<compile_context>
chip_gen: v7x
topology: tpu7x:2x2x1
jax: 0.10.0
libtpu: 0.0.40
codegen_flags: <defaults>
</compile_context>

<pallas_src>
import jax
import jax.numpy as jnp
import numpy as np
from jax import lax
from jax.experimental import pallas as pl
from jax.experimental.pallas import tpu as pltpu


# ----------------------------------------------------------------------------
# Pallas kernel: one grid step == TS consecutive timesteps of the recurrence.
# ----------------------------------------------------------------------------
def _lm2_kernel(e_ref, q_ref, gin_ref, m0_ref,
                wkv_ref, bkv_ref, wof_ref, bof_ref,
                e_out_ref, m_out_ref):
    ts, B, d = e_ref.shape
    BN, dd = m_out_ref.shape          # (B*N, d*d) flat, lane-dense state
    N = BN // B
    cdt = wkv_ref.dtype               # matmul operand dtype (bf16 or f32)
    inv_sqrt_d = float(1.0 / (d ** 0.5))

    # Initialize the VMEM-resident recurrent state once (first grid step only).
    @pl.when(pl.program_id(0) == 0)
    def _():
        m_out_ref[...] = m0_ref[...]

    # Hoist weight/bias loads out of the per-timestep loop.
    w_kv = wkv_ref[...]
    b_kv = bkv_ref[...].astype(jnp.float32)
    w_of = wof_ref[...]
    b_of = bof_ref[...].astype(jnp.float32)

    def expand_gate(x):
        # (B, d) -> (B*N, d*d): value x[b, i] placed at [b*N + n, i*d + j]
        # (matches the torch (B,1,d,1) broadcast on the flattened memory).
        xl = jnp.broadcast_to(x[:, :, None], (B, d, d)).reshape(B, dd)
        return jnp.broadcast_to(xl[:, None, :], (B, N, dd)).reshape(BN, dd)

    def step(tau, carry):
        m = m_out_ref[...]                           # (B*N, d*d) f32 state
        e_t = e_ref[tau].astype(jnp.float32)         # (B, d)
        q_t = q_ref[tau].astype(jnp.float32)         # (B, d)  = W_Q e_t + b_Q (hoisted)
        g_in = gin_ref[tau].astype(jnp.float32)      # (B, d)  = sigmoid(W_in e_t + b_in)

        # Fused K|V projection of the flat memory (bf16 operands, f32 accumulation).
        kv = jnp.dot(m.astype(cdt), w_kv,
                     preferred_element_type=jnp.float32) + b_kv        # (B*N, 2d)
        k3 = kv[:, :d].reshape(B, N, d)
        v3 = kv[:, d:].reshape(B, N, d)

        # Slot attention: contractions on the MXU, softmax reciprocal on the EUP.
        scores = jnp.einsum("bqd,bnd->bqn", q_t[:, None, :], k3,
                            preferred_element_type=jnp.float32) * inv_sqrt_d  # (B,1,N)
        scores = scores - jnp.max(scores, axis=-1, keepdims=True)
        p = jnp.exp(scores)
        probs = p * pl.reciprocal(jnp.sum(p, axis=-1, keepdims=True), approx=True)
        e_mem = jnp.einsum("bqn,bnd->bqd", probs, v3,
                           preferred_element_type=jnp.float32)[:, 0, :]       # (B, d)

        # Fused out|forget gates (one small matmul instead of two).
        of = jnp.dot(e_mem.astype(cdt), w_of,
                     preferred_element_type=jnp.float32) + b_of               # (B, 2d)
        g_out = jax.nn.sigmoid(of[:, :d])
        g_fg = jax.nn.sigmoid(of[:, d:])

        e_out_ref[tau] = (e_t + g_out * e_mem).astype(e_out_ref.dtype)

        # Gated memory update in the flat lane-dense layout; single store/step.
        add = expand_gate(g_in * jnp.tanh(e_mem))
        fgt = expand_gate(g_fg)
        # TODO(synk): for large B*N*d*d states, chunk this update over row
        # blocks of m_out_ref to keep the live vreg set small (no spills).
        m_out_ref[...] = add + fgt * m
        return carry

    lax.fori_loop(0, ts, step, 0, unroll=True)


# ----------------------------------------------------------------------------
# Wrapper: hoisted projections, fused weight packing, pallas_call.
# ----------------------------------------------------------------------------
def lm2_memory_forward(E, M0, params, *, ts=None, compute_dtype=jnp.bfloat16):
    """E: (B, S, d) f32, M0: (B, N, d, d) f32 -> (E_out (B,S,d), M_out (B,N,d,d))."""
    B, S, d = E.shape
    N = M0.shape[1]
    if ts is None:
        ts = min(S, 8)
    assert S % ts == 0, "ts must divide S"
    G = S // ts
    f32 = jnp.float32
    hp = jax.lax.Precision.HIGHEST

    # One small transpose to seq-major so the kernel indexes timesteps on the
    # leading axis; the hoisted projections below reuse it (no extra passes).
    E_sm = jnp.transpose(E, (1, 0, 2)).astype(f32)                      # (S, B, d)

    # Hoisted e_t-only projections: single (S*B, d) @ (d, 2d) matmul.
    w_qi = jnp.concatenate([params["wq"], params["wi"]], axis=1)        # (d, 2d)
    b_qi = jnp.concatenate([params["bq"], params["bi"]], axis=1)        # (1, 2d)
    qi = jnp.dot(E_sm.reshape(S * B, d), w_qi, precision=hp) + b_qi     # (S*B, 2d)
    Q_sm = qi[:, :d].reshape(S, B, d)
    Gin_sm = jax.nn.sigmoid(qi[:, d:]).reshape(S, B, d)

    # Fused in-kernel weights (bf16 operands; f32 biases / accumulation).
    w_kv = jnp.concatenate([params["wk"], params["wv"]], axis=1).astype(compute_dtype)  # (d*d, 2d)
    b_kv = jnp.concatenate([params["bk"], params["bv"]], axis=1).astype(f32)            # (1, 2d)
    w_of = jnp.concatenate([params["wo"], params["wf"]], axis=1).astype(compute_dtype)  # (d, 2d)
    b_of = jnp.concatenate([params["bo"], params["bf"]], axis=1).astype(f32)            # (1, 2d)

    # Flat lane-dense recurrent state (row-major == torch .view).
    M0_flat = M0.reshape(B * N, d * d).astype(f32)

    stream_spec = lambda: pl.BlockSpec((ts, B, d), lambda g: (g, 0, 0))
    full2 = lambda g: (0, 0)

    in_specs = [
        stream_spec(),                                   # E (seq-major)
        stream_spec(),                                   # Q (precomputed)
        stream_spec(),                                   # g_in (precomputed)
        pl.BlockSpec((B * N, d * d), full2),             # M0 (flat)
        pl.BlockSpec((d * d, 2 * d), full2),             # W_K | W_V
        pl.BlockSpec((1, 2 * d), full2),                 # b_K | b_V
        pl.BlockSpec((d, 2 * d), full2),                 # W_out | W_forget
        pl.BlockSpec((1, 2 * d), full2),                 # b_out | b_forget
    ]
    out_specs = [
        stream_spec(),                                   # E_out (seq-major)
        pl.BlockSpec((B * N, d * d), full2),             # M_out: VMEM-resident state
    ]

    # Explicit VMEM budget with headroom (matters most on v7x's 64 MiB VMEM).
    w_itemsize = jnp.dtype(compute_dtype).itemsize
    state_b = B * N * d * d * 4
    stream_b = ts * B * d * 4
    weight_b = (d * d * 2 * d + d * 2 * d) * w_itemsize + 2 * (2 * d) * 4
    vmem_limit = int(min(max(2 * state_b + 2 * weight_b + 8 * stream_b + (4 << 20),
                             8 << 20), 64 << 20))

    e_out_sm, m_out_flat = pl.pallas_call(
        _lm2_kernel,
        out_shape=(jax.ShapeDtypeStruct((S, B, d), E.dtype),
                   jax.ShapeDtypeStruct((B * N, d * d), M0.dtype)),
        grid_spec=pltpu.PrefetchScalarGridSpec(
            num_scalar_prefetch=0,
            grid=(G,),
            in_specs=in_specs,
            out_specs=out_specs,
        ),
        compiler_params=pltpu.CompilerParams(
            dimension_semantics=("arbitrary",),          # time recurrence -> sequential
            vmem_limit_bytes=vmem_limit,
        ),
        # TODO(synk): on v7x, add a leading "parallel" batch grid axis to split B
        # across the two TensorCores once (B//2)*N satisfies the sublane tiling.
    )(E_sm, Q_sm, Gin_sm, M0_flat, w_kv, b_kv, w_of, b_of)

    return jnp.transpose(e_out_sm, (1, 0, 2)), m_out_flat.reshape(B, N, d, d)


# ----------------------------------------------------------------------------
# Pure-JAX reference (mirrors the PyTorch forward) for verification.
# ----------------------------------------------------------------------------
def lm2_memory_reference(E, M0, params):
    B, S, d = E.shape
    N = M0.shape[1]
    hp = jax.lax.Precision.HIGHEST

    def step(M, e_t):
        Q = jnp.dot(e_t, params["wq"], precision=hp) + params["bq"]
        Mf = M.reshape(B, N, d * d)
        K = jnp.dot(Mf, params["wk"], precision=hp) + params["bk"]
        V = jnp.dot(Mf, params["wv"], precision=hp) + params["bv"]
        scores = jnp.einsum("bd,bnd->bn", Q, K, precision=hp) / (d ** 0.5)
        probs = jax.nn.softmax(scores, axis=-1)
        E_mem = jnp.einsum("bn,bnd->bd", probs, V, precision=hp)
        g_out = jax.nn.sigmoid(jnp.dot(E_mem, params["wo"], precision=hp) + params["bo"])
        e_new = e_t + g_out * E_mem
        g_in = jax.nn.sigmoid(jnp.dot(e_t, params["wi"], precision=hp) + params["bi"])
        g_fg = jax.nn.sigmoid(jnp.dot(E_mem, params["wf"], precision=hp) + params["bf"])
        ni = jnp.tanh(E_mem)
        M_new = (g_in[:, None, :, None] * ni[:, None, :, None]
                 + g_fg[:, None, :, None] * M)
        return M_new, e_new

    M_fin, E_steps = jax.lax.scan(step, M0, jnp.transpose(E, (1, 0, 2)))
    return jnp.transpose(E_steps, (1, 0, 2)), M_fin


# ----------------------------------------------------------------------------
# Deterministic parameter init (mimics torch.nn.Linear uniform init; weights
# stored pre-transposed as (in_features, out_features) so code does x @ W).
# ----------------------------------------------------------------------------
def init_params(key, d_model):
    d = d_model

    def linear(k, fan_in, fan_out):
        kw, kb = jax.random.split(k)
        lim = 1.0 / np.sqrt(fan_in)
        w = jax.random.uniform(kw, (fan_in, fan_out), jnp.float32, -lim, lim)
        b = jax.random.uniform(kb, (1, fan_out), jnp.float32, -lim, lim)
        return w, b

    ks = jax.random.split(key, 6)
    wq, bq = linear(ks[0], d, d)
    wk, bk = linear(ks[1], d * d, d)
    wv, bv = linear(ks[2], d * d, d)
    wo, bo = linear(ks[3], d, d)
    wf, bf = linear(ks[4], d, d)
    wi, bi = linear(ks[5], d, d)
    return dict(wq=wq, bq=bq, wk=wk, bk=bk, wv=wv, bv=bv,
                wo=wo, bo=bo, wf=wf, bf=bf, wi=wi, bi=bi)


if __name__ == "__main__":
    B, S, d_model, num_slots = 2, 8, 16, 4

    key = jax.random.PRNGKey(0)
    k_param, k_inp = jax.random.split(key)

    params = init_params(k_param, d_model)
    E = jax.random.normal(k_inp, (B, S, d_model), jnp.float32)
    # M_t is None in the PyTorch forward's default path -> identity per slot
    M0 = jnp.broadcast_to(jnp.eye(d_model, dtype=jnp.float32),
                          (B, num_slots, d_model, d_model))

    E_ref, M_ref = lm2_memory_reference(E, M0, params)

    # f32 operand path: tight check of structure/semantics.
    E_f32, M_f32 = lm2_memory_forward(E, M0, params, ts=4, compute_dtype=jnp.float32)
    jax.block_until_ready((E_f32, M_f32))
    np.testing.assert_allclose(np.asarray(E_f32), np.asarray(E_ref), atol=2e-3, rtol=2e-3)
    np.testing.assert_allclose(np.asarray(M_f32), np.asarray(M_ref), atol=2e-3, rtol=2e-3)

    # bf16 operand path (default / performance configuration): loose check.
    E_bf, M_bf = lm2_memory_forward(E, M0, params, ts=4, compute_dtype=jnp.bfloat16)
    jax.block_until_ready((E_bf, M_bf))
    np.testing.assert_allclose(np.asarray(E_bf), np.asarray(E_ref), atol=5e-2, rtol=5e-2)
    np.testing.assert_allclose(np.asarray(M_bf), np.asarray(M_ref), atol=5e-2, rtol=5e-2)

    print("KERNEL_OK")
</pallas_src>

<mosaic_0001>
module attributes {stable_mosaic.version = 11 : i64} {
  func.func @_lm2_kernel(%arg0: i32, %arg1: memref<4x2x16xf32, #tpu.memory_space<vmem>>, %arg2: memref<4x2x16xf32, #tpu.memory_space<vmem>>, %arg3: memref<4x2x16xf32, #tpu.memory_space<vmem>>, %arg4: memref<8x256xf32, #tpu.memory_space<vmem>>, %arg5: memref<256x32xf32, #tpu.memory_space<vmem>>, %arg6: memref<1x32xf32, #tpu.memory_space<vmem>>, %arg7: memref<16x32xf32, #tpu.memory_space<vmem>>, %arg8: memref<1x32xf32, #tpu.memory_space<vmem>>, %arg9: memref<4x2x16xf32, #tpu.memory_space<vmem>>, %arg10: memref<8x256xf32, #tpu.memory_space<vmem>>) attributes {dimension_semantics = [#tpu.dimension_semantics<arbitrary>], iteration_bounds = array<i64: 2>, scalar_prefetch = 0 : i64, scratch_operands = 0 : i64, tpu.core_type = #tpu.core_type<tc>, window_params = [{transform_indices = @transform_0, window_bounds = array<i64: 4, 2, 16>}, {transform_indices = @transform_1, window_bounds = array<i64: 4, 2, 16>}, {transform_indices = @transform_2, window_bounds = array<i64: 4, 2, 16>}, {pipeline_mode = #tpu.pipeline_mode<synchronous>, transform_indices = @transform_3, window_bounds = array<i64: 8, 256>}, {pipeline_mode = #tpu.pipeline_mode<synchronous>, transform_indices = @transform_4, window_bounds = array<i64: 256, 32>}, {pipeline_mode = #tpu.pipeline_mode<synchronous>, transform_indices = @transform_5, window_bounds = array<i64: 1, 32>}, {pipeline_mode = #tpu.pipeline_mode<synchronous>, transform_indices = @transform_6, window_bounds = array<i64: 16, 32>}, {pipeline_mode = #tpu.pipeline_mode<synchronous>, transform_indices = @transform_7, window_bounds = array<i64: 1, 32>}, {transform_indices = @transform_8, window_bounds = array<i64: 4, 2, 16>}, {pipeline_mode = #tpu.pipeline_mode<synchronous>, transform_indices = @transform_9, window_bounds = array<i64: 8, 256>}]} {
    %c0_i32 = arith.constant 0 : i32
    %0 = arith.cmpi eq, %arg0, %c0_i32 : i32
    %1 = arith.extui %0 : i1 to i32
    %c0_i32_0 = arith.constant 0 : i32
    %2 = arith.cmpi ne, %1, %c0_i32_0 : i32
    scf.if %2 {
      %c0_92 = arith.constant 0 : index
      %c0_93 = arith.constant 0 : index
      %307 = vector.load %arg4[%c0_92, %c0_93] : memref<8x256xf32, #tpu.memory_space<vmem>>, vector<8x256xf32>
      %c0_94 = arith.constant 0 : index
      %c0_95 = arith.constant 0 : index
      %308 = vector.load %arg10[%c0_94, %c0_95] : memref<8x256xf32, #tpu.memory_space<vmem>>, vector<8x256xf32>
      tpu.vector_store %arg10[%c0_94, %c0_95], %307 {strides = array<i32>} : memref<8x256xf32, #tpu.memory_space<vmem>>, vector<8x256xf32>,
    } else {
    }
    %c0 = arith.constant 0 : index
    %c0_1 = arith.constant 0 : index
    %3 = vector.load %arg5[%c0, %c0_1] : memref<256x32xf32, #tpu.memory_space<vmem>>, vector<256x32xf32>
    %c0_2 = arith.constant 0 : index
    %c0_3 = arith.constant 0 : index
    %4 = vector.load %arg6[%c0_2, %c0_3] : memref<1x32xf32, #tpu.memory_space<vmem>>, vector<1x32xf32>
    %c0_4 = arith.constant 0 : index
    %c0_5 = arith.constant 0 : index
    %5 = vector.load %arg7[%c0_4, %c0_5] : memref<16x32xf32, #tpu.memory_space<vmem>>, vector<16x32xf32>
    %c0_6 = arith.constant 0 : index
    %c0_7 = arith.constant 0 : index
    %6 = vector.load %arg8[%c0_6, %c0_7] : memref<1x32xf32, #tpu.memory_space<vmem>>, vector<1x32xf32>
    %c0_i32_8 = arith.constant 0 : i32
    %c0_9 = arith.constant 0 : index
    %c0_10 = arith.constant 0 : index
    %7 = vector.load %arg10[%c0_9, %c0_10] : memref<8x256xf32, #tpu.memory_space<vmem>>, vector<8x256xf32>
    %8 = arith.index_cast %c0_i32_8 : i32 to index
    %c0_11 = arith.constant 0 : index
    %c0_12 = arith.constant 0 : index
    %9 = vector.load %arg1[%8, %c0_11, %c0_12] : memref<4x2x16xf32, #tpu.memory_space<vmem>>, vector<1x2x16xf32>
    %10 = vector.shape_cast %9 : vector<1x2x16xf32> to vector<2x16xf32>
    %11 = arith.index_cast %c0_i32_8 : i32 to index
    %c0_13 = arith.constant 0 : index
    %c0_14 = arith.constant 0 : index
    %12 = vector.load %arg2[%11, %c0_13, %c0_14] : memref<4x2x16xf32, #tpu.memory_space<vmem>>, vector<1x2x16xf32>
    %13 = vector.shape_cast %12 : vector<1x2x16xf32> to vector<2x16xf32>
    %14 = arith.index_cast %c0_i32_8 : i32 to index
    %c0_15 = arith.constant 0 : index
    %c0_16 = arith.constant 0 : index
    %15 = vector.load %arg3[%14, %c0_15, %c0_16] : memref<4x2x16xf32, #tpu.memory_space<vmem>>, vector<1x2x16xf32>
    %16 = vector.shape_cast %15 : vector<1x2x16xf32> to vector<2x16xf32>
    %cst = arith.constant dense<0.000000e+00> : vector<8x32xf32>
    %17 = tpu.matmul %7, %3, %cst {dimension_numbers = #tpu.dot_dimension_numbers<[1], [0], [0], [1], [0, 0, 1, 1], [], []>} : vector<8x256xf32>, vector<256x32xf32>, vector<8x32xf32> -> vector<8x32xf32>
    %18 = vector.broadcast %4 : vector<1x32xf32> to vector<8x32xf32>
    %19 = arith.addf %17, %18 : vector<8x32xf32>
    %20 = vector.extract_strided_slice %19 {offsets = [0, 0], sizes = [8, 16], strides = [1, 1]} : vector<8x32xf32> to vector<8x16xf32>
    %21 = vector.shape_cast %20 : vector<8x16xf32> to vector<2x4x16xf32>
    %22 = vector.extract_strided_slice %19 {offsets = [0, 16], sizes = [8, 16], strides = [1, 1]} : vector<8x32xf32> to vector<8x16xf32>
    %23 = vector.shape_cast %22 : vector<8x16xf32> to vector<2x4x16xf32>
    %24 = vector.shape_cast %13 : vector<2x16xf32> to vector<2x1x16xf32>
    "tpu.trace_start"() <{level = 10 : i32, message = "bqd,bnd->bqn"}> : () -> ()
    %cst_17 = arith.constant dense<0.000000e+00> : vector<2x1x4xf32>
    %25 = tpu.matmul %24, %21, %cst_17 {dimension_numbers = #tpu.dot_dimension_numbers<[2], [2], [1], [1], [0, 0, 0, 1, 1, 1], [0], [0]>} : vector<2x1x16xf32>, vector<2x4x16xf32>, vector<2x1x4xf32> -> vector<2x1x4xf32>
    "tpu.trace_stop"() : () -> ()
    %cst_18 = arith.constant 2.500000e-01 : f32
    %26 = vector.broadcast %cst_18 : f32 to vector<2x1x4xf32>
    %27 = arith.mulf %25, %26 : vector<2x1x4xf32>
    %cst_19 = arith.constant dense<0xFF800000> : vector<2x1xf32>
    %28 = vector.multi_reduction <maximumf>, %27, %cst_19 [2] : vector<2x1x4xf32> to vector<2x1xf32>
    %29 = vector.shape_cast %28 : vector<2x1xf32> to vector<2x1x1xf32>
    %30 = vector.broadcast %29 : vector<2x1x1xf32> to vector<2x1x4xf32>
    %31 = arith.subf %27, %30 : vector<2x1x4xf32>
    %32 = math.exp %31 : vector<2x1x4xf32>
    %cst_20 = arith.constant dense<0.000000e+00> : vector<2x1xf32>
    %33 = vector.multi_reduction <add>, %32, %cst_20 [2] : vector<2x1x4xf32> to vector<2x1xf32>
    %34 = vector.shape_cast %33 : vector<2x1xf32> to vector<2x1x1xf32>
    %35 = tpu.reciprocal %34 {approx = true} : vector<2x1x1xf32> -> vector<2x1x1xf32>
    %36 = vector.broadcast %35 : vector<2x1x1xf32> to vector<2x1x4xf32>
    %37 = arith.mulf %32, %36 : vector<2x1x4xf32>
    "tpu.trace_start"() <{level = 10 : i32, message = "bqn,bnd->bqd"}> : () -> ()
    %cst_21 = arith.constant dense<0.000000e+00> : vector<2x1x16xf32>
    %38 = tpu.matmul %37, %23, %cst_21 {dimension_numbers = #tpu.dot_dimension_numbers<[2], [1], [1], [2], [0, 0, 0, 1, 1, 2], [0], [0]>} : vector<2x1x4xf32>, vector<2x4x16xf32>, vector<2x1x16xf32> -> vector<2x1x16xf32>
    "tpu.trace_stop"() : () -> ()
    %39 = vector.shape_cast %38 : vector<2x1x16xf32> to vector<2x16xf32>
    %cst_22 = arith.constant dense<0.000000e+00> : vector<2x32xf32>
    %40 = tpu.matmul %39, %5, %cst_22 {dimension_numbers = #tpu.dot_dimension_numbers<[1], [0], [0], [1], [0, 0, 1, 1], [], []>} : vector<2x16xf32>, vector<16x32xf32>, vector<2x32xf32> -> vector<2x32xf32>
    %41 = vector.broadcast %6 : vector<1x32xf32> to vector<2x32xf32>
    %42 = arith.addf %40, %41 : vector<2x32xf32>
    %43 = vector.extract_strided_slice %42 {offsets = [0, 0], sizes = [2, 16], strides = [1, 1]} : vector<2x32xf32> to vector<2x16xf32>
    %44 = arith.negf %43 : vector<2x16xf32>
    %45 = math.exp %44 : vector<2x16xf32>
    %cst_23 = arith.constant 1.000000e+00 : f32
    %46 = vector.broadcast %cst_23 : f32 to vector<2x16xf32>
    %47 = arith.addf %46, %45 : vector<2x16xf32>
    %48 = arith.divf %46, %47 : vector<2x16xf32>
    %49 = vector.extract_strided_slice %42 {offsets = [0, 16], sizes = [2, 16], strides = [1, 1]} : vector<2x32xf32> to vector<2x16xf32>
    %50 = arith.negf %49 : vector<2x16xf32>
    %51 = math.exp %50 : vector<2x16xf32>
    %cst_24 = arith.constant 1.000000e+00 : f32
    %52 = vector.broadcast %cst_24 : f32 to vector<2x16xf32>
    %53 = arith.addf %52, %51 : vector<2x16xf32>
    %54 = arith.divf %52, %53 : vector<2x16xf32>
    %55 = arith.mulf %48, %39 : vector<2x16xf32>
    %56 = arith.addf %10, %55 : vector<2x16xf32>
    %57 = arith.index_cast %c0_i32_8 : i32 to index
    %c0_25 = arith.constant 0 : index
    %c0_26 = arith.constant 0 : index
    %58 = vector.load %arg9[%57, %c0_25, %c0_26] : memref<4x2x16xf32, #tpu.memory_space<vmem>>, vector<1x2x16xf32>
    %59 = vector.shape_cast %58 : vector<1x2x16xf32> to vector<2x16xf32>
    %60 = vector.shape_cast %56 : vector<2x16xf32> to vector<1x2x16xf32>
    tpu.vector_store %arg9[%57, %c0_25, %c0_26], %60 {strides = array<i32>} : memref<4x2x16xf32, #tpu.memory_space<vmem>>, vector<1x2x16xf32>,
    %61 = math.tanh %39 : vector<2x16xf32>
    %62 = arith.mulf %16, %61 : vector<2x16xf32>
    %63 = vector.shape_cast %62 : vector<2x16xf32> to vector<2x16x1xf32>
    %64 = vector.shape_cast %63 : vector<2x16x1xf32> to vector<2x16x1xf32>
    %65 = vector.broadcast %64 : vector<2x16x1xf32> to vector<2x16x16xf32>
    %66 = vector.shape_cast %65 : vector<2x16x16xf32> to vector<2x256xf32>
    %67 = vector.shape_cast %66 : vector<2x256xf32> to vector<2x1x256xf32>
    %68 = vector.shape_cast %67 : vector<2x1x256xf32> to vector<2x1x256xf32>
    %69 = vector.broadcast %68 : vector<2x1x256xf32> to vector<2x4x256xf32>
    %70 = vector.shape_cast %69 : vector<2x4x256xf32> to vector<8x256xf32>
    %71 = vector.shape_cast %54 : vector<2x16xf32> to vector<2x16x1xf32>
    %72 = vector.shape_cast %71 : vector<2x16x1xf32> to vector<2x16x1xf32>
    %73 = vector.broadcast %72 : vector<2x16x1xf32> to vector<2x16x16xf32>
    %74 = vector.shape_cast %73 : vector<2x16x16xf32> to vector<2x256xf32>
    %75 = vector.shape_cast %74 : vector<2x256xf32> to vector<2x1x256xf32>
    %76 = vector.shape_cast %75 : vector<2x1x256xf32> to vector<2x1x256xf32>
    %77 = vector.broadcast %76 : vector<2x1x256xf32> to vector<2x4x256xf32>
    %78 = vector.shape_cast %77 : vector<2x4x256xf32> to vector<8x256xf32>
    %79 = arith.mulf %78, %7 : vector<8x256xf32>
    %80 = arith.addf %70, %79 : vector<8x256xf32>
    %c0_27 = arith.constant 0 : index
    %c0_28 = arith.constant 0 : index
    %81 = vector.load %arg10[%c0_27, %c0_28] : memref<8x256xf32, #tpu.memory_space<vmem>>, vector<8x256xf32>
    tpu.vector_store %arg10[%c0_27, %c0_28], %80 {strides = array<i32>} : memref<8x256xf32, #tpu.memory_space<vmem>>, vector<8x256xf32>,
    %c1_i32 = arith.constant 1 : i32
    %c0_29 = arith.constant 0 : index
    %c0_30 = arith.constant 0 : index
    %82 = vector.load %arg10[%c0_29, %c0_30] : memref<8x256xf32, #tpu.memory_space<vmem>>, vector<8x256xf32>
    %83 = arith.index_cast %c1_i32 : i32 to index
    %c0_31 = arith.constant 0 : index
    %c0_32 = arith.constant 0 : index
    %84 = vector.load %arg1[%83, %c0_31, %c0_32] : memref<4x2x16xf32, #tpu.memory_space<vmem>>, vector<1x2x16xf32>
    %85 = vector.shape_cast %84 : vector<1x2x16xf32> to vector<2x16xf32>
    %86 = arith.index_cast %c1_i32 : i32 to index
    %c0_33 = arith.constant 0 : index
    %c0_34 = arith.constant 0 : index
    %87 = vector.load %arg2[%86, %c0_33, %c0_34] : memref<4x2x16xf32, #tpu.memory_space<vmem>>, vector<1x2x16xf32>
    %88 = vector.shape_cast %87 : vector<1x2x16xf32> to vector<2x16xf32>
    %89 = arith.index_cast %c1_i32 : i32 to index
    %c0_35 = arith.constant 0 : index
    %c0_36 = arith.constant 0 : index
    %90 = vector.load %arg3[%89, %c0_35, %c0_36] : memref<4x2x16xf32, #tpu.memory_space<vmem>>, vector<1x2x16xf32>
    %91 = vector.shape_cast %90 : vector<1x2x16xf32> to vector<2x16xf32>
    %cst_37 = arith.constant dense<0.000000e+00> : vector<8x32xf32>
    %92 = tpu.matmul %82, %3, %cst_37 {dimension_numbers = #tpu.dot_dimension_numbers<[1], [0], [0], [1], [0, 0, 1, 1], [], []>} : vector<8x256xf32>, vector<256x32xf32>, vector<8x32xf32> -> vector<8x32xf32>
    %93 = vector.broadcast %4 : vector<1x32xf32> to vector<8x32xf32>
    %94 = arith.addf %92, %93 : vector<8x32xf32>
    %95 = vector.extract_strided_slice %94 {offsets = [0, 0], sizes = [8, 16], strides = [1, 1]} : vector<8x32xf32> to vector<8x16xf32>
    %96 = vector.shape_cast %95 : vector<8x16xf32> to vector<2x4x16xf32>
    %97 = vector.extract_strided_slice %94 {offsets = [0, 16], sizes = [8, 16], strides = [1, 1]} : vector<8x32xf32> to vector<8x16xf32>
    %98 = vector.shape_cast %97 : vector<8x16xf32> to vector<2x4x16xf32>
    %99 = vector.shape_cast %88 : vector<2x16xf32> to vector<2x1x16xf32>
    "tpu.trace_start"() <{level = 10 : i32, message = "bqd,bnd->bqn"}> : () -> ()
    %cst_38 = arith.constant dense<0.000000e+00> : vector<2x1x4xf32>
    %100 = tpu.matmul %99, %96, %cst_38 {dimension_numbers = #tpu.dot_dimension_numbers<[2], [2], [1], [1], [0, 0, 0, 1, 1, 1], [0], [0]>} : vector<2x1x16xf32>, vector<2x4x16xf32>, vector<2x1x4xf32> -> vector<2x1x4xf32>
    "tpu.trace_stop"() : () -> ()
    %cst_39 = arith.constant 2.500000e-01 : f32
    %101 = vector.broadcast %cst_39 : f32 to vector<2x1x4xf32>
    %102 = arith.mulf %100, %101 : vector<2x1x4xf32>
    %cst_40 = arith.constant dense<0xFF800000> : vector<2x1xf32>
    %103 = vector.multi_reduction <maximumf>, %102, %cst_40 [2] : vector<2x1x4xf32> to vector<2x1xf32>
    %104 = vector.shape_cast %103 : vector<2x1xf32> to vector<2x1x1xf32>
    %105 = vector.broadcast %104 : vector<2x1x1xf32> to vector<2x1x4xf32>
    %106 = arith.subf %102, %105 : vector<2x1x4xf32>
    %107 = math.exp %106 : vector<2x1x4xf32>
    %cst_41 = arith.constant dense<0.000000e+00> : vector<2x1xf32>
    %108 = vector.multi_reduction <add>, %107, %cst_41 [2] : vector<2x1x4xf32> to vector<2x1xf32>
    %109 = vector.shape_cast %108 : vector<2x1xf32> to vector<2x1x1xf32>
    %110 = tpu.reciprocal %109 {approx = true} : vector<2x1x1xf32> -> vector<2x1x1xf32>
    %111 = vector.broadcast %110 : vector<2x1x1xf32> to vector<2x1x4xf32>
    %112 = arith.mulf %107, %111 : vector<2x1x4xf32>
    "tpu.trace_start"() <{level = 10 : i32, message = "bqn,bnd->bqd"}> : () -> ()
    %cst_42 = arith.constant dense<0.000000e+00> : vector<2x1x16xf32>
    %113 = tpu.matmul %112, %98, %cst_42 {dimension_numbers = #tpu.dot_dimension_numbers<[2], [1], [1], [2], [0, 0, 0, 1, 1, 2], [0], [0]>} : vector<2x1x4xf32>, vector<2x4x16xf32>, vector<2x1x16xf32> -> vector<2x1x16xf32>
    "tpu.trace_stop"() : () -> ()
    %114 = vector.shape_cast %113 : vector<2x1x16xf32> to vector<2x16xf32>
    %cst_43 = arith.constant dense<0.000000e+00> : vector<2x32xf32>
    %115 = tpu.matmul %114, %5, %cst_43 {dimension_numbers = #tpu.dot_dimension_numbers<[1], [0], [0], [1], [0, 0, 1, 1], [], []>} : vector<2x16xf32>, vector<16x32xf32>, vector<2x32xf32> -> vector<2x32xf32>
    %116 = vector.broadcast %6 : vector<1x32xf32> to vector<2x32xf32>
    %117 = arith.addf %115, %116 : vector<2x32xf32>
    %118 = vector.extract_strided_slice %117 {offsets = [0, 0], sizes = [2, 16], strides = [1, 1]} : vector<2x32xf32> to vector<2x16xf32>
    %119 = arith.negf %118 : vector<2x16xf32>
    %120 = math.exp %119 : vector<2x16xf32>
    %cst_44 = arith.constant 1.000000e+00 : f32
    %121 = vector.broadcast %cst_44 : f32 to vector<2x16xf32>
    %122 = arith.addf %121, %120 : vector<2x16xf32>
    %123 = arith.divf %121, %122 : vector<2x16xf32>
    %124 = vector.extract_strided_slice %117 {offsets = [0, 16], sizes = [2, 16], strides = [1, 1]} : vector<2x32xf32> to vector<2x16xf32>
    %125 = arith.negf %124 : vector<2x16xf32>
    %126 = math.exp %125 : vector<2x16xf32>
    %cst_45 = arith.constant 1.000000e+00 : f32
    %127 = vector.broadcast %cst_45 : f32 to vector<2x16xf32>
    %128 = arith.addf %127, %126 : vector<2x16xf32>
    %129 = arith.divf %127, %128 : vector<2x16xf32>
    %130 = arith.mulf %123, %114 : vector<2x16xf32>
    %131 = arith.addf %85, %130 : vector<2x16xf32>
    %132 = arith.index_cast %c1_i32 : i32 to index
    %c0_46 = arith.constant 0 : index
    %c0_47 = arith.constant 0 : index
    %133 = vector.load %arg9[%132, %c0_46, %c0_47] : memref<4x2x16xf32, #tpu.memory_space<vmem>>, vector<1x2x16xf32>
    %134 = vector.shape_cast %133 : vector<1x2x16xf32> to vector<2x16xf32>
    %135 = vector.shape_cast %131 : vector<2x16xf32> to vector<1x2x16xf32>
    tpu.vector_store %arg9[%132, %c0_46, %c0_47], %135 {strides = array<i32>} : memref<4x2x16xf32, #tpu.memory_space<vmem>>, vector<1x2x16xf32>,
    %136 = math.tanh %114 : vector<2x16xf32>
    %137 = arith.mulf %91, %136 : vector<2x16xf32>
    %138 = vector.shape_cast %137 : vector<2x16xf32> to vector<2x16x1xf32>
    %139 = vector.shape_cast %138 : vector<2x16x1xf32> to vector<2x16x1xf32>
    %140 = vector.broadcast %139 : vector<2x16x1xf32> to vector<2x16x16xf32>
    %141 = vector.shape_cast %140 : vector<2x16x16xf32> to vector<2x256xf32>
    %142 = vector.shape_cast %141 : vector<2x256xf32> to vector<2x1x256xf32>
    %143 = vector.shape_cast %142 : vector<2x1x256xf32> to vector<2x1x256xf32>
    %144 = vector.broadcast %143 : vector<2x1x256xf32> to vector<2x4x256xf32>
    %145 = vector.shape_cast %144 : vector<2x4x256xf32> to vector<8x256xf32>
    %146 = vector.shape_cast %129 : vector<2x16xf32> to vector<2x16x1xf32>
    %147 = vector.shape_cast %146 : vector<2x16x1xf32> to vector<2x16x1xf32>
    %148 = vector.broadcast %147 : vector<2x16x1xf32> to vector<2x16x16xf32>
    %149 = vector.shape_cast %148 : vector<2x16x16xf32> to vector<2x256xf32>
    %150 = vector.shape_cast %149 : vector<2x256xf32> to vector<2x1x256xf32>
    %151 = vector.shape_cast %150 : vector<2x1x256xf32> to vector<2x1x256xf32>
    %152 = vector.broadcast %151 : vector<2x1x256xf32> to vector<2x4x256xf32>
    %153 = vector.shape_cast %152 : vector<2x4x256xf32> to vector<8x256xf32>
    %154 = arith.mulf %153, %82 : vector<8x256xf32>
    %155 = arith.addf %145, %154 : vector<8x256xf32>
    %c0_48 = arith.constant 0 : index
    %c0_49 = arith.constant 0 : index
    %156 = vector.load %arg10[%c0_48, %c0_49] : memref<8x256xf32, #tpu.memory_space<vmem>>, vector<8x256xf32>
    tpu.vector_store %arg10[%c0_48, %c0_49], %155 {strides = array<i32>} : memref<8x256xf32, #tpu.memory_space<vmem>>, vector<8x256xf32>,
    %c2_i32 = arith.constant 2 : i32
    %c0_50 = arith.constant 0 : index
    %c0_51 = arith.constant 0 : index
    %157 = vector.load %arg10[%c0_50, %c0_51] : memref<8x256xf32, #tpu.memory_space<vmem>>, vector<8x256xf32>
    %158 = arith.index_cast %c2_i32 : i32 to index
    %c0_52 = arith.constant 0 : index
    %c0_53 = arith.constant 0 : index
    %159 = vector.load %arg1[%158, %c0_52, %c0_53] : memref<4x2x16xf32, #tpu.memory_space<vmem>>, vector<1x2x16xf32>
    %160 = vector.shape_cast %159 : vector<1x2x16xf32> to vector<2x16xf32>
    %161 = arith.index_cast %c2_i32 : i32 to index
    %c0_54 = arith.constant 0 : index
    %c0_55 = arith.constant 0 : index
    %162 = vector.load %arg2[%161, %c0_54, %c0_55] : memref<4x2x16xf32, #tpu.memory_space<vmem>>, vector<1x2x16xf32>
    %163 = vector.shape_cast %162 : vector<1x2x16xf32> to vector<2x16xf32>
    %164 = arith.index_cast %c2_i32 : i32 to index
    %c0_56 = arith.constant 0 : index
    %c0_57 = arith.constant 0 : index
    %165 = vector.load %arg3[%164, %c0_56, %c0_57] : memref<4x2x16xf32, #tpu.memory_space<vmem>>, vector<1x2x16xf32>
    %166 = vector.shape_cast %165 : vector<1x2x16xf32> to vector<2x16xf32>
    %cst_58 = arith.constant dense<0.000000e+00> : vector<8x32xf32>
    %167 = tpu.matmul %157, %3, %cst_58 {dimension_numbers = #tpu.dot_dimension_numbers<[1], [0], [0], [1], [0, 0, 1, 1], [], []>} : vector<8x256xf32>, vector<256x32xf32>, vector<8x32xf32> -> vector<8x32xf32>
    %168 = vector.broadcast %4 : vector<1x32xf32> to vector<8x32xf32>
    %169 = arith.addf %167, %168 : vector<8x32xf32>
    %170 = vector.extract_strided_slice %169 {offsets = [0, 0], sizes = [8, 16], strides = [1, 1]} : vector<8x32xf32> to vector<8x16xf32>
    %171 = vector.shape_cast %170 : vector<8x16xf32> to vector<2x4x16xf32>
    %172 = vector.extract_strided_slice %169 {offsets = [0, 16], sizes = [8, 16], strides = [1, 1]} : vector<8x32xf32> to vector<8x16xf32>
    %173 = vector.shape_cast %172 : vector<8x16xf32> to vector<2x4x16xf32>
    %174 = vector.shape_cast %163 : vector<2x16xf32> to vector<2x1x16xf32>
    "tpu.trace_start"() <{level = 10 : i32, message = "bqd,bnd->bqn"}> : () -> ()
    %cst_59 = arith.constant dense<0.000000e+00> : vector<2x1x4xf32>
    %175 = tpu.matmul %174, %171, %cst_59 {dimension_numbers = #tpu.dot_dimension_numbers<[2], [2], [1], [1], [0, 0, 0, 1, 1, 1], [0], [0]>} : vector<2x1x16xf32>, vector<2x4x16xf32>, vector<2x1x4xf32> -> vector<2x1x4xf32>
    "tpu.trace_stop"() : () -> ()
    %cst_60 = arith.constant 2.500000e-01 : f32
    %176 = vector.broadcast %cst_60 : f32 to vector<2x1x4xf32>
    %177 = arith.mulf %175, %176 : vector<2x1x4xf32>
    %cst_61 = arith.constant dense<0xFF800000> : vector<2x1xf32>
    %178 = vector.multi_reduction <maximumf>, %177, %cst_61 [2] : vector<2x1x4xf32> to vector<2x1xf32>
    %179 = vector.shape_cast %178 : vector<2x1xf32> to vector<2x1x1xf32>
    %180 = vector.broadcast %179 : vector<2x1x1xf32> to vector<2x1x4xf32>
    %181 = arith.subf %177, %180 : vector<2x1x4xf32>
    %182 = math.exp %181 : vector<2x1x4xf32>
    %cst_62 = arith.constant dense<0.000000e+00> : vector<2x1xf32>
    %183 = vector.multi_reduction <add>, %182, %cst_62 [2] : vector<2x1x4xf32> to vector<2x1xf32>
    %184 = vector.shape_cast %183 : vector<2x1xf32> to vector<2x1x1xf32>
    %185 = tpu.reciprocal %184 {approx = true} : vector<2x1x1xf32> -> vector<2x1x1xf32>
    %186 = vector.broadcast %185 : vector<2x1x1xf32> to vector<2x1x4xf32>
    %187 = arith.mulf %182, %186 : vector<2x1x4xf32>
    "tpu.trace_start"() <{level = 10 : i32, message = "bqn,bnd->bqd"}> : () -> ()
    %cst_63 = arith.constant dense<0.000000e+00> : vector<2x1x16xf32>
    %188 = tpu.matmul %187, %173, %cst_63 {dimension_numbers = #tpu.dot_dimension_numbers<[2], [1], [1], [2], [0, 0, 0, 1, 1, 2], [0], [0]>} : vector<2x1x4xf32>, vector<2x4x16xf32>, vector<2x1x16xf32> -> vector<2x1x16xf32>
    "tpu.trace_stop"() : () -> ()
    %189 = vector.shape_cast %188 : vector<2x1x16xf32> to vector<2x16xf32>
    %cst_64 = arith.constant dense<0.000000e+00> : vector<2x32xf32>
    %190 = tpu.matmul %189, %5, %cst_64 {dimension_numbers = #tpu.dot_dimension_numbers<[1], [0], [0], [1], [0, 0, 1, 1], [], []>} : vector<2x16xf32>, vector<16x32xf32>, vector<2x32xf32> -> vector<2x32xf32>
    %191 = vector.broadcast %6 : vector<1x32xf32> to vector<2x32xf32>
    %192 = arith.addf %190, %191 : vector<2x32xf32>
    %193 = vector.extract_strided_slice %192 {offsets = [0, 0], sizes = [2, 16], strides = [1, 1]} : vector<2x32xf32> to vector<2x16xf32>
    %194 = arith.negf %193 : vector<2x16xf32>
    %195 = math.exp %194 : vector<2x16xf32>
    %cst_65 = arith.constant 1.000000e+00 : f32
    %196 = vector.broadcast %cst_65 : f32 to vector<2x16xf32>
    %197 = arith.addf %196, %195 : vector<2x16xf32>
    %198 = arith.divf %196, %197 : vector<2x16xf32>
    %199 = vector.extract_strided_slice %192 {offsets = [0, 16], sizes = [2, 16], strides = [1, 1]} : vector<2x32xf32> to vector<2x16xf32>
    %200 = arith.negf %199 : vector<2x16xf32>
    %201 = math.exp %200 : vector<2x16xf32>
    %cst_66 = arith.constant 1.000000e+00 : f32
    %202 = vector.broadcast %cst_66 : f32 to vector<2x16xf32>
    %203 = arith.addf %202, %201 : vector<2x16xf32>
    %204 = arith.divf %202, %203 : vector<2x16xf32>
    %205 = arith.mulf %198, %189 : vector<2x16xf32>
    %206 = arith.addf %160, %205 : vector<2x16xf32>
    %207 = arith.index_cast %c2_i32 : i32 to index
    %c0_67 = arith.constant 0 : index
    %c0_68 = arith.constant 0 : index
    %208 = vector.load %arg9[%207, %c0_67, %c0_68] : memref<4x2x16xf32, #tpu.memory_space<vmem>>, vector<1x2x16xf32>
    %209 = vector.shape_cast %208 : vector<1x2x16xf32> to vector<2x16xf32>
    %210 = vector.shape_cast %206 : vector<2x16xf32> to vector<1x2x16xf32>
    tpu.vector_store %arg9[%207, %c0_67, %c0_68], %210 {strides = array<i32>} : memref<4x2x16xf32, #tpu.memory_space<vmem>>, vector<1x2x16xf32>,
    %211 = math.tanh %189 : vector<2x16xf32>
    %212 = arith.mulf %166, %211 : vector<2x16xf32>
    %213 = vector.shape_cast %212 : vector<2x16xf32> to vector<2x16x1xf32>
    %214 = vector.shape_cast %213 : vector<2x16x1xf32> to vector<2x16x1xf32>
    %215 = vector.broadcast %214 : vector<2x16x1xf32> to vector<2x16x16xf32>
    %216 = vector.shape_cast %215 : vector<2x16x16xf32> to vector<2x256xf32>
    %217 = vector.shape_cast %216 : vector<2x256xf32> to vector<2x1x256xf32>
    %218 = vector.shape_cast %217 : vector<2x1x256xf32> to vector<2x1x256xf32>
    %219 = vector.broadcast %218 : vector<2x1x256xf32> to vector<2x4x256xf32>
    %220 = vector.shape_cast %219 : vector<2x4x256xf32> to vector<8x256xf32>
    %221 = vector.shape_cast %204 : vector<2x16xf32> to vector<2x16x1xf32>
    %222 = vector.shape_cast %221 : vector<2x16x1xf32> to vector<2x16x1xf32>
    %223 = vector.broadcast %222 : vector<2x16x1xf32> to vector<2x16x16xf32>
    %224 = vector.shape_cast %223 : vector<2x16x16xf32> to vector<2x256xf32>
    %225 = vector.shape_cast %224 : vector<2x256xf32> to vector<2x1x256xf32>
    %226 = vector.shape_cast %225 : vector<2x1x256xf32> to vector<2x1x256xf32>
    %227 = vector.broadcast %226 : vector<2x1x256xf32> to vector<2x4x256xf32>
    %228 = vector.shape_cast %227 : vector<2x4x256xf32> to vector<8x256xf32>
    %229 = arith.mulf %228, %157 : vector<8x256xf32>
    %230 = arith.addf %220, %229 : vector<8x256xf32>
    %c0_69 = arith.constant 0 : index
    %c0_70 = arith.constant 0 : index
    %231 = vector.load %arg10[%c0_69, %c0_70] : memref<8x256xf32, #tpu.memory_space<vmem>>, vector<8x256xf32>
    tpu.vector_store %arg10[%c0_69, %c0_70], %230 {strides = array<i32>} : memref<8x256xf32, #tpu.memory_space<vmem>>, vector<8x256xf32>,
    %c3_i32 = arith.constant 3 : i32
    %c0_71 = arith.constant 0 : index
    %c0_72 = arith.constant 0 : index
    %232 = vector.load %arg10[%c0_71, %c0_72] : memref<8x256xf32, #tpu.memory_space<vmem>>, vector<8x256xf32>
    %233 = arith.index_cast %c3_i32 : i32 to index
    %c0_73 = arith.constant 0 : index
    %c0_74 = arith.constant 0 : index
    %234 = vector.load %arg1[%233, %c0_73, %c0_74] : memref<4x2x16xf32, #tpu.memory_space<vmem>>, vector<1x2x16xf32>
    %235 = vector.shape_cast %234 : vector<1x2x16xf32> to vector<2x16xf32>
    %236 = arith.index_cast %c3_i32 : i32 to index
    %c0_75 = arith.constant 0 : index
    %c0_76 = arith.constant 0 : index
    %237 = vector.load %arg2[%236, %c0_75, %c0_76] : memref<4x2x16xf32, #tpu.memory_space<vmem>>, vector<1x2x16xf32>
    %238 = vector.shape_cast %237 : vector<1x2x16xf32> to vector<2x16xf32>
    %239 = arith.index_cast %c3_i32 : i32 to index
    %c0_77 = arith.constant 0 : index
    %c0_78 = arith.constant 0 : index
    %240 = vector.load %arg3[%239, %c0_77, %c0_78] : memref<4x2x16xf32, #tpu.memory_space<vmem>>, vector<1x2x16xf32>
    %241 = vector.shape_cast %240 : vector<1x2x16xf32> to vector<2x16xf32>
    %cst_79 = arith.constant dense<0.000000e+00> : vector<8x32xf32>
    %242 = tpu.matmul %232, %3, %cst_79 {dimension_numbers = #tpu.dot_dimension_numbers<[1], [0], [0], [1], [0, 0, 1, 1], [], []>} : vector<8x256xf32>, vector<256x32xf32>, vector<8x32xf32> -> vector<8x32xf32>
    %243 = vector.broadcast %4 : vector<1x32xf32> to vector<8x32xf32>
    %244 = arith.addf %242, %243 : vector<8x32xf32>
    %245 = vector.extract_strided_slice %244 {offsets = [0, 0], sizes = [8, 16], strides = [1, 1]} : vector<8x32xf32> to vector<8x16xf32>
    %246 = vector.shape_cast %245 : vector<8x16xf32> to vector<2x4x16xf32>
    %247 = vector.extract_strided_slice %244 {offsets = [0, 16], sizes = [8, 16], strides = [1, 1]} : vector<8x32xf32> to vector<8x16xf32>
    %248 = vector.shape_cast %247 : vector<8x16xf32> to vector<2x4x16xf32>
    %249 = vector.shape_cast %238 : vector<2x16xf32> to vector<2x1x16xf32>
    "tpu.trace_start"() <{level = 10 : i32, message = "bqd,bnd->bqn"}> : () -> ()
    %cst_80 = arith.constant dense<0.000000e+00> : vector<2x1x4xf32>
    %250 = tpu.matmul %249, %246, %cst_80 {dimension_numbers = #tpu.dot_dimension_numbers<[2], [2], [1], [1], [0, 0, 0, 1, 1, 1], [0], [0]>} : vector<2x1x16xf32>, vector<2x4x16xf32>, vector<2x1x4xf32> -> vector<2x1x4xf32>
    "tpu.trace_stop"() : () -> ()
    %cst_81 = arith.constant 2.500000e-01 : f32
    %251 = vector.broadcast %cst_81 : f32 to vector<2x1x4xf32>
    %252 = arith.mulf %250, %251 : vector<2x1x4xf32>
    %cst_82 = arith.constant dense<0xFF800000> : vector<2x1xf32>
    %253 = vector.multi_reduction <maximumf>, %252, %cst_82 [2] : vector<2x1x4xf32> to vector<2x1xf32>
    %254 = vector.shape_cast %253 : vector<2x1xf32> to vector<2x1x1xf32>
    %255 = vector.broadcast %254 : vector<2x1x1xf32> to vector<2x1x4xf32>
    %256 = arith.subf %252, %255 : vector<2x1x4xf32>
    %257 = math.exp %256 : vector<2x1x4xf32>
    %cst_83 = arith.constant dense<0.000000e+00> : vector<2x1xf32>
    %258 = vector.multi_reduction <add>, %257, %cst_83 [2] : vector<2x1x4xf32> to vector<2x1xf32>
    %259 = vector.shape_cast %258 : vector<2x1xf32> to vector<2x1x1xf32>
    %260 = tpu.reciprocal %259 {approx = true} : vector<2x1x1xf32> -> vector<2x1x1xf32>
    %261 = vector.broadcast %260 : vector<2x1x1xf32> to vector<2x1x4xf32>
    %262 = arith.mulf %257, %261 : vector<2x1x4xf32>
    "tpu.trace_start"() <{level = 10 : i32, message = "bqn,bnd->bqd"}> : () -> ()
    %cst_84 = arith.constant dense<0.000000e+00> : vector<2x1x16xf32>
    %263 = tpu.matmul %262, %248, %cst_84 {dimension_numbers = #tpu.dot_dimension_numbers<[2], [1], [1], [2], [0, 0, 0, 1, 1, 2], [0], [0]>} : vector<2x1x4xf32>, vector<2x4x16xf32>, vector<2x1x16xf32> -> vector<2x1x16xf32>
    "tpu.trace_stop"() : () -> ()
    %264 = vector.shape_cast %263 : vector<2x1x16xf32> to vector<2x16xf32>
    %cst_85 = arith.constant dense<0.000000e+00> : vector<2x32xf32>
    %265 = tpu.matmul %264, %5, %cst_85 {dimension_numbers = #tpu.dot_dimension_numbers<[1], [0], [0], [1], [0, 0, 1, 1], [], []>} : vector<2x16xf32>, vector<16x32xf32>, vector<2x32xf32> -> vector<2x32xf32>
    %266 = vector.broadcast %6 : vector<1x32xf32> to vector<2x32xf32>
    %267 = arith.addf %265, %266 : vector<2x32xf32>
    %268 = vector.extract_strided_slice %267 {offsets = [0, 0], sizes = [2, 16], strides = [1, 1]} : vector<2x32xf32> to vector<2x16xf32>
    %269 = arith.negf %268 : vector<2x16xf32>
    %270 = math.exp %269 : vector<2x16xf32>
    %cst_86 = arith.constant 1.000000e+00 : f32
    %271 = vector.broadcast %cst_86 : f32 to vector<2x16xf32>
    %272 = arith.addf %271, %270 : vector<2x16xf32>
    %273 = arith.divf %271, %272 : vector<2x16xf32>
    %274 = vector.extract_strided_slice %267 {offsets = [0, 16], sizes = [2, 16], strides = [1, 1]} : vector<2x32xf32> to vector<2x16xf32>
    %275 = arith.negf %274 : vector<2x16xf32>
    %276 = math.exp %275 : vector<2x16xf32>
    %cst_87 = arith.constant 1.000000e+00 : f32
    %277 = vector.broadcast %cst_87 : f32 to vector<2x16xf32>
    %278 = arith.addf %277, %276 : vector<2x16xf32>
    %279 = arith.divf %277, %278 : vector<2x16xf32>
    %280 = arith.mulf %273, %264 : vector<2x16xf32>
    %281 = arith.addf %235, %280 : vector<2x16xf32>
    %282 = arith.index_cast %c3_i32 : i32 to index
    %c0_88 = arith.constant 0 : index
    %c0_89 = arith.constant 0 : index
    %283 = vector.load %arg9[%282, %c0_88, %c0_89] : memref<4x2x16xf32, #tpu.memory_space<vmem>>, vector<1x2x16xf32>
    %284 = vector.shape_cast %283 : vector<1x2x16xf32> to vector<2x16xf32>
    %285 = vector.shape_cast %281 : vector<2x16xf32> to vector<1x2x16xf32>
    tpu.vector_store %arg9[%282, %c0_88, %c0_89], %285 {strides = array<i32>} : memref<4x2x16xf32, #tpu.memory_space<vmem>>, vector<1x2x16xf32>,
    %286 = math.tanh %264 : vector<2x16xf32>
    %287 = arith.mulf %241, %286 : vector<2x16xf32>
    %288 = vector.shape_cast %287 : vector<2x16xf32> to vector<2x16x1xf32>
    %289 = vector.shape_cast %288 : vector<2x16x1xf32> to vector<2x16x1xf32>
    %290 = vector.broadcast %289 : vector<2x16x1xf32> to vector<2x16x16xf32>
    %291 = vector.shape_cast %290 : vector<2x16x16xf32> to vector<2x256xf32>
    %292 = vector.shape_cast %291 : vector<2x256xf32> to vector<2x1x256xf32>
    %293 = vector.shape_cast %292 : vector<2x1x256xf32> to vector<2x1x256xf32>
    %294 = vector.broadcast %293 : vector<2x1x256xf32> to vector<2x4x256xf32>
    %295 = vector.shape_cast %294 : vector<2x4x256xf32> to vector<8x256xf32>
    %296 = vector.shape_cast %279 : vector<2x16xf32> to vector<2x16x1xf32>
    %297 = vector.shape_cast %296 : vector<2x16x1xf32> to vector<2x16x1xf32>
    %298 = vector.broadcast %297 : vector<2x16x1xf32> to vector<2x16x16xf32>
    %299 = vector.shape_cast %298 : vector<2x16x16xf32> to vector<2x256xf32>
    %300 = vector.shape_cast %299 : vector<2x256xf32> to vector<2x1x256xf32>
    %301 = vector.shape_cast %300 : vector<2x1x256xf32> to vector<2x1x256xf32>
    %302 = vector.broadcast %301 : vector<2x1x256xf32> to vector<2x4x256xf32>
    %303 = vector.shape_cast %302 : vector<2x4x256xf32> to vector<8x256xf32>
    %304 = arith.mulf %303, %232 : vector<8x256xf32>
    %305 = arith.addf %295, %304 : vector<8x256xf32>
    %c0_90 = arith.constant 0 : index
    %c0_91 = arith.constant 0 : index
    %306 = vector.load %arg10[%c0_90, %c0_91] : memref<8x256xf32, #tpu.memory_space<vmem>>, vector<8x256xf32>
    tpu.vector_store %arg10[%c0_90, %c0_91], %305 {strides = array<i32>} : memref<8x256xf32, #tpu.memory_space<vmem>>, vector<8x256xf32>,
    %c4_i32 = arith.constant 4 : i32
    return
  }
  func.func @transform_0(%arg0: i32) -> (i32, i32, i32) {
    %c0_i32 = arith.constant 0 : i32
    %c0_i32_0 = arith.constant 0 : i32
    %c0_i32_1 = arith.constant 0 : i32
    return %arg0, %c0_i32, %c0_i32_0 : i32, i32, i32
  }
  func.func @transform_1(%arg0: i32) -> (i32, i32, i32) {
    %c0_i32 = arith.constant 0 : i32
    %c0_i32_0 = arith.constant 0 : i32
    %c0_i32_1 = arith.constant 0 : i32
    return %arg0, %c0_i32, %c0_i32_0 : i32, i32, i32
  }
  func.func @transform_2(%arg0: i32) -> (i32, i32, i32) {
    %c0_i32 = arith.constant 0 : i32
    %c0_i32_0 = arith.constant 0 : i32
    %c0_i32_1 = arith.constant 0 : i32
    return %arg0, %c0_i32, %c0_i32_0 : i32, i32, i32
  }
  func.func @transform_3(%arg0: i32) -> (i32, i32) {
    %c0_i32 = arith.constant 0 : i32
    %c0_i32_0 = arith.constant 0 : i32
    %c0_i32_1 = arith.constant 0 : i32
    return %c0_i32, %c0_i32_0 : i32, i32
  }
  func.func @transform_4(%arg0: i32) -> (i32, i32) {
    %c0_i32 = arith.constant 0 : i32
    %c0_i32_0 = arith.constant 0 : i32
    %c0_i32_1 = arith.constant 0 : i32
    return %c0_i32, %c0_i32_0 : i32, i32
  }
  func.func @transform_5(%arg0: i32) -> (i32, i32) {
    %c0_i32 = arith.constant 0 : i32
    %c0_i32_0 = arith.constant 0 : i32
    %c0_i32_1 = arith.constant 0 : i32
    return %c0_i32, %c0_i32_0 : i32, i32
  }
  func.func @transform_6(%arg0: i32) -> (i32, i32) {
    %c0_i32 = arith.constant 0 : i32
    %c0_i32_0 = arith.constant 0 : i32
    %c0_i32_1 = arith.constant 0 : i32
    return %c0_i32, %c0_i32_0 : i32, i32
  }
  func.func @transform_7(%arg0: i32) -> (i32, i32) {
    %c0_i32 = arith.constant 0 : i32
    %c0_i32_0 = arith.constant 0 : i32
    %c0_i32_1 = arith.constant 0 : i32
    return %c0_i32, %c0_i32_0 : i32, i32
  }
  func.func @transform_8(%arg0: i32) -> (i32, i32, i32) {
    %c0_i32 = arith.constant 0 : i32
    %c0_i32_0 = arith.constant 0 : i32
    %c0_i32_1 = arith.constant 0 : i32
    return %arg0, %c0_i32, %c0_i32_0 : i32, i32, i32
  }
  func.func @transform_9(%arg0: i32) -> (i32, i32) {
    %c0_i32 = arith.constant 0 : i32
    %c0_i32_0 = arith.constant 0 : i32
    %c0_i32_1 = arith.constant 0 : i32
    return %c0_i32, %c0_i32_0 : i32, i32
  }
}

</mosaic_0001>

<bundles_post_ra>
// kernel: tpu_custom_call.1
= control target key start
LH: loop header
LB: loop body
LE: loop exit
PB: predicated region body
PF: predicated region fallthrough
CT: control target
= control target key end

     0   :  { %15 = vsyncpa [#allocation3], 0  ;;  %s8546_s0 = inlined_call_operand.vmem [shape: f32[8,2,16], index: 0, kind: input, shape index: {}]   ;;  %s8547_s1 = inlined_call_operand.vmem [shape: f32[8,2,16], index: 1, kind: input, shape index: {}]   ;;  %s8548_s2 = inlined_call_operand.vmem [shape: f32[8,2,16], index: 2, kind: input, shape index: {}]   ;;  %s8549_s3 = inlined_call_operand.vmem [shape: f32[8,256], index: 3, kind: input, shape index: {}]   ;;  %s8550_s4 = inlined_call_operand.vmem [shape: f32[256,32], index: 4, kind: input, shape index: {}]   ;;  %s8551_s5 = inlined_call_operand.vmem [shape: f32[1,32], index: 5, kind: input, shape index: {}]   ;;  %s8552_s6 = inlined_call_operand.vmem [shape: f32[16,32], index: 6, kind: input, shape index: {}]   ;;  %s8553_s7 = inlined_call_operand.vmem [shape: f32[1,32], index: 7, kind: input, shape index: {}]   ;;  %s8554_s8 = inlined_call_operand.hbm [shape: f32[8,2,16], index: 8, kind: output, shape index: {0}]   ;;  %s8555_s9 = inlined_call_operand.hbm [shape: f32[8,256], index: 9, kind: output, shape index: {1}]  }
   0x1   :  { %17 = vsyncpa [#allocation3 + $0x1], 0 }
   0x2   :  { %18 = vsyncpa [#allocation5], 0  ;;  %s6593_s30 = smov 0   ;;  %s6595_s10 = smov 0  }
   0x3   :  { %s6597_s11 = smov 0   ;;  %s6599_s12 = smov 0  }
   0x4 LB: > { %8620 = sst [smem:[#allocation8_spill]] %s6521_s11  ;;  %s6614_s13 = sadd.s32 4294967295, %s6525_s12   ;;  %s6525_s12 = sphi %s6599_s12, %s8718_s12   ;;  %s6521_s11 = sphi %s6597_s11, %s8715_s11   ;;  %s6517_s10 = sphi %s6595_s10, %s8717_s10   ;;  %s6513_s30 = sphi %s6593_s30, %s8716_s30  }
   0x5   : > { %s5795_s14 = sadd.s32 4294967294, %s6525_s12   ;;  %s6618_s15 = sadd.s32 1, %s6525_s12  }
   0x6   : > { %s214_s16 = sadd.s32 1, %s6521_s11  ;;  %s211_s17 = ssub.s32 %s6525_s12, %s6618_s15 }
   0x7   : > { %p224_p0 = scmp.ne.s32.totalorder %s6521_s11, %s6517_s10  ;;  %p212_p1 = scmp.eq.s32.totalorder %s211_s17, 0 }
   0x8   : > { %p225_p2 = scmp.eq.s32.totalorder %s6614_s13, 1  ;;  %p230_p3 = scmp.ne.s32.totalorder %s6517_s10, %s6513_s30 }
   0x9   : > { %p231_p4 = scmp.eq.s32.totalorder %s5795_s14, 1  ;;  %p5798_p7 = scmp.ge.s32.totalorder %s6525_s12, 1 }
   0xa   : > { %s6629_s18 = scalar_select %p212_p1, %s6521_s11, %s214_s16  }
   0xb   : > { %p6633_p5 = por %p225_p2, %p224_p0  ;;  %p6637_p6 = por %p231_p4, %p230_p3 }
   0xc   : > { %8621 = sst [smem:[#allocation9_spill]] %s6629_s18  ;;  %p312_p8 = scmp.lt.s32.totalorder %s6525_s12, 3 }
   0xe   : > { %p313_p9 = pnand %p5798_p7, %p312_p8 }
  0x10   : > { %316 = sbr.rel (%p313_p9) target bundleno = 6156 (0x180c), region = 52 }
  0x17   : > { %s8557_s21 = sand.u32 1, %s6517_s10   ;;  %s5800_s22 = sshll.u32 %s6614_s13, 2 }
  0x18   : > { %s5799_s23 = sshll.u32 %s8557_s21, 3  ;;  %p359_p10 = scmp.lt.s32.totalorder %s5800_s22, 7 }
  0x19   : > { %s6662_s11 = scalar_lea.vmem [#allocation2], %s5799_s23  ;;  %p5806_p11 = scmp.ne.s32.totalorder %s6614_s13, 0 }
  0x1a   : > { %s8720_s22 = smov (!%p359_p10, %s5800_s22), 7  ;;  %v381_v0 = vld [vmem:[%s8549_s3] sm:$0xff] (!%p5806_p11)  ;;  %v382_v1 = vld [vmem:[%s8549_s3 + $0x8] sm:$0xff] (!%p5806_p11) }
  0x1b   : > { %s5801_s24 = sshll.u32 %s8720_s22, 1  ;;  %380 = sbr.rel (%p5806_p11) target bundleno = 34 (0x22), region = 56  ;;  %383 = vst [vmem:[#allocation4] sm:$0xff] (!%p5806_p11), %v381_v0  ;;  %384 = vst [vmem:[#allocation4 + $0x8] sm:$0xff] (!%p5806_p11), %v382_v1 }
  0x1c   : > { %s6650_s27 = scalar_lea.vmem %s8546_s0, %s5801_s24  ;;  %s6655_s14 = scalar_lea.vmem %s8547_s1, %s5801_s24 }
  0x1d   : > { %s6660_s18 = scalar_lea.vmem %s8548_s2, %s5801_s24 }
  0x22 PF: > { %v401_v2 = vld [vmem:[%s8550_s4 + $0x80] sm:$0xff]  ;;  %v402_v3 = vld [vmem:[%s8550_s4 + $0x88] sm:$0xff]  ;;  %v403_v7 = vld [vmem:[%s8550_s4 + $0x90] sm:$0xff]  ;;  %v8579_v52 = vmov 0.0   ;;  %vm6528_vm0 = vmmov 0   ;;  %v516_v55 = vlaneseq  ;;  %vm527_vm1 = vcmask 130048  }
  0x23   : > { %v385_v4 = vld [vmem:[%s8550_s4] sm:$0xff]  ;;  %v6680_v5 = vpack.c.bf16 %v402_v3, %v401_v2  ;;  %v386_v6 = vld [vmem:[%s8550_s4 + $0x8] sm:$0xff]  ;;  %v404_v8 = vld [vmem:[%s8550_s4 + $0x98] sm:$0xff]  ;;  %6057 = vmatprep.subr.mxu1 %v8579_v52  ;;  %6059 = vmatprep.mubr.msk.f32.mxu1 %vm6528_vm0, %v8579_v52  ;;  %v6529_v53 = vmov 1966171168   ;;  %vm678_vm2 = vcmask 24576  }
  0x24   : > { %v6691_v9 = vpack.c.bf16 %v386_v6, %v385_v4  ;;  %v6693_v10 = vpack.c.bf16 %v404_v8, %v403_v7  ;;  %v387_v11 = vld [vmem:[%s8550_s4 + $0x10] sm:$0xff]  ;;  %v388_v12 = vld [vmem:[%s8550_s4 + $0x18] sm:$0xff]  ;;  %v405_v13 = vld [vmem:[%s8550_s4 + $0xa0] sm:$0xff]  ;;  %v514_v54 = vunpack.c.l.s4 %v6529_v53  ;;  %v6827_v57 = vshrl.u32 %v516_v55, 7  ;;  %s6530_s21 = smov 112   ;;  %s6534_s29 = smov 16  }
  0x25   : > { %8624 = vst [vmem:[#allocation10_spill] sm:$0xff] %v6680_v5  ;;  %6166 = vmatprep.subr.bf16.mxu0 %v6680_v5  ;;  %v406_v14 = vld [vmem:[%s8550_s4 + $0xa8] sm:$0xff]  ;;  %v6709_v15 = vpack.c.bf16 %v388_v12, %v387_v11  ;;  %v389_v17 = vld [vmem:[%s8550_s4 + $0x20] sm:$0xff]  ;;  %v407_v19 = vld [vmem:[%s8550_s4 + $0xb0] sm:$0xff]  ;;  %vm707_vm3 = vcmask 1043456   ;;  %vm703_vm4 = vcmask 31744  }
  0x26   : > { %8625 = vst [vmem:[#allocation11_spill] sm:$0xff] %v6691_v9  ;;  %8626 = vst [vmem:[#allocation12_spill] sm:$0xff] %v6693_v10  ;;  %6168 = vmatpush3.bf16.msra.mxu0 %v6691_v9  ;;  %v6712_v16 = vpack.c.bf16 %v406_v14, %v405_v13  ;;  %v390_v18 = vld [vmem:[%s8550_s4 + $0x28] sm:$0xff]  ;;  %v408_v20 = vld [vmem:[%s8550_s4 + $0xb8] sm:$0xff]  ;;  %v515_v56 = vunpack.c.0.s8 %v514_v54  ;;  %v8558_v53 = vmov 0.0|0.0   ;;  %vm866_vm5 = vcmask 1041409  }
  0x27   : > { %8627 = vst [vmem:[#allocation13_spill] sm:$0xff] %v6709_v15  ;;  %6170 = vmatprep.subr.bf16.mxu0 %v6693_v10  ;;  %v6727_v21 = vpack.c.bf16 %v390_v18, %v389_v17  ;;  %v6730_v22 = vpack.c.bf16 %v408_v20, %v407_v19  ;;  %v391_v23 = vld [vmem:[%s8550_s4 + $0x30] sm:$0xff]  ;;  %v392_v24 = vld [vmem:[%s8550_s4 + $0x38] sm:$0xff]  ;;  %v409_v25 = vld [vmem:[%s8550_s4 + $0xc0] sm:$0xff]  ;;  %s6535_s23 = smov 32   ;;  %s6536_s24 = smov 64  }
  0x28   : > { %8628 = vst [vmem:[#allocation14_spill] sm:$0xff] %v6712_v16  ;;  %v410_v26 = vld [vmem:[%s8550_s4 + $0xc8] sm:$0xff]  ;;  %v6744_v27 = vld [vmem:[#allocation4 + $0x8] sm:$0xff]  ;;  %v6748_v28 = vpack.c.bf16 %v392_v24, %v391_v23  ;;  %v393_v30 = vld [vmem:[%s8550_s4 + $0x40] sm:$0xff]  ;;  %v6835_v61 = vsub.s32 %v515_v56, %v6827_v57  ;;  %s6537_s16 = smov 48   ;;  %s6538_s17 = smov 80  }
  0x29   : > { %8629 = vst [vmem:[#allocation15_spill] sm:$0xff] %v6727_v21  ;;  %8630 = vst [vmem:[#allocation16_spill] sm:$0xff] %v6730_v22  ;;  %496 = vmatprep.mubr.f32.mxu0 %v6744_v27  ;;  %v6751_v29 = vpack.c.bf16 %v410_v26, %v409_v25  ;;  %v394_v31 = vld [vmem:[%s8550_s4 + $0x48] sm:$0xff]  ;;  %v411_v32 = vld [vmem:[%s8550_s4 + $0xd0] sm:$0xff]  ;;  %vm949_vm6 = vcmask 123904   ;;  %s6539_s26 = smov 96  }
  0x2a   : > { %6172 = vmatpush3.bf16.msra.mxu0 %v6709_v15  ;;  %8631 = vst [vmem:[#allocation17_spill] sm:$0xff] %v6748_v28  ;;  %v412_v33 = vld [vmem:[%s8550_s4 + $0xd8] sm:$0xff]  ;;  %v6766_v34 = vpack.c.bf16 %v394_v31, %v393_v30  ;;  %v395_v36 = vld [vmem:[%s8550_s4 + $0x50] sm:$0xff]  ;;  %v413_v38 = vld [vmem:[%s8550_s4 + $0xe0] sm:$0xff]  ;;  %vm1291_vm7 = vcmask 261120   ;;  %vm1294_vm8 = vcmask 392192  }
  0x2b   : > { %6174 = vmatprep.subr.bf16.mxu0 %v6712_v16  ;;  %8632 = vst [vmem:[#allocation18_spill] sm:$0xff] %v6751_v29  ;;  %v6769_v35 = vpack.c.bf16 %v412_v33, %v411_v32  ;;  %v396_v37 = vld [vmem:[%s8550_s4 + $0x58] sm:$0xff]  ;;  %v414_v39 = vld [vmem:[%s8550_s4 + $0xe8] sm:$0xff]  ;;  %v397_v42 = vld [vmem:[%s8550_s4 + $0x60] sm:$0xff]  ;;  %vm1297_vm9 = vcmask 523264   ;;  %vm1300_vm10 = vcmask 654336  }
  0x2c   : > { %8633 = vst [vmem:[#allocation19_spill] sm:$0xff] %v6766_v34  ;;  %v6784_v40 = vpack.c.bf16 %v396_v37, %v395_v36  ;;  %v6787_v41 = vpack.c.bf16 %v414_v39, %v413_v38  ;;  %v398_v43 = vld [vmem:[%s8550_s4 + $0x68] sm:$0xff]  ;;  %v415_v44 = vld [vmem:[%s8550_s4 + $0xf0] sm:$0xff]  ;;  %v416_v45 = vld [vmem:[%s8550_s4 + $0xf8] sm:$0xff]  ;;  %vm1303_vm11 = vcmask 785408   ;;  %vm1306_vm12 = vcmask 916480  }
  0x2d   : > { %8634 = vst [vmem:[#allocation20_spill] sm:$0xff] %v6769_v35  ;;  %v6802_v46 = vpack.c.bf16 %v398_v43, %v397_v42  ;;  %v6805_v47 = vpack.c.bf16 %v416_v45, %v415_v44  ;;  %v399_v48 = vld [vmem:[%s8550_s4 + $0x70] sm:$0xff]  ;;  %v400_v49 = vld [vmem:[%s8550_s4 + $0x78] sm:$0xff]  ;;  %v6832_v59 = vld [vmem:[%s8551_s5] ss:$0 sm:$0xff]  ;;  %s6540_s22 = smov [#allocation2]  }
  0x2e   : > { %6176 = vmatpush3.bf16.msra.mxu0 %v6727_v21  ;;  %8635 = vst [vmem:[#allocation21_spill] sm:$0xff] %v6784_v40  ;;  %8636 = vst [vmem:[#allocation22_spill] sm:$0xff] %v6787_v41  ;;  %v6814_v50 = vpack.c.bf16 %v400_v49, %v399_v48  ;;  %v6818_v51 = vld [vmem:[#allocation4] sm:$0xff]  ;;  %v418_v45 = vld [vmem:[%s8552_s6] sm:$0xff] }
  0x2f   : > { %6178 = vmatprep.subr.bf16.mxu0 %v6730_v22  ;;  %8637 = vst [vmem:[#allocation23_spill] sm:$0xff] %v6802_v46  ;;  %8638 = vst [vmem:[#allocation24_spill] sm:$0xff] %v6805_v47  ;;  %v5808_v63 = vld.sshfl [vmem:[%s6655_s14] sm:$0x11 pattern:$0x75316420] }
  0x30   : > { %8639 = vst [vmem:[#allocation25_spill] sm:$0xff] %v6814_v50  ;;  %8640 = vst [vmem:[#allocation26_spill] sm:$0xff] %v6832_v59  ;;  %v512_v1 = vcombine.high %v5808_v63, %v5808_v63  ;;  %v519_v2 = vrot.slane %v5808_v63, %v6835_v61  ;;  %v419_v48 = vld [vmem:[%s8552_s6 + $0x8] sm:$0xff] }
  0x31   : > { %8641 = vst [vmem:[#allocation27_spill] sm:$0xff] %v6835_v61  ;;  %v6872_v49 = vpack.c.bf16 %v419_v48, %v418_v45 }
  0x32   : > { %6180 = vmatpush3.bf16.msra.mxu0 %v6748_v28  ;;  %v526_v4 = vrot.slane %v512_v1, %v6835_v61  ;;  %v425_v1 = vld [vmem:[%s6660_s18] sm:$0x3] }
  0x33   : > { %6182 = vmatprep.subr.bf16.mxu0 %v6751_v29  ;;  %8642 = vst [vmem:[#allocation28_spill] sm:$0xff] %v6872_v49 }
  0x36   : > { %6184 = vmatpush3.bf16.msra.mxu0 %v6766_v34 }
  0x37   : > { %6186 = vmatprep.subr.bf16.mxu0 %v6769_v35 }
  0x3a   : > { %6188 = vmatpush3.bf16.msra.mxu0 %v6784_v40 }
  0x3b   : > { %6190 = vmatprep.subr.bf16.mxu0 %v6787_v41 }
  0x3e   : > { %6192 = vmatpush3.bf16.msra.mxu0 %v6802_v46 }
  0x3f   : > { %6194 = vmatprep.subr.bf16.mxu0 %v6805_v47 }
  0x42   : > { %6196 = vmatpush3.bf16.msra.mxu0 %v6814_v50 }
  0x43   : > { %6084 = vmatprep.subr.mxu0 %v8579_v52 }
  0x45   : > { %497 = vmatmul.mubr.f32.vlgmr.msra.gmra.mrb[0].mxu0 %v6818_v51 }
  0x46   : > { %6086 = vmatprep.mubr.msk.f32.mxu0 %vm6528_vm0, %v8579_v52 }
 0x118   : > { %v5905_v58 = vpop.f32.mrb[0].mxu0 }
 0x119   : > { %v5906_v60 = vpop.f32.mrb[1].mxu0 }
 0x11a   : > { %v5907_v62 = vadd.f32 %v5906_v60, %v5905_v58 }
 0x11c   : > { %v499_v0 = vadd.f32 %v5907_v62, %v6832_v59 }
 0x11e   : > { %6058 = vmatpush3.xpose.msk.msra.mxu1 %vm527_vm1, %v499_v0  ;;  %v503_v3 = vcombine.high %v499_v0, %v499_v0 }
 0x11f   : > { %6062 = vmatprep.subr.mxu1 %v8579_v52 }
 0x121   : > { %6060 = vmatmul.mubr.msk.f32.vlgmr.msra.gmra.mrb[0].mxu1 %vm527_vm1, %v519_v2 }
 0x122   : > { %6063 = vmatpush3.xpose.msk.msra.mxu1 %vm527_vm1, %v503_v3  ;;  %6064 = vmatprep.mubr.msk.f32.mxu1 %vm6528_vm0, %v8579_v52 }
 0x123   : > { %6067 = vmatprep.subr.mxu1 %v8579_v52 }
 0x125   : > { %6065 = vmatmul.mubr.msk.f32.vlgmr.msra.gmra.mrb[2].mxu1 %vm527_vm1, %v526_v4 }
 0x126   : > { %6069 = vmatprep.mubr.msk.f32.mxu1 %vm6528_vm0, %v8579_v52 }
 0x1f4   : > { %v598_v6 = vpop.f32.mrb[0].mxu1 }
 0x1f5   : > { %v676_v7 = vmul.f32 0.25, %v598_v6  ;;  %v6061_v8 = vpop.f32.mrb[1].mxu1 }
 0x1f6   : > { %v6895_v8 = vsub.s32 1, %v6827_v57 }
 0x1f7   : > { %v679_v11 = vsel %vm678_vm2, %v676_v7, -inf }
 0x1f8   : > { %680 = vmax.xlane.f32.xlu0 %v679_v11  ;;  %v672_v12 = vpop.f32.mrb[2].mxu1  ;;  %8643 = vst [vmem:[#allocation29_spill] sm:$0xff] %v6895_v8 }
 0x1f9   : > { %v677_v13 = vmul.f32 0.25, %v672_v12  ;;  %v6066_v14 = vpop.f32.mrb[3].mxu1  ;;  %v6532_v12 = vmov 1983009808  }
 0x1fa   : > { %v6533_v14 = vmov 1934713408  }
 0x1fb   : > { %v682_v17 = vsel %vm678_vm2, %v677_v13, -inf }
 0x1fc   : > { %683 = vmax.xlane.f32.xlu0 %v682_v17  ;;  %v998_v17 = vunpack.c.l.s4 %v6533_v14 }
 0x212   : > { %701 = vrot.lane.b32.xlu0 %v499_v0, %s6530_s21 }
 0x285   : > { %v681_v18 = vpop.xlane.xlu0 %680 }
 0x286   : > { %v685_v19 = vsub.f32 %v676_v7, %v681_v18 }
 0x288   : > { %v687_v20 = vmul.f32 1.442695, %v685_v19  ;;  %v999_v19 = vunpack.c.0.s8 %v998_v17 }
 0x289   : > { %v684_v23 = vpop.xlane.xlu0 %683 }
 0x28a   : > { %6367 = vpow2.f32 %v687_v20  ;;  %v686_v24 = vsub.f32 %v677_v13, %v684_v23  ;;  %v983_v13 = vunpack.c.l.s4 %v6532_v12  ;;  %v6912_v23 = vsub.s32 %v999_v19, %v6827_v57 }
 0x28c   : > { %v689_v25 = vmul.f32 1.442695, %v686_v24  ;;  %v984_v18 = vunpack.c.0.s8 %v983_v13  ;;  %8645 = vst [vmem:[#allocation31_spill] sm:$0xff] %v6912_v23 }
 0x28d   : > { %v702_v26 = vpop.permute.xlu0 %701 }
 0x28e   : > { %6369 = vpow2.f32 %v689_v25  ;;  %6068 = vmatpush3.msk.msra.mxu1 %vm707_vm3, %v702_v26  ;;  %v6909_v20 = vsub.s32 %v984_v18, %v6827_v57 }
 0x28f   : > { %6072 = vmatprep.subr.mxu1 %v8579_v52 }
 0x290   : > { %8644 = vst [vmem:[#allocation30_spill] sm:$0xff] %v6909_v20 }
 0x294   : > { %v6368_v30 = vpop.eup %6367 }
 0x295   : > { %v691_v31 = vsel %vm678_vm2, %v6368_v30, 0.0 }
 0x296   : > { %692 = vadd.xlane.f32.xlu1 %v691_v31 }
 0x298   : > { %v6370_v32 = vpop.eup %6369 }
 0x299   : > { %v694_v33 = vsel %vm678_vm2, %v6370_v32, 0.0 }
 0x29a   : > { %695 = vadd.xlane.f32.xlu1 %v694_v33 }
 0x2ab   : > { %780 = vrot.lane.b32.xlu1 %v503_v3, %s6530_s21  ;;  %v6888_v3 = vsub.s32 0, %v6827_v57 }
 0x323   : > { %v693_v36 = vpop.xlane.xlu1 %692 }
 0x324   : > { %6371 = vrcp.f32 %v693_v36 }
 0x327   : > { %v696_v37 = vpop.xlane.xlu1 %695 }
 0x328   : > { %6373 = vrcp.f32 %v696_v37 }
 0x32b   : > { %v781_v42 = vpop.permute.xlu1 %780 }
 0x32e   : > { %v6372_v38 = vpop.eup %6371 }
 0x32f   : > { %v699_v39 = vmul.f32 %v6372_v38, %v6368_v30 }
 0x331   : > { %6070 = vmatmul.mubr.msk.f32.vlgmr.msra.gmra.mrb[4].mxu1 %vm703_vm4, %v699_v39 }
 0x332   : > { %v6374_v43 = vpop.eup %6373  ;;  %6073 = vmatpush3.msk.msra.mxu1 %vm707_vm3, %v781_v42  ;;  %6074 = vmatprep.mubr.msk.f32.mxu1 %vm6528_vm0, %v8579_v52 }
 0x333   : > { %v700_v44 = vmul.f32 %v6374_v43, %v6370_v32  ;;  %6197 = vmatprep.subr.bf16.mxu1 %v8558_v53 }
 0x335   : > { %6075 = vmatmul.mubr.msk.f32.vlgmr.msra.gmra.mrb[6].mxu1 %vm703_vm4, %v700_v44 }
 0x336   : > { %6081 = vmatprep.mubr.msk.f32.mxu1 %vm6528_vm0, %v8579_v52  ;;  %6199 = vmatpush3.bf16.msra.mxu1 %v6872_v49 }
 0x337   : > { %6201 = vmatprep.subr.bf16.mxu1 %v6680_v5 }
 0x404   : > { %v776_v54 = vpop.f32.mrb[4].mxu1 }
 0x405   : > { %v6071_v55 = vpop.f32.mrb[5].mxu1 }
 0x408   : > { %v853_v56 = vpop.f32.mrb[6].mxu1 }
 0x409   : > { %v865_v58 = vrot.slane %v853_v56, 7  ;;  %6375 = vtanh.f32 %v853_v56  ;;  %v6076_v60 = vpop.f32.mrb[7].mxu1 }
 0x40a   : > { %6377 = vtanh.f32 %v776_v54 }
 0x40b   : > { %v6878_v62 = vsel %vm866_vm5, %v865_v58, %v776_v54 }
 0x40c   : > { %6082 = vmatmul.mubr.msk.f32.vlgmr.msra.gmra.mrb[8].mxu1 %vm527_vm1, %v6878_v62 }
 0x40d   : > { %6203 = vmatpush3.bf16.msra.mxu1 %v6691_v9 }
 0x40e   : > { %6205 = vmatprep.subr.bf16.mxu1 %v6693_v10 }
 0x411   : > { %6207 = vmatpush3.bf16.msra.mxu1 %v6709_v15 }
 0x412   : > { %6209 = vmatprep.subr.bf16.mxu1 %v6712_v16 }
 0x413   : > { %v6376_v63 = vpop.eup %6375 }
 0x414   : > { %v955_v0 = vrot.slane %v6376_v63, 7  ;;  %v6378_v2 = vpop.eup %6377 }
 0x415   : > { %6211 = vmatpush3.bf16.msra.mxu1 %v6727_v21 }
 0x416   : > { %v956_v4 = vsel %vm866_vm5, %v955_v0, %v6378_v2  ;;  %6213 = vmatprep.subr.bf16.mxu1 %v6730_v22 }
 0x417   : > { %v958_v6 = vmul.f32 %v956_v4, %v425_v1 }
 0x419   : > { %v962_v7 = vrot.slane %v958_v6, %v6888_v3  ;;  %6215 = vmatpush3.bf16.msra.mxu1 %v6748_v28  ;;  %v973_v11 = vrot.slane %v958_v6, %v6895_v8 }
 0x41a   : > { %6217 = vmatprep.subr.bf16.mxu1 %v6751_v29 }
 0x41b   : > { %968 = vbcast.lane.b32.xlu1 %v962_v7, 264  ;;  %964 = vbcast.lane.b32.xlu0 %v962_v7, 256 }
 0x41d   : > { %6219 = vmatpush3.bf16.msra.mxu1 %v6766_v34 }
 0x41e   : > { %6221 = vmatprep.subr.bf16.mxu1 %v6769_v35 }
 0x41f   : > { %979 = vbcast.lane.b32.xlu1 %v973_v11, 264  ;;  %975 = vbcast.lane.b32.xlu0 %v973_v11, 256 }
 0x421   : > { %6223 = vmatpush3.bf16.msra.mxu1 %v6784_v40 }
 0x422   : > { %6225 = vmatprep.subr.bf16.mxu1 %v6787_v41 }
 0x425   : > { %6227 = vmatpush3.bf16.msra.mxu1 %v6802_v46 }
 0x426   : > { %6229 = vmatprep.subr.bf16.mxu1 %v6805_v47 }
 0x429   : > { %6231 = vmatpush3.bf16.msra.mxu1 %v6814_v50 }
 0x42a   : > { %6111 = vmatprep.subr.mxu1 %v8579_v52 }
 0x48d   : > { %v969_v24 = vpop.permute.xlu1 %968  ;;  %v965_v25 = vpop.permute.xlu0 %964 }
 0x48e   : > { %v988_v26 = vrot.slane %v965_v25, %v6909_v20  ;;  %v1037_v30 = vrot.slane %v969_v24, %v6909_v20  ;;  %v981_v48 = vcombine.high %v965_v25, %v8579_v52  ;;  %v1030_v60 = vcombine.high %v969_v24, %v8579_v52 }
 0x490   : > { %v6917_v31 = vrot.slane %v988_v26, %v6912_v23  ;;  %v6921_v37 = vrot.slane %v1037_v30, %v6912_v23  ;;  %v996_v42 = vcombine.high %v988_v26, %v8579_v52  ;;  %v1045_v54 = vcombine.high %v1037_v30, %v8579_v52 }
 0x491   : > { %v980_v32 = vpop.permute.xlu1 %979  ;;  %v976_v33 = vpop.permute.xlu0 %975  ;;  %v995_v63 = vrot.slane %v981_v48, %v6909_v20  ;;  %v1044_v6 = vrot.slane %v1030_v60, %v6909_v20 }
 0x492   : > { %v1086_v36 = vrot.slane %v976_v33, %v6909_v20  ;;  %v1135_v38 = vrot.slane %v980_v32, %v6909_v20  ;;  %v1026_v57 = vcombine.high %v6917_v31, %v8579_v52  ;;  %v1075_v44 = vcombine.high %v6921_v37, %v8579_v52 }
 0x493   : > { %v1010_v56 = vrot.slane %v996_v42, %v6912_v23  ;;  %v1079_v1 = vcombine.high %v976_v33, %v8579_v52  ;;  %v1059_v2 = vrot.slane %v1045_v54, %v6912_v23  ;;  %v1128_v7 = vcombine.high %v980_v32, %v8579_v52 }
 0x494   : > { %v6927_v39 = vrot.slane %v1086_v36, %v6912_v23  ;;  %1179 = vrot.lane.b32.xlu0 %v1026_v57, %s6534_s29  ;;  %v6932_v43 = vrot.slane %v1135_v38, %v6912_v23  ;;  %v1094_v55 = vcombine.high %v1086_v36, %v8579_v52  ;;  %v1143_v0 = vcombine.high %v1135_v38, %v8579_v52  ;;  %v6989_v57 = vld [vmem:[%s8553_s7] ss:$0 sm:$0xff] }
 0x495   : > { %v1093_v11 = vrot.slane %v1079_v1, %v6909_v20  ;;  %v1018_v12 = vrot.slane %v995_v63, %v6912_v23  ;;  %v1142_v14 = vrot.slane %v1128_v7, %v6909_v20  ;;  %v1067_v17 = vrot.slane %v1044_v6, %v6912_v23  ;;  %8646 = vst [vmem:[#allocation32_spill] sm:$0xff] %v6989_v57 }
 0x496   : > { %v1124_v45 = vcombine.high %v6927_v39, %v8579_v52  ;;  %v1173_v58 = vcombine.high %v6932_v43, %v8579_v52  ;;  %v1108_v4 = vrot.slane %v1094_v55, %v6912_v23  ;;  %v1157_v13 = vrot.slane %v1143_v0, %v6912_v23 }
 0x497   : > { %v1116_v18 = vrot.slane %v1093_v11, %v6912_v23  ;;  %v1027_v19 = vcombine.high %v1010_v56, %v8579_v52  ;;  %v1165_v24 = vrot.slane %v1142_v14, %v6912_v23  ;;  %v1076_v25 = vcombine.high %v1059_v2, %v8579_v52 }
 0x498   : > { %1235 = vrot.lane.b32.xlu0 %v1075_v44, %s6534_s29  ;;  %1181 = vrot.lane.b32.xlu1 %v1124_v45, %s6534_s29  ;;  %v1125_v26 = vcombine.high %v1108_v4, %v8579_v52  ;;  %v1028_v30 = vcombine.high %v1018_v12, %v8579_v52  ;;  %v1174_v32 = vcombine.high %v1157_v13, %v8579_v52 }
 0x499   : > { %v1077_v33 = vcombine.high %v1067_v17, %v8579_v52  ;;  %v1126_v36 = vcombine.high %v1116_v18, %v8579_v52  ;;  %v1175_v38 = vcombine.high %v1165_v24, %v8579_v52  ;;  %v1011_v1 = vcombine.high %v995_v63, %v8579_v52 }
 0x49a   : > { %v1109_v63 = vcombine.high %v1093_v11, %v8579_v52 }
 0x49b   : > { %v1025_v7 = vrot.slane %v1011_v1, %v6912_v23 }
 0x49c   : > { %1187 = vrot.lane.b32.xlu0 %v1010_v56, %s6535_s23  ;;  %1237 = vrot.lane.b32.xlu1 %v1173_v58, %s6534_s29  ;;  %v423_v58 = vld [vmem:[%s6650_s27] sm:$0x3] }
 0x4a0   : > { %1243 = vrot.lane.b32.xlu0 %v1059_v2, %s6535_s23  ;;  %1189 = vrot.lane.b32.xlu1 %v1108_v4, %s6535_s23 }
 0x4a4   : > { %1203 = vrot.lane.b32.xlu0 %v1018_v12, %s6536_s24  ;;  %1245 = vrot.lane.b32.xlu1 %v1157_v13, %s6535_s23  ;;  %v1060_v12 = vcombine.high %v1044_v6, %v8579_v52  ;;  %v1158_v6 = vcombine.high %v1142_v14, %v8579_v52 }
 0x4a6   : > { %v7003_v13 = vrot.slane %v1060_v12, %v6912_v23 }
 0x4a8   : > { %1259 = vrot.lane.b32.xlu0 %v1067_v17, %s6536_s24  ;;  %1205 = vrot.lane.b32.xlu1 %v1116_v18, %s6536_s24  ;;  %v1123_v17 = vrot.slane %v1109_v63, %v6912_v23  ;;  %v7014_v18 = vrot.slane %v1158_v6, %v6912_v23 }
 0x4aa   : > { %v1127_v11 = vcombine.high %v1123_v17, %v8579_v52 }
 0x4ac   : > { %1195 = vrot.lane.b32.xlu0 %v1027_v19, %s6537_s16  ;;  %1261 = vrot.lane.b32.xlu1 %v1165_v24, %s6536_s24 }
 0x4b0   : > { %1251 = vrot.lane.b32.xlu0 %v1076_v25, %s6537_s16  ;;  %1197 = vrot.lane.b32.xlu1 %v1125_v26, %s6537_s16 }
 0x4b4   : > { %1211 = vrot.lane.b32.xlu0 %v1028_v30, %s6538_s17  ;;  %1253 = vrot.lane.b32.xlu1 %v1174_v32, %s6537_s16 }
 0x4b8   : > { %1267 = vrot.lane.b32.xlu0 %v1077_v33, %s6538_s17  ;;  %1213 = vrot.lane.b32.xlu1 %v1126_v36, %s6538_s17 }
 0x4bc   : > { %1269 = vrot.lane.b32.xlu1 %v1175_v38, %s6538_s17 }
 0x4df   : > { %v936_v42 = vpop.f32.mrb[8].mxu1 }
 0x4e0   : > { %v937_v44 = vadd.f32 %v6989_v57, %v936_v42  ;;  %v6083_v45 = vpop.f32.mrb[9].mxu1 }
 0x4e2   : > { %v5819_v48 = vmul.f32 -1.442695, %v937_v44 }
 0x4e4   : > { %6379 = vpow2.f32 %v5819_v48 }
 0x4ee   : > { %v6380_v54 = vpop.eup %6379 }
 0x4ef   : > { %v943_v55 = vadd.f32 1.0, %v6380_v54 }
 0x4f1   : > { %6381 = vrcp.f32 %v943_v55 }
 0x4fb   : > { %v6382_v56 = vpop.eup %6381 }
 0x4fc   : > { %v1362_v60 = vrot.slane %v6382_v56, %v6895_v8  ;;  %v1350_v0 = vrot.slane %v6382_v56, %v6888_v3  ;;  %v947_v2 = vmul.f32 %v6382_v56, %v6878_v62  ;;  %v1029_v62 = vcombine.high %v1025_v7, %v8579_v52 }
 0x4fe   : > { %1365 = vbcast.lane.b32.xlu0 %v1362_v60, 272  ;;  %1353 = vbcast.lane.b32.xlu1 %v1350_v0, 272  ;;  %v948_v4 = vadd.f32 %v947_v2, %v423_v58 }
 0x500   : > { %950 = vst.msk [vmem:[%s6662_s11] sm:$0x3] %vm949_vm6, %v948_v4 }
 0x502   : > { %1219 = vrot.lane.b32.xlu0 %v1025_v7, %s6539_s26  ;;  %1357 = vbcast.lane.b32.xlu1 %v1350_v0, 280 }
 0x506   : > { %1275 = vrot.lane.b32.xlu0 %v7003_v13, %s6539_s26  ;;  %1369 = vbcast.lane.b32.xlu1 %v1362_v60, 280  ;;  %v7020_v19 = vpop.permute.xlu0 %1179 }
 0x507   : > { %v1289_v9 = vsel %vm527_vm1, %v6917_v31, %v7020_v19 }
 0x50a   : > { %1227 = vrot.lane.b32.xlu0 %v1029_v62, %s6530_s21  ;;  %1221 = vrot.lane.b32.xlu1 %v1123_v17, %s6539_s26  ;;  %v7022_v24 = vpop.permute.xlu1 %1181  ;;  %v7024_v25 = vpop.permute.xlu0 %1235 }
 0x50b   : > { %v1290_v49 = vsel %vm527_vm1, %v6927_v39, %v7022_v24  ;;  %v1309_v61 = vsel %vm527_vm1, %v6921_v37, %v7024_v25 }
 0x50e   : > { %1277 = vrot.lane.b32.xlu1 %v7014_v18, %s6539_s26  ;;  %v7026_v14 = vpop.permute.xlu1 %1237  ;;  %v7028_v26 = vpop.permute.xlu0 %1187 }
 0x50f   : > { %v1310_v10 = vsel %vm527_vm1, %v6932_v43, %v7026_v14  ;;  %v1292_v59 = vsel %vm1291_vm7, %v1289_v9, %v7028_v26 }
 0x512   : > { %1229 = vrot.lane.b32.xlu1 %v1127_v11, %s6530_s21  ;;  %v7030_v30 = vpop.permute.xlu1 %1189  ;;  %v7032_v32 = vpop.permute.xlu0 %1243 }
 0x513   : > { %v1293_v19 = vsel %vm1291_vm7, %v1290_v49, %v7030_v30 }
 0x516   : > { %v7034_v33 = vpop.permute.xlu1 %1245  ;;  %v7036_v36 = vpop.permute.xlu0 %1203 }
 0x517   : > { %v1312_v26 = vsel %vm1291_vm7, %v1310_v10, %v7034_v33 }
 0x51a   : > { %v7038_v38 = vpop.permute.xlu1 %1205  ;;  %v7040_v42 = vpop.permute.xlu0 %1259 }
 0x51e   : > { %v7042_v44 = vpop.permute.xlu1 %1261  ;;  %v7044_v45 = vpop.permute.xlu0 %1195 }
 0x51f   : > { %v1295_v39 = vsel %vm1294_vm8, %v1292_v59, %v7044_v45 }
 0x522   : > { %v7046_v48 = vpop.permute.xlu1 %1197  ;;  %v7048_v54 = vpop.permute.xlu0 %1251 }
 0x523   : > { %v1296_v24 = vsel %vm1294_vm8, %v1293_v19, %v7046_v48 }
 0x524   : > { %v1299_v10 = vsel %vm1297_vm9, %v1296_v24, %v7038_v38 }
 0x526   : > { %v7050_v55 = vpop.permute.xlu1 %1253  ;;  %v7052_v56 = vpop.permute.xlu0 %1211 }
 0x52a   : > { %v7054_v58 = vpop.permute.xlu1 %1213  ;;  %v7056_v60 = vpop.permute.xlu0 %1267 }
 0x52e   : > { %v7058_v0 = vpop.permute.xlu1 %1269 }
 0x570   : > { %v1366_v1 = vpop.permute.xlu0 %1365  ;;  %v1354_v2 = vpop.permute.xlu1 %1353 }
 0x571   : > { %v1476_v4 = vrot.slane %v1366_v1, %v6909_v20  ;;  %v1378_v7 = vrot.slane %v1354_v2, %v6909_v20 }
 0x573   : > { %v7063_v12 = vrot.slane %v1476_v4, %v6912_v23  ;;  %v7066_v63 = vrot.slane %v1378_v7, %v6912_v23  ;;  %v1386_v46 = vcombine.high %v1378_v7, %v8579_v52  ;;  %v1484_v40 = vcombine.high %v1476_v4, %v8579_v52 }
 0x574   : > { %v1358_v62 = vpop.permute.xlu1 %1357  ;;  %v1469_v7 = vcombine.high %v1366_v1, %v8579_v52 }
 0x575   : > { %v1427_v17 = vrot.slane %v1358_v62, %v6909_v20  ;;  %v1514_v6 = vcombine.high %v7063_v12, %v8579_v52  ;;  %v1416_v11 = vcombine.high %v7066_v63, %v8579_v52  ;;  %v1400_v34 = vrot.slane %v1386_v46, %v6912_v23 }
 0x576   : > { %v1420_v29 = vcombine.high %v1358_v62, %v8579_v52  ;;  %v1483_v46 = vrot.slane %v1469_v7, %v6909_v20 }
 0x577   : > { %v7074_v53 = vrot.slane %v1427_v17, %v6912_v23  ;;  %1571 = vrot.lane.b32.xlu1 %v1514_v6, %s6534_s29  ;;  %1569 = vrot.lane.b32.xlu0 %v1416_v11, %s6534_s29  ;;  %v1371_v11 = vcombine.high %v1354_v2, %v8579_v52  ;;  %v1435_v35 = vcombine.high %v1427_v17, %v8579_v52 }
 0x578   : > { %v1370_v57 = vpop.permute.xlu1 %1369  ;;  %v1506_v62 = vrot.slane %v1483_v46, %v6912_v23 }
 0x579   : > { %v1525_v50 = vrot.slane %v1370_v57, %v6909_v20  ;;  %v1465_v47 = vcombine.high %v7074_v53, %v8579_v52  ;;  %v1385_v4 = vrot.slane %v1371_v11, %v6909_v20  ;;  %v1449_v2 = vrot.slane %v1435_v35, %v6912_v23 }
 0x57a   : > { %v1518_v17 = vcombine.high %v1370_v57, %v8579_v52 }
 0x57b   : > { %v7083_v41 = vrot.slane %v1525_v50, %v6912_v23  ;;  %1625 = vrot.lane.b32.xlu0 %v1465_v47, %s6534_s29  ;;  %v1533_v8 = vcombine.high %v1525_v50, %v8579_v52  ;;  %v1498_v47 = vrot.slane %v1484_v40, %v6912_v23  ;;  %v1434_v50 = vrot.slane %v1420_v29, %v6909_v20 }
 0x57c   : > { %v1408_v40 = vrot.slane %v1385_v4, %v6912_v23  ;;  %v1532_v35 = vrot.slane %v1518_v17, %v6909_v20  ;;  %v1417_v29 = vcombine.high %v1400_v34, %v8579_v52  ;;  %v1466_v11 = vcombine.high %v1449_v2, %v8579_v52 }
 0x57d   : > { %v1563_v6 = vcombine.high %v7083_v41, %v8579_v52  ;;  %v1547_v1 = vrot.slane %v1533_v8, %v6912_v23  ;;  %v1515_v57 = vcombine.high %v1498_v47, %v8579_v52 }
 0x57e   : > { %v1555_v8 = vrot.slane %v1532_v35, %v6912_v23  ;;  %v1418_v17 = vcombine.high %v1408_v40, %v8579_v52 }
 0x57f   : > { %1627 = vrot.lane.b32.xlu1 %v1563_v6, %s6534_s29  ;;  %1577 = vrot.lane.b32.xlu0 %v1400_v34, %s6535_s23  ;;  %v1457_v6 = vrot.slane %v1434_v50, %v6912_v23  ;;  %v1564_v7 = vcombine.high %v1547_v1, %v8579_v52  ;;  %v1516_v34 = vcombine.high %v1506_v62, %v8579_v52 }
 0x583   : > { %1579 = vrot.lane.b32.xlu1 %v1498_v47, %s6535_s23  ;;  %1633 = vrot.lane.b32.xlu0 %v1449_v2, %s6535_s23  ;;  %v1401_v47 = vcombine.high %v1385_v4, %v8579_v52  ;;  %v1565_v2 = vcombine.high %v1555_v8, %v8579_v52  ;;  %v1548_v4 = vcombine.high %v1532_v35, %v8579_v52 }
 0x587   : > { %1635 = vrot.lane.b32.xlu1 %v1547_v1, %s6535_s23  ;;  %1593 = vrot.lane.b32.xlu0 %v1408_v40, %s6536_s24  ;;  %v1499_v1 = vcombine.high %v1483_v46, %v8579_v52  ;;  %v1415_v40 = vrot.slane %v1401_v47, %v6912_v23  ;;  %v1562_v46 = vrot.slane %v1548_v4, %v6912_v23 }
 0x589   : > { %v1566_v35 = vcombine.high %v1562_v46, %v8579_v52 }
 0x58b   : > { %1595 = vrot.lane.b32.xlu1 %v1506_v62, %s6536_s24  ;;  %1649 = vrot.lane.b32.xlu0 %v1457_v6, %s6536_s24  ;;  %v1513_v62 = vrot.slane %v1499_v1, %v6912_v23 }
 0x58f   : > { %1651 = vrot.lane.b32.xlu1 %v1555_v8, %s6536_s24  ;;  %1585 = vrot.lane.b32.xlu0 %v1417_v29, %s6537_s16  ;;  %v1467_v29 = vcombine.high %v1457_v6, %v8579_v52  ;;  %v1419_v8 = vcombine.high %v1415_v40, %v8579_v52 }
 0x593   : > { %1587 = vrot.lane.b32.xlu1 %v1515_v57, %s6537_s16  ;;  %1641 = vrot.lane.b32.xlu0 %v1466_v11, %s6537_s16  ;;  %v1450_v57 = vcombine.high %v1434_v50, %v8579_v52  ;;  %v1517_v50 = vcombine.high %v1513_v62, %v8579_v52 }
 0x595   : > { %v1464_v6 = vrot.slane %v1450_v57, %v6912_v23 }
 0x597   : > { %1643 = vrot.lane.b32.xlu1 %v1564_v7, %s6537_s16  ;;  %1601 = vrot.lane.b32.xlu0 %v1418_v17, %s6538_s17  ;;  %v1468_v11 = vcombine.high %v1464_v6, %v8579_v52  ;;  %v1078_v7 = vcombine.high %v7003_v13, %v8579_v52  ;;  %v1176_v17 = vcombine.high %v7014_v18, %v8579_v52 }
 0x59b   : > { %1603 = vrot.lane.b32.xlu1 %v1516_v34, %s6538_s17  ;;  %1657 = vrot.lane.b32.xlu0 %v1467_v29, %s6538_s17  ;;  %v7158_v34 = vpop.permute.xlu0 %1219  ;;  %v7160_v29 = vpop.permute.xlu1 %1221 }
 0x59f   : > { %1659 = vrot.lane.b32.xlu1 %v1565_v2, %s6538_s17  ;;  %1609 = vrot.lane.b32.xlu0 %v1415_v40, %s6539_s26  ;;  %v7162_v47 = vpop.permute.xlu0 %1275  ;;  %v7164_v2 = vpop.permute.xlu1 %1277 }
 0x5a0   : > { %8647 = vst [vmem:[#allocation33_spill] sm:$0xff] %v7164_v2  ;;  %v1311_v2 = vsel %vm1291_vm7, %v1309_v61, %v7032_v32 }
 0x5a1   : > { %v1313_v61 = vsel %vm1294_vm8, %v1311_v2, %v7048_v54  ;;  %v1314_v54 = vsel %vm1294_vm8, %v1312_v26, %v7050_v55 }
 0x5a2   : > { %v1316_v38 = vsel %vm1297_vm9, %v1314_v54, %v7042_v44  ;;  %v8651_v54 = vmov 0.0  }
 0x5a3   : > { %1611 = vrot.lane.b32.xlu1 %v1513_v62, %s6539_s26  ;;  %1665 = vrot.lane.b32.xlu0 %v1464_v6, %s6539_s26  ;;  %v7166_v1 = vpop.permute.xlu0 %1227  ;;  %v7168_v13 = vpop.permute.xlu1 %1229 }
 0x5a7   : > { %1667 = vrot.lane.b32.xlu1 %v1562_v46, %s6539_s26  ;;  %1617 = vrot.lane.b32.xlu0 %v1419_v8, %s6530_s21 }
 0x5ab   : > { %1619 = vrot.lane.b32.xlu1 %v1517_v50, %s6530_s21  ;;  %1673 = vrot.lane.b32.xlu0 %v1468_v11, %s6530_s21 }
 0x5af   : > { %1675 = vrot.lane.b32.xlu1 %v1566_v35, %s6530_s21  ;;  %1283 = vrot.lane.b32.xlu0 %v1078_v7, %s6530_s21 }
 0x5b3   : > { %1285 = vrot.lane.b32.xlu1 %v1176_v17, %s6530_s21 }
 0x5e9   : > { %v1570_v40 = vpop.permute.xlu0 %1569  ;;  %v1572_v57 = vpop.permute.xlu1 %1571 }
 0x5ea   : > { %v1679_v43 = vsel %vm527_vm1, %v7066_v63, %v1570_v40  ;;  %v1680_v9 = vsel %vm527_vm1, %v7063_v12, %v1572_v57  ;;  %v1298_v12 = vsel %vm1297_vm9, %v1295_v39, %v7036_v36 }
 0x5eb   : > { %v1301_v63 = vsel %vm1300_vm10, %v1298_v12, %v7052_v56 }
 0x5ed   : > { %v1626_v62 = vpop.permute.xlu0 %1625 }
 0x5ee   : > { %v1693_v37 = vsel %vm527_vm1, %v7074_v53, %v1626_v62 }
 0x5f1   : > { %v1628_v4 = vpop.permute.xlu1 %1627  ;;  %v1578_v6 = vpop.permute.xlu0 %1577 }
 0x5f2   : > { %v1681_v25 = vsel %vm1291_vm7, %v1679_v43, %v1578_v6  ;;  %v1694_v30 = vsel %vm527_vm1, %v7083_v41, %v1628_v4  ;;  %v1315_v41 = vsel %vm1297_vm9, %v1313_v61, %v7040_v42 }
 0x5f5   : > { %v1580_v18 = vpop.permute.xlu1 %1579  ;;  %v1634_v46 = vpop.permute.xlu0 %1633 }
 0x5f6   : > { %v1695_v49 = vsel %vm1291_vm7, %v1693_v37, %v1634_v46  ;;  %v1682_v59 = vsel %vm1291_vm7, %v1680_v9, %v1580_v18  ;;  %v1302_v18 = vsel %vm1300_vm10, %v1299_v10, %v7054_v58  ;;  %v1317_v46 = vsel %vm1300_vm10, %v1315_v41, %v7056_v60  ;;  %v8648_v37 = vld [vmem:[#allocation33_spill] sm:$0xff]  ;;  %v8652_v10 = vld [vmem:[#allocation26_spill] sm:$0xff] }
 0x5f7   : > { %v1319_v58 = vsel %vm1303_vm11, %v1317_v46, %v7162_v47  ;;  %v1734_v47 = vcombine.high %v6818_v51, %v6744_v27 }
 0x5f9   : > { %v1636_v8 = vpop.permute.xlu1 %1635  ;;  %v1594_v50 = vpop.permute.xlu0 %1593 }
 0x5fd   : > { %v1596_v11 = vpop.permute.xlu1 %1595  ;;  %v1650_v35 = vpop.permute.xlu0 %1649 }
 0x601   : > { %v1652_v7 = vpop.permute.xlu1 %1651  ;;  %v1586_v17 = vpop.permute.xlu0 %1585 }
 0x602   : > { %v1683_v32 = vsel %vm1294_vm8, %v1681_v25, %v1586_v17 }
 0x603   : > { %v1685_v55 = vsel %vm1297_vm9, %v1683_v32, %v1594_v50 }
 0x605   : > { %v1588_v52 = vpop.permute.xlu1 %1587  ;;  %v1642_v23 = vpop.permute.xlu0 %1641 }
 0x606   : > { %v1697_v53 = vsel %vm1294_vm8, %v1695_v49, %v1642_v23  ;;  %v1684_v45 = vsel %vm1294_vm8, %v1682_v59, %v1588_v52  ;;  %v1696_v23 = vsel %vm1291_vm7, %v1694_v30, %v1636_v8 }
 0x607   : > { %v1699_v52 = vsel %vm1297_vm9, %v1697_v53, %v1650_v35  ;;  %v1686_v2 = vsel %vm1297_vm9, %v1684_v45, %v1596_v11  ;;  %v1305_v11 = vsel %vm1303_vm11, %v1302_v18, %v7160_v29 }
 0x608   : > { %v1308_v29 = vsel %vm1306_vm12, %v1305_v11, %v7168_v13  ;;  %v8649_v13 = vcombine.low %v6818_v51, %v6744_v27 }
 0x609   : > { %v1644_v20 = vpop.permute.xlu1 %1643  ;;  %v1602_v28 = vpop.permute.xlu0 %1601  ;;  %v1334_v25 = vrot.slane %v1308_v29, %v6888_v3 }
 0x60a   : > { %v1698_v33 = vsel %vm1294_vm8, %v1696_v23, %v1644_v20  ;;  %v1687_v57 = vsel %vm1300_vm10, %v1685_v55, %v1602_v28  ;;  %v5823_v23 = vld.sshfl [vmem:[%s6655_s14 + $0x2] sm:$0x11 pattern:$0x75316420] }
 0x60b   : > { %v1700_v56 = vsel %vm1297_vm9, %v1698_v33, %v1652_v7  ;;  %v8653_v33 = vld [vmem:[#allocation27_spill] sm:$0xff] }
 0x60d   : > { %v1604_v22 = vpop.permute.xlu1 %1603  ;;  %v1658_v21 = vpop.permute.xlu0 %1657 }
 0x60e   : > { %v1701_v36 = vsel %vm1300_vm10, %v1699_v52, %v1658_v21  ;;  %v1688_v42 = vsel %vm1300_vm10, %v1686_v2, %v1604_v22  ;;  %v1844_v52 = vrot.slane %v5823_v23, %v8653_v33 }
 0x611   : > { %v1660_v16 = vpop.permute.xlu1 %1659  ;;  %v1610_v15 = vpop.permute.xlu0 %1609 }
 0x612   : > { %v1689_v4 = vsel %vm1303_vm11, %v1687_v57, %v1610_v15  ;;  %v1702_v44 = vsel %vm1300_vm10, %v1700_v56, %v1660_v16  ;;  %v1304_v15 = vsel %vm1303_vm11, %v1301_v63, %v7158_v34  ;;  %v1837_v63 = vcombine.high %v5823_v23, %v5823_v23  ;;  %v8666_v23 = vld [vmem:[#allocation19_spill] sm:$0xff] }
 0x613   : > { %v1307_v16 = vsel %vm1306_vm12, %v1304_v15, %v7166_v1  ;;  %v1318_v1 = vsel %vm1300_vm10, %v1316_v38, %v7058_v0 }
 0x614   : > { %v1326_v39 = vrot.slane %v1307_v16, %v6888_v3  ;;  %v1320_v24 = vsel %vm1303_vm11, %v1318_v1, %v8648_v37 }
 0x615   : > { %v1612_v5 = vpop.permute.xlu1 %1611  ;;  %v1666_v31 = vpop.permute.xlu0 %1665 }
 0x616   : > { %v1703_v20 = vsel %vm1303_vm11, %v1701_v36, %v1666_v31  ;;  %v1690_v6 = vsel %vm1303_vm11, %v1688_v42, %v1612_v5  ;;  %v1851_v36 = vrot.slane %v1837_v63, %v8653_v33  ;;  %v8670_v63 = vld [vmem:[#allocation23_spill] sm:$0xff] }
 0x619   : > { %v1668_v14 = vpop.permute.xlu1 %1667  ;;  %v1618_v48 = vpop.permute.xlu0 %1617 }
 0x61a   : > { %v1691_v28 = vsel %vm1306_vm12, %v1689_v4, %v1618_v48  ;;  %v1704_v8 = vsel %vm1303_vm11, %v1702_v44, %v1668_v14 }
 0x61b   : > { %v1710_v7 = vrot.slane %v1691_v28, %v6888_v3 }
 0x61d   : > { %v1620_v40 = vpop.permute.xlu1 %1619  ;;  %v1674_v62 = vpop.permute.xlu0 %1673 }
 0x61e   : > { %v1705_v21 = vsel %vm1306_vm12, %v1703_v20, %v1674_v62  ;;  %v1692_v22 = vsel %vm1306_vm12, %v1690_v6, %v1620_v40 }
 0x61f   : > { %v1714_v5 = vrot.slane %v1705_v21, %v6888_v3  ;;  %v1718_v34 = vrot.slane %v1692_v22, %v6888_v3 }
 0x621   : > { %v1676_v50 = vpop.permute.xlu1 %1675  ;;  %v1284_v35 = vpop.permute.xlu0 %1283  ;;  %v1727_v43 = vcombine.low %v1710_v7, %v1714_v5 }
 0x622   : > { %v1706_v60 = vsel %vm1306_vm12, %v1704_v8, %v1676_v50  ;;  %v1321_v17 = vsel %vm1306_vm12, %v1319_v58, %v1284_v35 }
 0x623   : > { %v1722_v31 = vrot.slane %v1706_v60, %v6888_v3  ;;  %v1330_v19 = vrot.slane %v1321_v17, %v6888_v3  ;;  %v1737_v53 = vmul.f32 %v8649_v13, %v1727_v43  ;;  %v8655_v17 = vld [vmem:[#allocation28_spill] sm:$0xff]  ;;  %v8661_v13 = vld [vmem:[#allocation15_spill] sm:$0xff] }
 0x624   : > { %v8658_v43 = vld [vmem:[#allocation12_spill] sm:$0xff] }
 0x625   : > { %v1728_v9 = vcombine.low %v1718_v34, %v1722_v31  ;;  %v1286_v49 = vpop.permute.xlu1 %1285  ;;  %v1343_v59 = vcombine.low %v1326_v39, %v1330_v19  ;;  %v8654_v34 = vmov 0.0|0.0   ;;  %v8656_v31 = vld [vmem:[#allocation10_spill] sm:$0xff] }
 0x626   : > { %v1322_v61 = vsel %vm1306_vm12, %v1320_v24, %v1286_v49  ;;  %v8657_v24 = vld [vmem:[#allocation11_spill] sm:$0xff]  ;;  %v8660_v49 = vld [vmem:[#allocation14_spill] sm:$0xff] }
 0x627   : > { %v1338_v0 = vrot.slane %v1322_v61, %v6888_v3  ;;  %v1738_v14 = vmul.f32 %v1734_v47, %v1728_v9  ;;  %v7275_v30 = vadd.f32 %v1737_v53, %v1343_v59  ;;  %v8659_v9 = vld [vmem:[#allocation13_spill] sm:$0xff]  ;;  %v5822_v59 = vld [vmem:[%s6660_s18 + $0x2] sm:$0x3] }
 0x629   : > { %v1344_v26 = vcombine.low %v1334_v25, %v1338_v0 }
 0x62b   : > { %v7277_v32 = vadd.f32 %v1738_v14, %v1344_v26  ;;  %v8662_v14 = vld [vmem:[#allocation16_spill] sm:$0xff] }
 0x62d   : > { %8650 = vst [vmem:[#allocation33_spill] sm:$0xff] %v7277_v32  ;;  %v1743_v45 = vcombine.low %v7275_v30, %v7277_v32  ;;  %v1744_v48 = vcombine.high %v7275_v30, %v7277_v32 }
 0x62f   : > { %1821 = vmatprep.mubr.f32.mxu1 %v1744_v48  ;;  %v8663_v48 = vld [vmem:[#allocation17_spill] sm:$0xff] }
 0x630   : > { %1822 = vmatmul.mubr.f32.vlgmr.msra.gmra.mrb[10].mxu1 %v1743_v45 }
 0x631   : > { %6113 = vmatprep.mubr.msk.f32.mxu1 %vm6528_vm0, %v8651_v54 }
 0x703   : > { %v5951_v12 = vpop.f32.mrb[10].mxu1 }
 0x704   : > { %v5952_v27 = vpop.f32.mrb[11].mxu1 }
 0x705   : > { %v5953_v51 = vadd.f32 %v5952_v27, %v5951_v12  ;;  %v8664_v12 = vld [vmem:[#allocation18_spill] sm:$0xff]  ;;  %v8665_v27 = vld [vmem:[#allocation29_spill] sm:$0xff] }
 0x707   : > { %v1824_v41 = vadd.f32 %v5953_v51, %v8652_v10  ;;  %v8667_v10 = vld [vmem:[#allocation20_spill] sm:$0xff] }
 0x709   : > { %6085 = vmatpush3.xpose.msk.msra.mxu0 %vm527_vm1, %v1824_v41  ;;  %v1828_v55 = vcombine.high %v1824_v41, %v1824_v41 }
 0x70a   : > { %6089 = vmatprep.subr.mxu0 %v8651_v54 }
 0x70c   : > { %6087 = vmatmul.mubr.msk.f32.vlgmr.msra.gmra.mrb[2].mxu0 %vm527_vm1, %v1844_v52  ;;  %v8669_v52 = vld [vmem:[#allocation22_spill] sm:$0xff] }
 0x70d   : > { %6090 = vmatpush3.xpose.msk.msra.mxu0 %vm527_vm1, %v1828_v55  ;;  %6091 = vmatprep.mubr.msk.f32.mxu0 %vm6528_vm0, %v8651_v54 }
 0x70e   : > { %6094 = vmatprep.subr.mxu0 %v8651_v54 }
 0x710   : > { %6092 = vmatmul.mubr.msk.f32.vlgmr.msra.gmra.mrb[4].mxu0 %vm527_vm1, %v1851_v36  ;;  %v8672_v36 = vld [vmem:[#allocation25_spill] sm:$0xff] }
 0x711   : > { %6096 = vmatprep.mubr.msk.f32.mxu0 %vm6528_vm0, %v8651_v54 }
 0x7df   : > { %v1922_v2 = vpop.f32.mrb[2].mxu0 }
 0x7e0   : > { %v2000_v40 = vmul.f32 0.25, %v1922_v2  ;;  %v6088_v38 = vpop.f32.mrb[3].mxu0 }
 0x7e1   : > { %v8673_v38 = vld [vmem:[#allocation30_spill] sm:$0xff] }
 0x7e2   : > { %v2002_v57 = vsel %vm678_vm2, %v2000_v40, -inf }
 0x7e3   : > { %2003 = vmax.xlane.f32.xlu0 %v2002_v57  ;;  %v1996_v42 = vpop.f32.mrb[4].mxu0 }
 0x7e4   : > { %v2001_v20 = vmul.f32 0.25, %v1996_v42  ;;  %v6093_v62 = vpop.f32.mrb[5].mxu0 }
 0x7e6   : > { %v2005_v4 = vsel %vm678_vm2, %v2001_v20, -inf }
 0x7e7   : > { %2006 = vmax.xlane.f32.xlu1 %v2005_v4 }
 0x7f8   : > { %2101 = vrot.lane.b32.xlu1 %v1828_v55, %s6530_s21  ;;  %v8671_v55 = vld [vmem:[#allocation24_spill] sm:$0xff] }
 0x870   : > { %v2004_v56 = vpop.xlane.xlu0 %2003 }
 0x871   : > { %v2008_v6 = vsub.f32 %v2000_v40, %v2004_v56 }
 0x873   : > { %v2010_v21 = vmul.f32 1.442695, %v2008_v6 }
 0x874   : > { %v2007_v18 = vpop.xlane.xlu1 %2006 }
 0x875   : > { %6383 = vpow2.f32 %v2010_v21  ;;  %v2009_v44 = vsub.f32 %v2001_v20, %v2007_v18  ;;  %v8674_v20 = vld [vmem:[#allocation31_spill] sm:$0xff] }
 0x877   : > { %v2012_v28 = vmul.f32 1.442695, %v2009_v44 }
 0x878   : > { %v2102_v35 = vpop.permute.xlu1 %2101 }
 0x879   : > { %6385 = vpow2.f32 %v2012_v28 }
 0x87f   : > { %v6384_v22 = vpop.eup %6383 }
 0x880   : > { %v2014_v46 = vsel %vm678_vm2, %v6384_v22, 0.0 }
 0x881   : > { %2015 = vadd.xlane.f32.xlu0 %v2014_v46 }
 0x883   : > { %v6386_v15 = vpop.eup %6385 }
 0x884   : > { %v2017_v8 = vsel %vm678_vm2, %v6386_v15, 0.0 }
 0x885   : > { %2018 = vadd.xlane.f32.xlu0 %v2017_v8 }
 0x89b   : > { %2024 = vrot.lane.b32.xlu0 %v1824_v41, %s6530_s21  ;;  %v8668_v41 = vld [vmem:[#allocation21_spill] sm:$0xff] }
 0x90e   : > { %v2016_v5 = vpop.xlane.xlu0 %2015 }
 0x90f   : > { %6387 = vrcp.f32 %v2016_v5 }
 0x912   : > { %v2019_v50 = vpop.xlane.xlu0 %2018 }
 0x913   : > { %6389 = vrcp.f32 %v2019_v50 }
 0x916   : > { %v2025_v58 = vpop.permute.xlu0 %2024 }
 0x917   : > { %6095 = vmatpush3.msk.msra.mxu0 %vm707_vm3, %v2025_v58 }
 0x918   : > { %6099 = vmatprep.subr.mxu0 %v8651_v54 }
 0x919   : > { %v6388_v16 = vpop.eup %6387 }
 0x91a   : > { %v2022_v11 = vmul.f32 %v6388_v16, %v6384_v22 }
 0x91c   : > { %6097 = vmatmul.mubr.msk.f32.vlgmr.msra.gmra.mrb[6].mxu0 %vm703_vm4, %v2022_v11 }
 0x91d   : > { %v6390_v60 = vpop.eup %6389  ;;  %6100 = vmatpush3.msk.msra.mxu0 %vm707_vm3, %v2102_v35  ;;  %6101 = vmatprep.mubr.msk.f32.mxu0 %vm6528_vm0, %v8651_v54 }
 0x91e   : > { %v2023_v7 = vmul.f32 %v6390_v60, %v6386_v15  ;;  %6232 = vmatprep.subr.bf16.mxu0 %v8654_v34 }
 0x920   : > { %6102 = vmatmul.mubr.msk.f32.vlgmr.msra.gmra.mrb[8].mxu0 %vm703_vm4, %v2023_v7 }
 0x921   : > { %6234 = vmatpush3.bf16.msra.mxu0 %v8655_v17  ;;  %6108 = vmatprep.mubr.msk.f32.mxu0 %vm6528_vm0, %v8651_v54 }
 0x922   : > { %6236 = vmatprep.subr.bf16.mxu0 %v8656_v31 }
 0x9ef   : > { %v2097_v47 = vpop.f32.mrb[6].mxu0 }
 0x9f0   : > { %v6098_v1 = vpop.f32.mrb[7].mxu0 }
 0x9f3   : > { %v2174_v29 = vpop.f32.mrb[8].mxu0 }
 0x9f4   : > { %v2180_v19 = vrot.slane %v2174_v29, 7  ;;  %6391 = vtanh.f32 %v2174_v29  ;;  %v6103_v39 = vpop.f32.mrb[9].mxu0 }
 0x9f5   : > { %6393 = vtanh.f32 %v2097_v47 }
 0x9f6   : > { %v7318_v37 = vsel %vm866_vm5, %v2180_v19, %v2097_v47 }
 0x9f7   : > { %6109 = vmatmul.mubr.msk.f32.vlgmr.msra.gmra.mrb[10].mxu0 %vm527_vm1, %v7318_v37 }
 0x9f8   : > { %6238 = vmatpush3.bf16.msra.mxu0 %v8657_v24 }
 0x9f9   : > { %6240 = vmatprep.subr.bf16.mxu0 %v8658_v43 }
 0x9fc   : > { %6242 = vmatpush3.bf16.msra.mxu0 %v8659_v9 }
 0x9fd   : > { %6244 = vmatprep.subr.bf16.mxu0 %v8660_v49 }
 0x9fe   : > { %v6392_v61 = vpop.eup %6391 }
 0x9ff   : > { %v2269_v25 = vrot.slane %v6392_v61, 7  ;;  %v6394_v0 = vpop.eup %6393 }
 0xa00   : > { %6246 = vmatpush3.bf16.msra.mxu0 %v8661_v13 }
 0xa01   : > { %v2270_v53 = vsel %vm866_vm5, %v2269_v25, %v6394_v0  ;;  %6248 = vmatprep.subr.bf16.mxu0 %v8662_v14 }
 0xa02   : > { %v2272_v26 = vmul.f32 %v5822_v59, %v2270_v53 }
 0xa04   : > { %v2276_v45 = vrot.slane %v2272_v26, %v6888_v3  ;;  %6250 = vmatpush3.bf16.msra.mxu0 %v8663_v48  ;;  %v2287_v51 = vrot.slane %v2272_v26, %v8665_v27 }
 0xa05   : > { %6252 = vmatprep.subr.bf16.mxu0 %v8664_v12 }
 0xa06   : > { %2282 = vbcast.lane.b32.xlu1 %v2276_v45, 264  ;;  %2278 = vbcast.lane.b32.xlu0 %v2276_v45, 256 }
 0xa08   : > { %6254 = vmatpush3.bf16.msra.mxu0 %v8666_v23 }
 0xa09   : > { %6256 = vmatprep.subr.bf16.mxu0 %v8667_v10 }
 0xa0a   : > { %2293 = vbcast.lane.b32.xlu1 %v2287_v51, 264  ;;  %2289 = vbcast.lane.b32.xlu0 %v2287_v51, 256 }
 0xa0c   : > { %6258 = vmatpush3.bf16.msra.mxu0 %v8668_v41 }
 0xa0d   : > { %6260 = vmatprep.subr.bf16.mxu0 %v8669_v52 }
 0xa10   : > { %6262 = vmatpush3.bf16.msra.mxu0 %v8670_v63 }
 0xa11   : > { %6264 = vmatprep.subr.bf16.mxu0 %v8671_v55 }
 0xa14   : > { %6266 = vmatpush3.bf16.msra.mxu0 %v8672_v36 }
 0xa15   : > { %6138 = vmatprep.subr.mxu0 %v8651_v54 }
 0xa78   : > { %v2283_v2 = vpop.permute.xlu1 %2282  ;;  %v2279_v40 = vpop.permute.xlu0 %2278 }
 0xa79   : > { %v2302_v57 = vrot.slane %v2279_v40, %v8673_v38  ;;  %v2351_v42 = vrot.slane %v2283_v2, %v8673_v38  ;;  %v2295_v5 = vcombine.high %v2279_v40, %v8651_v54  ;;  %v2344_v35 = vcombine.high %v2283_v2, %v8651_v54 }
 0xa7b   : > { %v7345_v62 = vrot.slane %v2302_v57, %v8674_v20  ;;  %v7348_v6 = vrot.slane %v2351_v42, %v8674_v20  ;;  %v2310_v22 = vcombine.high %v2302_v57, %v8651_v54  ;;  %v2359_v50 = vcombine.high %v2351_v42, %v8651_v54 }
 0xa7c   : > { %v2294_v4 = vpop.permute.xlu1 %2293  ;;  %v2290_v56 = vpop.permute.xlu0 %2289  ;;  %v2309_v60 = vrot.slane %v2295_v5, %v8673_v38  ;;  %v2358_v19 = vrot.slane %v2344_v35, %v8673_v38 }
 0xa7d   : > { %v2449_v21 = vrot.slane %v2294_v4, %v8673_v38  ;;  %v2400_v18 = vrot.slane %v2290_v56, %v8673_v38  ;;  %v2340_v44 = vcombine.high %v7345_v62, %v8651_v54  ;;  %v2389_v15 = vcombine.high %v7348_v6, %v8651_v54 }
 0xa7e   : > { %v2324_v16 = vrot.slane %v2310_v22, %v8674_v20  ;;  %v2393_v47 = vcombine.high %v2290_v56, %v8651_v54  ;;  %v2373_v1 = vrot.slane %v2359_v50, %v8674_v20  ;;  %v2442_v39 = vcombine.high %v2294_v4, %v8651_v54 }
 0xa7f   : > { %v7355_v28 = vrot.slane %v2400_v18, %v8674_v20  ;;  %2493 = vrot.lane.b32.xlu0 %v2340_v44, %s6534_s29  ;;  %v7360_v46 = vrot.slane %v2449_v21, %v8674_v20  ;;  %v2408_v58 = vcombine.high %v2400_v18, %v8651_v54  ;;  %v2457_v7 = vcombine.high %v2449_v21, %v8651_v54  ;;  %v8675_v44 = vld [vmem:[#allocation32_spill] sm:$0xff] }
 0xa80   : > { %v2407_v61 = vrot.slane %v2393_v47, %v8673_v38  ;;  %v2332_v25 = vrot.slane %v2309_v60, %v8674_v20  ;;  %v2456_v0 = vrot.slane %v2442_v39, %v8673_v38  ;;  %v2381_v53 = vrot.slane %v2358_v19, %v8674_v20 }
 0xa81   : > { %v2438_v8 = vcombine.high %v7355_v28, %v8651_v54  ;;  %v2487_v11 = vcombine.high %v7360_v46, %v8651_v54  ;;  %v2422_v29 = vrot.slane %v2408_v58, %v8674_v20  ;;  %v2471_v59 = vrot.slane %v2457_v7, %v8674_v20 }
 0xa82   : > { %v2430_v26 = vrot.slane %v2407_v61, %v8674_v20  ;;  %v2341_v45 = vcombine.high %v2324_v16, %v8651_v54  ;;  %v2479_v51 = vrot.slane %v2456_v0, %v8674_v20  ;;  %v2390_v2 = vcombine.high %v2373_v1, %v8651_v54 }
 0xa83   : > { %2549 = vrot.lane.b32.xlu0 %v2389_v15, %s6534_s29  ;;  %2495 = vrot.lane.b32.xlu1 %v2438_v8, %s6534_s29  ;;  %v2439_v40 = vcombine.high %v2422_v29, %v8651_v54  ;;  %v2342_v57 = vcombine.high %v2332_v25, %v8651_v54  ;;  %v2488_v42 = vcombine.high %v2471_v59, %v8651_v54 }
 0xa84   : > { %v2391_v4 = vcombine.high %v2381_v53, %v8651_v54  ;;  %v2440_v56 = vcombine.high %v2430_v26, %v8651_v54  ;;  %v2489_v21 = vcombine.high %v2479_v51, %v8651_v54 }
 0xa87   : > { %2501 = vrot.lane.b32.xlu0 %v2324_v16, %s6535_s23  ;;  %2551 = vrot.lane.b32.xlu1 %v2487_v11, %s6534_s29  ;;  %v5820_v16 = vld [vmem:[%s6650_s27 + $0x2] sm:$0x3]  ;;  %v2325_v11 = vcombine.high %v2309_v60, %v8651_v54  ;;  %v2423_v60 = vcombine.high %v2407_v61, %v8651_v54 }
 0xa89   : > { %v2339_v39 = vrot.slane %v2325_v11, %v8674_v20 }
 0xa8b   : > { %2557 = vrot.lane.b32.xlu0 %v2373_v1, %s6535_s23  ;;  %2503 = vrot.lane.b32.xlu1 %v2422_v29, %s6535_s23  ;;  %v2374_v29 = vcombine.high %v2358_v19, %v8651_v54  ;;  %v2343_v19 = vcombine.high %v2339_v39, %v8651_v54 }
 0xa8f   : > { %2517 = vrot.lane.b32.xlu0 %v2332_v25, %s6536_s24  ;;  %2559 = vrot.lane.b32.xlu1 %v2471_v59, %s6535_s23  ;;  %v7427_v25 = vrot.slane %v2374_v29, %v8674_v20  ;;  %v2437_v59 = vrot.slane %v2423_v60, %v8674_v20 }
 0xa91   : > { %v2441_v61 = vcombine.high %v2437_v59, %v8651_v54 }
 0xa93   : > { %2573 = vrot.lane.b32.xlu0 %v2381_v53, %s6536_s24  ;;  %2519 = vrot.lane.b32.xlu1 %v2430_v26, %s6536_s24 }
 0xa97   : > { %2509 = vrot.lane.b32.xlu0 %v2341_v45, %s6537_s16  ;;  %2575 = vrot.lane.b32.xlu1 %v2479_v51, %s6536_s24 }
 0xa9b   : > { %2565 = vrot.lane.b32.xlu0 %v2390_v2, %s6537_s16  ;;  %2511 = vrot.lane.b32.xlu1 %v2439_v40, %s6537_s16 }
 0xa9f   : > { %2525 = vrot.lane.b32.xlu0 %v2342_v57, %s6538_s17  ;;  %2567 = vrot.lane.b32.xlu1 %v2488_v42, %s6537_s16 }
 0xaa3   : > { %2581 = vrot.lane.b32.xlu0 %v2391_v4, %s6538_s17  ;;  %2527 = vrot.lane.b32.xlu1 %v2440_v56, %s6538_s17 }
 0xaa7   : > { %2583 = vrot.lane.b32.xlu1 %v2489_v21, %s6538_s17 }
 0xaca   : > { %v2250_v18 = vpop.f32.mrb[10].mxu0 }
 0xacb   : > { %v2251_v22 = vadd.f32 %v8675_v44, %v2250_v18  ;;  %v6110_v15 = vpop.f32.mrb[11].mxu0 }
 0xacd   : > { %v5833_v8 = vmul.f32 -1.442695, %v2251_v22 }
 0xacf   : > { %6395 = vpow2.f32 %v5833_v8 }
 0xad9   : > { %v6396_v5 = vpop.eup %6395 }
 0xada   : > { %v2257_v50 = vadd.f32 1.0, %v6396_v5 }
 0xadc   : > { %6397 = vrcp.f32 %v2257_v50 }
 0xae6   : > { %v6398_v58 = vpop.eup %6397 }
 0xae7   : > { %v2670_v35 = vrot.slane %v6398_v58, %v8665_v27  ;;  %v2658_v7 = vrot.slane %v6398_v58, %v6888_v3  ;;  %v2261_v47 = vmul.f32 %v6398_v58, %v7318_v37  ;;  %v2472_v37 = vcombine.high %v2456_v0, %v8651_v54 }
 0xae9   : > { %2673 = vbcast.lane.b32.xlu0 %v2670_v35, 272  ;;  %2661 = vbcast.lane.b32.xlu1 %v2658_v7, 272  ;;  %v2262_v1 = vadd.f32 %v5820_v16, %v2261_v47  ;;  %v7437_v53 = vrot.slane %v2472_v37, %v8674_v20 }
 0xaeb   : > { %5834 = vst.msk [vmem:[%s6662_s11 + $0x2] sm:$0x3] %vm949_vm6, %v2262_v1 }
 0xaed   : > { %2533 = vrot.lane.b32.xlu0 %v2339_v39, %s6539_s26  ;;  %2665 = vbcast.lane.b32.xlu1 %v2658_v7, 280 }
 0xaf1   : > { %2589 = vrot.lane.b32.xlu0 %v7427_v25, %s6539_s26  ;;  %2677 = vbcast.lane.b32.xlu1 %v2670_v35, 280  ;;  %v7443_v26 = vpop.permute.xlu0 %2493 }
 0xaf2   : > { %v2603_v24 = vsel %vm527_vm1, %v7345_v62, %v7443_v26 }
 0xaf5   : > { %2541 = vrot.lane.b32.xlu0 %v2343_v19, %s6530_s21  ;;  %2535 = vrot.lane.b32.xlu1 %v2437_v59, %s6539_s26  ;;  %v7445_v0 = vpop.permute.xlu1 %2495  ;;  %v7447_v45 = vpop.permute.xlu0 %2549 }
 0xaf6   : > { %v2604_v17 = vsel %vm527_vm1, %v7355_v28, %v7445_v0  ;;  %v2617_v34 = vsel %vm527_vm1, %v7348_v6, %v7447_v45 }
 0xaf9   : > { %2591 = vrot.lane.b32.xlu1 %v7437_v53, %s6539_s26  ;;  %v7449_v51 = vpop.permute.xlu1 %2551  ;;  %v7451_v2 = vpop.permute.xlu0 %2501 }
 0xafa   : > { %v2618_v33 = vsel %vm527_vm1, %v7360_v46, %v7449_v51 }
 0xafd   : > { %2543 = vrot.lane.b32.xlu1 %v2441_v61, %s6530_s21  ;;  %v7453_v40 = vpop.permute.xlu1 %2503  ;;  %v7455_v57 = vpop.permute.xlu0 %2557 }
 0xafe   : > { %v2606_v62 = vsel %vm1291_vm7, %v2604_v17, %v7453_v40  ;;  %v2619_v26 = vsel %vm1291_vm7, %v2617_v34, %v7455_v57 }
 0xb01   : > { %v7457_v42 = vpop.permute.xlu1 %2559  ;;  %v7459_v4 = vpop.permute.xlu0 %2517 }
 0xb02   : > { %v2620_v40 = vsel %vm1291_vm7, %v2618_v33, %v7457_v42 }
 0xb05   : > { %v7461_v56 = vpop.permute.xlu1 %2519  ;;  %v7463_v21 = vpop.permute.xlu0 %2573 }
 0xb09   : > { %v7465_v18 = vpop.permute.xlu1 %2575  ;;  %v7467_v44 = vpop.permute.xlu0 %2509 }
 0xb0d   : > { %v7469_v22 = vpop.permute.xlu1 %2511  ;;  %v7471_v15 = vpop.permute.xlu0 %2565 }
 0xb0e   : > { %v2608_v0 = vsel %vm1294_vm8, %v2606_v62, %v7469_v22  ;;  %v2621_v34 = vsel %vm1294_vm8, %v2619_v26, %v7471_v15 }
 0xb0f   : > { %v2623_v33 = vsel %vm1297_vm9, %v2621_v34, %v7463_v21 }
 0xb11   : > { %v7473_v8 = vpop.permute.xlu1 %2567  ;;  %v7475_v5 = vpop.permute.xlu0 %2525 }
 0xb12   : > { %v2622_v15 = vsel %vm1294_vm8, %v2620_v40, %v7473_v8 }
 0xb15   : > { %v7477_v50 = vpop.permute.xlu1 %2527  ;;  %v7479_v58 = vpop.permute.xlu0 %2581 }
 0xb19   : > { %v7481_v16 = vpop.permute.xlu1 %2583 }
 0xb5b   : > { %v2674_v11 = vpop.permute.xlu0 %2673  ;;  %v2662_v35 = vpop.permute.xlu1 %2661 }
 0xb5c   : > { %v2784_v7 = vrot.slane %v2674_v11, %v8673_v38  ;;  %v2686_v47 = vrot.slane %v2662_v35, %v8673_v38 }
 0xb5e   : > { %v7486_v1 = vrot.slane %v2784_v7, %v8674_v20  ;;  %v7489_v29 = vrot.slane %v2686_v47, %v8674_v20  ;;  %v2694_v55 = vcombine.high %v2686_v47, %v8651_v54  ;;  %v2792_v41 = vcombine.high %v2784_v7, %v8651_v54 }
 0xb5f   : > { %v2666_v39 = vpop.permute.xlu1 %2665  ;;  %v2777_v47 = vcombine.high %v2674_v11, %v8651_v54 }
 0xb60   : > { %v2735_v60 = vrot.slane %v2666_v39, %v8673_v38  ;;  %v2822_v37 = vcombine.high %v7486_v1, %v8651_v54  ;;  %v2724_v19 = vcombine.high %v7489_v29, %v8651_v54  ;;  %v2708_v23 = vrot.slane %v2694_v55, %v8674_v20 }
 0xb61   : > { %v2728_v12 = vcombine.high %v2666_v39, %v8651_v54  ;;  %v2791_v55 = vrot.slane %v2777_v47, %v8673_v38 }
 0xb62   : > { %v7497_v59 = vrot.slane %v2735_v60, %v8674_v20  ;;  %2879 = vrot.lane.b32.xlu1 %v2822_v37, %s6534_s29  ;;  %2877 = vrot.lane.b32.xlu0 %v2724_v19, %s6534_s29  ;;  %v2679_v19 = vcombine.high %v2662_v35, %v8651_v54  ;;  %v2743_v10 = vcombine.high %v2735_v60, %v8651_v54 }
 0xb63   : > { %v2678_v61 = vpop.permute.xlu1 %2677  ;;  %v2814_v39 = vrot.slane %v2791_v55, %v8674_v20 }
 0xb64   : > { %v2833_v36 = vrot.slane %v2678_v61, %v8673_v38  ;;  %v2773_v63 = vcombine.high %v7497_v59, %v8651_v54  ;;  %v2693_v7 = vrot.slane %v2679_v19, %v8673_v38  ;;  %v2757_v35 = vrot.slane %v2743_v10, %v8674_v20 }
 0xb65   : > { %v2826_v60 = vcombine.high %v2678_v61, %v8651_v54 }
 0xb66   : > { %v7506_v52 = vrot.slane %v2833_v36, %v8674_v20  ;;  %2933 = vrot.lane.b32.xlu0 %v2773_v63, %s6534_s29  ;;  %v2841_v27 = vcombine.high %v2833_v36, %v8651_v54  ;;  %v2806_v63 = vrot.slane %v2792_v41, %v8674_v20  ;;  %v2742_v36 = vrot.slane %v2728_v12, %v8673_v38 }
 0xb67   : > { %v2716_v41 = vrot.slane %v2693_v7, %v8674_v20  ;;  %v2840_v10 = vrot.slane %v2826_v60, %v8673_v38  ;;  %v2725_v12 = vcombine.high %v2708_v23, %v8651_v54  ;;  %v2774_v19 = vcombine.high %v2757_v35, %v8651_v54 }
 0xb68   : > { %v2871_v37 = vcombine.high %v7506_v52, %v8651_v54  ;;  %v2855_v11 = vrot.slane %v2841_v27, %v8674_v20  ;;  %v2823_v61 = vcombine.high %v2806_v63, %v8651_v54 }
 0xb69   : > { %v2863_v27 = vrot.slane %v2840_v10, %v8674_v20  ;;  %v2726_v60 = vcombine.high %v2716_v41, %v8651_v54 }
 0xb6a   : > { %2935 = vrot.lane.b32.xlu1 %v2871_v37, %s6534_s29  ;;  %2885 = vrot.lane.b32.xlu0 %v2708_v23, %s6535_s23  ;;  %v2765_v37 = vrot.slane %v2742_v36, %v8674_v20  ;;  %v2872_v47 = vcombine.high %v2855_v11, %v8651_v54  ;;  %v2824_v23 = vcombine.high %v2814_v39, %v8651_v54 }
 0xb6e   : > { %2887 = vrot.lane.b32.xlu1 %v2806_v63, %s6535_s23  ;;  %2941 = vrot.lane.b32.xlu0 %v2757_v35, %s6535_s23  ;;  %v2775_v63 = vcombine.high %v2765_v37, %v8651_v54  ;;  %v2807_v35 = vcombine.high %v2791_v55, %v8651_v54 }
 0xb72   : > { %2943 = vrot.lane.b32.xlu1 %v2855_v11, %s6535_s23  ;;  %2901 = vrot.lane.b32.xlu0 %v2716_v41, %s6536_s24  ;;  %v2873_v11 = vcombine.high %v2863_v27, %v8651_v54  ;;  %v2758_v41 = vcombine.high %v2742_v36, %v8651_v54 }
 0xb76   : > { %2903 = vrot.lane.b32.xlu1 %v2814_v39, %s6536_s24  ;;  %2957 = vrot.lane.b32.xlu0 %v2765_v37, %s6536_s24  ;;  %v2821_v39 = vrot.slane %v2807_v35, %v8674_v20  ;;  %v2772_v37 = vrot.slane %v2758_v41, %v8674_v20 }
 0xb7a   : > { %2959 = vrot.lane.b32.xlu1 %v2863_v27, %s6536_s24  ;;  %2893 = vrot.lane.b32.xlu0 %v2725_v12, %s6537_s16  ;;  %v2709_v12 = vcombine.high %v2693_v7, %v8651_v54  ;;  %v2856_v7 = vcombine.high %v2840_v10, %v8651_v54  ;;  %v2825_v27 = vcombine.high %v2821_v39, %v8651_v54 }
 0xb7b   : > { %v2776_v10 = vcombine.high %v2772_v37, %v8651_v54 }
 0xb7c   : > { %v2870_v55 = vrot.slane %v2856_v7, %v8674_v20 }
 0xb7e   : > { %2895 = vrot.lane.b32.xlu1 %v2823_v61, %s6537_s16  ;;  %2949 = vrot.lane.b32.xlu0 %v2774_v19, %s6537_s16  ;;  %v2723_v61 = vrot.slane %v2709_v12, %v8674_v20  ;;  %v2874_v19 = vcombine.high %v2870_v55, %v8651_v54  ;;  %v7583_v12 = vpop.permute.xlu1 %2535 }
 0xb80   : > { %v2727_v36 = vcombine.high %v2723_v61, %v8651_v54 }
 0xb82   : > { %2951 = vrot.lane.b32.xlu1 %v2872_v47, %s6537_s16  ;;  %2909 = vrot.lane.b32.xlu0 %v2726_v60, %s6538_s17  ;;  %v2392_v47 = vcombine.high %v7427_v25, %v8651_v54  ;;  %v2490_v60 = vcombine.high %v7437_v53, %v8651_v54  ;;  %v7587_v35 = vpop.permute.xlu1 %2591  ;;  %v2605_v54 = vsel %vm1291_vm7, %v2603_v24, %v7451_v2 }
 0xb83   : > { %v2607_v28 = vsel %vm1294_vm8, %v2605_v54, %v7467_v44 }
 0xb86   : > { %2911 = vrot.lane.b32.xlu1 %v2824_v23, %s6538_s17  ;;  %2965 = vrot.lane.b32.xlu0 %v2775_v63, %s6538_s17  ;;  %v7581_v23 = vpop.permute.xlu0 %2533  ;;  %v7591_v25 = vpop.permute.xlu1 %2543 }
 0xb8a   : > { %2967 = vrot.lane.b32.xlu1 %v2873_v11, %s6538_s17  ;;  %2917 = vrot.lane.b32.xlu0 %v2723_v61, %s6539_s26  ;;  %v7585_v63 = vpop.permute.xlu0 %2589 }
 0xb8e   : > { %2919 = vrot.lane.b32.xlu1 %v2821_v39, %s6539_s26  ;;  %2973 = vrot.lane.b32.xlu0 %v2772_v37, %s6539_s26  ;;  %v7589_v11 = vpop.permute.xlu0 %2541 }
 0xb92   : > { %2975 = vrot.lane.b32.xlu1 %v2870_v55, %s6539_s26  ;;  %2925 = vrot.lane.b32.xlu0 %v2727_v36, %s6530_s21 }
 0xb96   : > { %2927 = vrot.lane.b32.xlu1 %v2825_v27, %s6530_s21  ;;  %2981 = vrot.lane.b32.xlu0 %v2776_v10, %s6530_s21 }
 0xb9a   : > { %2983 = vrot.lane.b32.xlu1 %v2874_v19, %s6530_s21  ;;  %2597 = vrot.lane.b32.xlu0 %v2392_v47, %s6530_s21 }
 0xb9e   : > { %2599 = vrot.lane.b32.xlu1 %v2490_v60, %s6530_s21 }
 0xbd4   : > { %v2878_v41 = vpop.permute.xlu0 %2877  ;;  %v2880_v61 = vpop.permute.xlu1 %2879 }
 0xbd5   : > { %v2987_v46 = vsel %vm527_vm1, %v7489_v29, %v2878_v41  ;;  %v2988_v24 = vsel %vm527_vm1, %v7486_v1, %v2880_v61  ;;  %v2609_v29 = vsel %vm1297_vm9, %v2607_v28, %v7459_v4 }
 0xbd8   : > { %v2934_v7 = vpop.permute.xlu0 %2933 }
 0xbd9   : > { %v3001_v6 = vsel %vm527_vm1, %v7497_v59, %v2934_v7  ;;  %v2610_v59 = vsel %vm1297_vm9, %v2608_v0, %v7461_v56  ;;  %v2624_v56 = vsel %vm1297_vm9, %v2622_v15, %v7465_v18  ;;  %v5838_v15 = vld.sshfl [vmem:[%s6655_s14 + $0x4] sm:$0x11 pattern:$0x75316420] }
 0xbdc   : > { %v2936_v39 = vpop.permute.xlu1 %2935  ;;  %v2886_v37 = vpop.permute.xlu0 %2885 }
 0xbdd   : > { %v2989_v45 = vsel %vm1291_vm7, %v2987_v46, %v2886_v37  ;;  %v3002_v57 = vsel %vm527_vm1, %v7506_v52, %v2936_v39 }
 0xbe0   : > { %v2888_v53 = vpop.permute.xlu1 %2887  ;;  %v2942_v55 = vpop.permute.xlu0 %2941 }
 0xbe1   : > { %v3003_v17 = vsel %vm1291_vm7, %v3001_v6, %v2942_v55  ;;  %v2990_v54 = vsel %vm1291_vm7, %v2988_v24, %v2888_v53  ;;  %v2612_v55 = vsel %vm1300_vm10, %v2610_v59, %v7477_v50  ;;  %v8680_v59 = vld [vmem:[#allocation27_spill] sm:$0xff] }
 0xbe4   : > { %v2944_v36 = vpop.permute.xlu1 %2943  ;;  %v2902_v27 = vpop.permute.xlu0 %2901 }
 0xbe8   : > { %v2904_v10 = vpop.permute.xlu1 %2903  ;;  %v2958_v19 = vpop.permute.xlu0 %2957 }
 0xbec   : > { %v2960_v47 = vpop.permute.xlu1 %2959  ;;  %v2894_v60 = vpop.permute.xlu0 %2893 }
 0xbed   : > { %v2991_v44 = vsel %vm1294_vm8, %v2989_v45, %v2894_v60  ;;  %v8676_v45 = vld [vmem:[#allocation33_spill] sm:$0xff] }
 0xbee   : > { %v2993_v8 = vsel %vm1297_vm9, %v2991_v44, %v2902_v27  ;;  %v8678_v44 = vmov 0.0  }
 0xbf0   : > { %v2896_v20 = vpop.permute.xlu1 %2895  ;;  %v2950_v38 = vpop.permute.xlu0 %2949 }
 0xbf1   : > { %v3005_v51 = vsel %vm1294_vm8, %v3003_v17, %v2950_v38  ;;  %v2992_v22 = vsel %vm1294_vm8, %v2990_v54, %v2896_v20  ;;  %v3004_v38 = vsel %vm1291_vm7, %v3002_v57, %v2944_v36  ;;  %v2611_v20 = vsel %vm1300_vm10, %v2609_v29, %v7475_v5  ;;  %v7707_v29 = vld [vmem:[%s8551_s5] ss:$0 sm:$0xff] }
 0xbf2   : > { %v3007_v42 = vsel %vm1297_vm9, %v3005_v51, %v2958_v19  ;;  %v2994_v4 = vsel %vm1297_vm9, %v2992_v22, %v2904_v10  ;;  %v2614_v10 = vsel %vm1303_vm11, %v2612_v55, %v7583_v12  ;;  %8679 = vst [vmem:[#allocation32_spill] sm:$0xff] %v7707_v29 }
 0xbf4   : > { %v2952_v48 = vpop.permute.xlu1 %2951  ;;  %v2910_v14 = vpop.permute.xlu0 %2909 }
 0xbf5   : > { %v3006_v52 = vsel %vm1294_vm8, %v3004_v38, %v2952_v48  ;;  %v2995_v7 = vsel %vm1300_vm10, %v2993_v8, %v2910_v14 }
 0xbf6   : > { %v3008_v5 = vsel %vm1297_vm9, %v3006_v52, %v2960_v47  ;;  %v3145_v52 = vcombine.high %v5838_v15, %v5838_v15 }
 0xbf8   : > { %v2912_v13 = vpop.permute.xlu1 %2911  ;;  %v2966_v49 = vpop.permute.xlu0 %2965 }
 0xbf9   : > { %v3009_v41 = vsel %vm1300_vm10, %v3007_v42, %v2966_v49  ;;  %v2996_v21 = vsel %vm1300_vm10, %v2994_v4, %v2912_v13 }
 0xbfc   : > { %v2968_v9 = vpop.permute.xlu1 %2967  ;;  %v2918_v43 = vpop.permute.xlu0 %2917 }
 0xbfd   : > { %v2997_v37 = vsel %vm1303_vm11, %v2995_v7, %v2918_v43  ;;  %v3010_v18 = vsel %vm1300_vm10, %v3008_v5, %v2968_v9  ;;  %v2613_v43 = vsel %vm1303_vm11, %v2611_v20, %v7581_v23  ;;  %v3159_v20 = vrot.slane %v3145_v52, %v8680_v59  ;;  %v8696_v52 = vld [vmem:[#allocation22_spill] sm:$0xff] }
 0xbfe   : > { %v2615_v9 = vsel %vm1306_vm12, %v2613_v43, %v7589_v11  ;;  %v2616_v11 = vsel %vm1306_vm12, %v2614_v10, %v7591_v25 }
 0xbff   : > { %v2634_v12 = vrot.slane %v2615_v9, %v6888_v3  ;;  %v2642_v17 = vrot.slane %v2616_v11, %v6888_v3 }
 0xc00   : > { %v2920_v31 = vpop.permute.xlu1 %2919  ;;  %v2974_v32 = vpop.permute.xlu0 %2973 }
 0xc01   : > { %v3011_v48 = vsel %vm1303_vm11, %v3009_v41, %v2974_v32  ;;  %v2998_v53 = vsel %vm1303_vm11, %v2996_v21, %v2920_v31  ;;  %v2625_v32 = vsel %vm1300_vm10, %v2623_v33, %v7479_v58  ;;  %v3152_v33 = vrot.slane %v5838_v15, %v8680_v59  ;;  %v8693_v15 = vld [vmem:[#allocation19_spill] sm:$0xff] }
 0xc02   : > { %v2627_v50 = vsel %vm1303_vm11, %v2625_v32, %v7585_v63  ;;  %v2626_v63 = vsel %vm1300_vm10, %v2624_v56, %v7481_v16 }
 0xc03   : > { %v2628_v28 = vsel %vm1303_vm11, %v2626_v63, %v7587_v35 }
 0xc04   : > { %v2976_v2 = vpop.permute.xlu1 %2975  ;;  %v2926_v1 = vpop.permute.xlu0 %2925 }
 0xc05   : > { %v2999_v14 = vsel %vm1306_vm12, %v2997_v37, %v2926_v1  ;;  %v3012_v36 = vsel %vm1303_vm11, %v3010_v18, %v2976_v2 }
 0xc06   : > { %v3018_v47 = vrot.slane %v2999_v14, %v6888_v3 }
 0xc08   : > { %v2928_v61 = vpop.permute.xlu1 %2927  ;;  %v2982_v39 = vpop.permute.xlu0 %2981 }
 0xc09   : > { %v3013_v49 = vsel %vm1306_vm12, %v3011_v48, %v2982_v39  ;;  %v3000_v13 = vsel %vm1306_vm12, %v2998_v53, %v2928_v61 }
 0xc0a   : > { %v3022_v31 = vrot.slane %v3013_v49, %v6888_v3  ;;  %v3026_v23 = vrot.slane %v3000_v13, %v6888_v3 }
 0xc0c   : > { %v2984_v27 = vpop.permute.xlu1 %2983  ;;  %v2598_v19 = vpop.permute.xlu0 %2597  ;;  %v3035_v6 = vcombine.low %v3018_v47, %v3022_v31  ;;  %v8682_v47 = vld [vmem:[#allocation28_spill] sm:$0xff] }
 0xc0d   : > { %v3014_v58 = vsel %vm1306_vm12, %v3012_v36, %v2984_v27  ;;  %v2629_v60 = vsel %vm1306_vm12, %v2627_v50, %v2598_v19 }
 0xc0e   : > { %v3030_v62 = vrot.slane %v3014_v58, %v6888_v3  ;;  %v2638_v26 = vrot.slane %v2629_v60, %v6888_v3  ;;  %v3045_v25 = vmul.f32 %v3035_v6, %v7275_v30  ;;  %v8681_v58 = vmov 0.0|0.0   ;;  %v8685_v6 = vld [vmem:[#allocation12_spill] sm:$0xff] }
 0xc10   : > { %v3036_v0 = vcombine.low %v3026_v23, %v3030_v62  ;;  %v2600_v46 = vpop.permute.xlu1 %2599  ;;  %v2651_v34 = vcombine.low %v2634_v12, %v2638_v26  ;;  %v8683_v23 = vld [vmem:[#allocation10_spill] sm:$0xff] }
 0xc11   : > { %v2630_v24 = vsel %vm1306_vm12, %v2628_v28, %v2600_v46  ;;  %v8684_v28 = vld [vmem:[#allocation11_spill] sm:$0xff]  ;;  %v8687_v46 = vld [vmem:[#allocation14_spill] sm:$0xff] }
 0xc12   : > { %v2646_v16 = vrot.slane %v2630_v24, %v6888_v3  ;;  %v3046_v54 = vmul.f32 %v3036_v0, %v8676_v45  ;;  %v7693_v2 = vadd.f32 %v3045_v25, %v2651_v34  ;;  %v8686_v0 = vld [vmem:[#allocation13_spill] sm:$0xff]  ;;  %v5837_v34 = vld [vmem:[%s6660_s18 + $0x4] sm:$0x3]  ;;  %v8688_v25 = vld [vmem:[#allocation15_spill] sm:$0xff] }
 0xc14   : > { %v2652_v51 = vcombine.low %v2642_v17, %v2646_v16 }
 0xc16   : > { %v7695_v40 = vadd.f32 %v3046_v54, %v2652_v51  ;;  %v8689_v54 = vld [vmem:[#allocation16_spill] sm:$0xff] }
 0xc18   : > { %8677 = vst [vmem:[#allocation26_spill] sm:$0xff] %v7695_v40  ;;  %v3051_v35 = vcombine.low %v7693_v2, %v7695_v40  ;;  %v3052_v57 = vcombine.high %v7693_v2, %v7695_v40 }
 0xc1a   : > { %3129 = vmatprep.mubr.f32.mxu0 %v3052_v57  ;;  %v8690_v57 = vld [vmem:[#allocation17_spill] sm:$0xff] }
 0xc1b   : > { %3130 = vmatmul.mubr.f32.vlgmr.msra.gmra.mrb[12].mxu0 %v3051_v35 }
 0xc1c   : > { %6140 = vmatprep.mubr.msk.f32.mxu0 %vm6528_vm0, %v8678_v44 }
 0xcee   : > { %v5997_v22 = vpop.f32.mrb[12].mxu0 }
 0xcef   : > { %v5998_v30 = vpop.f32.mrb[13].mxu0 }
 0xcf0   : > { %v5999_v1 = vadd.f32 %v5998_v30, %v5997_v22  ;;  %v8691_v22 = vld [vmem:[#allocation18_spill] sm:$0xff]  ;;  %v8692_v30 = vld [vmem:[#allocation29_spill] sm:$0xff] }
 0xcf2   : > { %v3132_v38 = vadd.f32 %v7707_v29, %v5999_v1 }
 0xcf4   : > { %6112 = vmatpush3.xpose.msk.msra.mxu1 %vm527_vm1, %v3132_v38  ;;  %v3136_v42 = vcombine.high %v3132_v38, %v3132_v38 }
 0xcf5   : > { %6116 = vmatprep.subr.mxu1 %v8678_v44 }
 0xcf7   : > { %6114 = vmatmul.mubr.msk.f32.vlgmr.msra.gmra.mrb[12].mxu1 %vm527_vm1, %v3152_v33  ;;  %v8695_v33 = vld [vmem:[#allocation21_spill] sm:$0xff] }
 0xcf8   : > { %6117 = vmatpush3.xpose.msk.msra.mxu1 %vm527_vm1, %v3136_v42  ;;  %6118 = vmatprep.mubr.msk.f32.mxu1 %vm6528_vm0, %v8678_v44 }
 0xcf9   : > { %6121 = vmatprep.subr.mxu1 %v8678_v44 }
 0xcfb   : > { %6119 = vmatmul.mubr.msk.f32.vlgmr.msra.gmra.mrb[14].mxu1 %vm527_vm1, %v3159_v20  ;;  %v8698_v20 = vld [vmem:[#allocation24_spill] sm:$0xff] }
 0xcfc   : > { %6123 = vmatprep.mubr.msk.f32.mxu1 %vm6528_vm0, %v8678_v44 }
 0xdca   : > { %v3230_v8 = vpop.f32.mrb[12].mxu1 }
 0xdcb   : > { %v3308_v41 = vmul.f32 0.25, %v3230_v8  ;;  %v6115_v4 = vpop.f32.mrb[13].mxu1  ;;  %v8699_v8 = vld [vmem:[#allocation25_spill] sm:$0xff] }
 0xdcd   : > { %v3310_v61 = vsel %vm678_vm2, %v3308_v41, -inf }
 0xdce   : > { %3311 = vmax.xlane.f32.xlu0 %v3310_v61  ;;  %v3304_v56 = vpop.f32.mrb[14].mxu1  ;;  %v8700_v61 = vld [vmem:[#allocation30_spill] sm:$0xff] }
 0xdcf   : > { %v3309_v7 = vmul.f32 0.25, %v3304_v56  ;;  %v6120_v21 = vpop.f32.mrb[15].mxu1 }
 0xdd0   : > { %v8701_v21 = vld [vmem:[#allocation31_spill] sm:$0xff] }
 0xdd1   : > { %v3313_v48 = vsel %vm678_vm2, %v3309_v7, -inf }
 0xdd2   : > { %3314 = vmax.xlane.f32.xlu1 %v3313_v48 }
 0xde3   : > { %3409 = vrot.lane.b32.xlu1 %v3136_v42, %s6530_s21  ;;  %v8697_v42 = vld [vmem:[#allocation23_spill] sm:$0xff] }
 0xe5b   : > { %v3312_v39 = vpop.xlane.xlu0 %3311 }
 0xe5c   : > { %v3316_v37 = vsub.f32 %v3308_v41, %v3312_v39 }
 0xe5e   : > { %v3318_v5 = vmul.f32 1.442695, %v3316_v37 }
 0xe5f   : > { %v3315_v53 = vpop.xlane.xlu1 %3314 }
 0xe60   : > { %6399 = vpow2.f32 %v3318_v5  ;;  %v3317_v49 = vsub.f32 %v3309_v7, %v3315_v53 }
 0xe62   : > { %v3320_v55 = vmul.f32 1.442695, %v3317_v49 }
 0xe63   : > { %v3410_v9 = vpop.permute.xlu1 %3409 }
 0xe64   : > { %6401 = vpow2.f32 %v3320_v55 }
 0xe6a   : > { %v6400_v18 = vpop.eup %6399 }
 0xe6b   : > { %v3322_v14 = vsel %vm678_vm2, %v6400_v18, 0.0 }
 0xe6c   : > { %3323 = vadd.xlane.f32.xlu0 %v3322_v14 }
 0xe6e   : > { %v6402_v13 = vpop.eup %6401 }
 0xe6f   : > { %v3325_v32 = vsel %vm678_vm2, %v6402_v13, 0.0 }
 0xe70   : > { %3326 = vadd.xlane.f32.xlu0 %v3325_v32 }
 0xe86   : > { %3332 = vrot.lane.b32.xlu0 %v3132_v38, %s6530_s21  ;;  %v8694_v38 = vld [vmem:[#allocation20_spill] sm:$0xff] }
 0xef9   : > { %v3324_v43 = vpop.xlane.xlu0 %3323 }
 0xefa   : > { %6403 = vrcp.f32 %v3324_v43 }
 0xefd   : > { %v3327_v36 = vpop.xlane.xlu0 %3326 }
 0xefe   : > { %6405 = vrcp.f32 %v3327_v36 }
 0xf01   : > { %v3333_v31 = vpop.permute.xlu0 %3332 }
 0xf02   : > { %6122 = vmatpush3.msk.msra.mxu1 %vm707_vm3, %v3333_v31 }
 0xf03   : > { %6126 = vmatprep.subr.mxu1 %v8678_v44 }
 0xf04   : > { %v6404_v27 = vpop.eup %6403 }
 0xf05   : > { %v3330_v50 = vmul.f32 %v6404_v27, %v6400_v18 }
 0xf07   : > { %6124 = vmatmul.mubr.msk.f32.vlgmr.msra.gmra.mrb[16].mxu1 %vm703_vm4, %v3330_v50 }
 0xf08   : > { %v6406_v10 = vpop.eup %6405  ;;  %6127 = vmatpush3.msk.msra.mxu1 %vm707_vm3, %v3410_v9  ;;  %6128 = vmatprep.mubr.msk.f32.mxu1 %vm6528_vm0, %v8678_v44 }
 0xf09   : > { %v3331_v19 = vmul.f32 %v6406_v10, %v6402_v13  ;;  %6267 = vmatprep.subr.bf16.mxu1 %v8681_v58 }
 0xf0b   : > { %6129 = vmatmul.mubr.msk.f32.vlgmr.msra.gmra.mrb[18].mxu1 %vm703_vm4, %v3331_v19 }
 0xf0c   : > { %6269 = vmatpush3.bf16.msra.mxu1 %v8682_v47  ;;  %6135 = vmatprep.mubr.msk.f32.mxu1 %vm6528_vm0, %v8678_v44 }
 0xf0d   : > { %6271 = vmatprep.subr.bf16.mxu1 %v8683_v23 }
 0xfda   : > { %v3405_v60 = vpop.f32.mrb[16].mxu1 }
 0xfdb   : > { %v6125_v62 = vpop.f32.mrb[17].mxu1 }
 0xfde   : > { %v3482_v63 = vpop.f32.mrb[18].mxu1 }
 0xfdf   : > { %v3488_v11 = vrot.slane %v3482_v63, 7  ;;  %6407 = vtanh.f32 %v3482_v63  ;;  %v6130_v26 = vpop.f32.mrb[19].mxu1 }
 0xfe0   : > { %6409 = vtanh.f32 %v3405_v60 }
 0xfe1   : > { %v7741_v12 = vsel %vm866_vm5, %v3488_v11, %v3405_v60 }
 0xfe2   : > { %6136 = vmatmul.mubr.msk.f32.vlgmr.msra.gmra.mrb[20].mxu1 %vm527_vm1, %v7741_v12 }
 0xfe3   : > { %6273 = vmatpush3.bf16.msra.mxu1 %v8684_v28 }
 0xfe4   : > { %6275 = vmatprep.subr.bf16.mxu1 %v8685_v6 }
 0xfe7   : > { %6277 = vmatpush3.bf16.msra.mxu1 %v8686_v0 }
 0xfe8   : > { %6279 = vmatprep.subr.bf16.mxu1 %v8687_v46 }
 0xfe9   : > { %v6408_v24 = vpop.eup %6407 }
 0xfea   : > { %v3577_v17 = vrot.slane %v6408_v24, 7  ;;  %v6410_v16 = vpop.eup %6409 }
 0xfeb   : > { %6281 = vmatpush3.bf16.msra.mxu1 %v8688_v25 }
 0xfec   : > { %v3578_v45 = vsel %vm866_vm5, %v3577_v17, %v6410_v16  ;;  %6283 = vmatprep.subr.bf16.mxu1 %v8689_v54 }
 0xfed   : > { %v3580_v51 = vmul.f32 %v5837_v34, %v3578_v45 }
 0xfef   : > { %v3584_v35 = vrot.slane %v3580_v51, %v6888_v3  ;;  %6285 = vmatpush3.bf16.msra.mxu1 %v8690_v57  ;;  %v3595_v1 = vrot.slane %v3580_v51, %v8692_v30 }
 0xff0   : > { %6287 = vmatprep.subr.bf16.mxu1 %v8691_v22 }
 0xff1   : > { %3590 = vbcast.lane.b32.xlu1 %v3584_v35, 264  ;;  %3586 = vbcast.lane.b32.xlu0 %v3584_v35, 256 }
 0xff3   : > { %6289 = vmatpush3.bf16.msra.mxu1 %v8693_v15  ;;  %v7839_v15 = vld [vmem:[%s8553_s7] ss:$0 sm:$0xff] }
 0xff4   : > { %6291 = vmatprep.subr.bf16.mxu1 %v8694_v38  ;;  %8702 = vst [vmem:[#allocation33_spill] sm:$0xff] %v7839_v15 }
 0xff5   : > { %3601 = vbcast.lane.b32.xlu1 %v3595_v1, 264  ;;  %3597 = vbcast.lane.b32.xlu0 %v3595_v1, 256 }
 0xff7   : > { %6293 = vmatpush3.bf16.msra.mxu1 %v8695_v33 }
 0xff8   : > { %6295 = vmatprep.subr.bf16.mxu1 %v8696_v52 }
 0xffb   : > { %6297 = vmatpush3.bf16.msra.mxu1 %v8697_v42 }
 0xffc   : > { %6299 = vmatprep.subr.bf16.mxu1 %v8698_v20 }
 0xfff   : > { %6301 = vmatpush3.bf16.msra.mxu1 %v8699_v8 }
0x1063   : > { %v3591_v41 = vpop.permute.xlu1 %3590  ;;  %v3587_v4 = vpop.permute.xlu0 %3586 }
0x1064   : > { %v3610_v56 = vrot.slane %v3587_v4, %v8700_v61  ;;  %v3659_v7 = vrot.slane %v3591_v41, %v8700_v61  ;;  %v3603_v36 = vcombine.high %v3587_v4, %v8678_v44  ;;  %v3652_v10 = vcombine.high %v3591_v41, %v8678_v44  ;;  %v5835_v41 = vld [vmem:[%s6650_s27 + $0x4] sm:$0x3] }
0x1066   : > { %v7767_v48 = vrot.slane %v3610_v56, %v8701_v21  ;;  %v7770_v5 = vrot.slane %v3659_v7, %v8701_v21  ;;  %v3618_v14 = vcombine.high %v3610_v56, %v8678_v44  ;;  %v3667_v31 = vcombine.high %v3659_v7, %v8678_v44 }
0x1067   : > { %v3602_v39 = vpop.permute.xlu1 %3601  ;;  %v3598_v37 = vpop.permute.xlu0 %3597  ;;  %v3617_v19 = vrot.slane %v3603_v36, %v8700_v61  ;;  %v3666_v11 = vrot.slane %v3652_v10, %v8700_v61 }
0x1068   : > { %v3757_v53 = vrot.slane %v3602_v39, %v8700_v61  ;;  %v3708_v49 = vrot.slane %v3598_v37, %v8700_v61  ;;  %v3648_v55 = vcombine.high %v7767_v48, %v8678_v44  ;;  %v3697_v32 = vcombine.high %v7770_v5, %v8678_v44 }
0x1069   : > { %v3632_v50 = vrot.slane %v3618_v14, %v8701_v21  ;;  %v3701_v60 = vcombine.high %v3598_v37, %v8678_v44  ;;  %v3681_v62 = vrot.slane %v3667_v31, %v8701_v21  ;;  %v3750_v26 = vcombine.high %v3602_v39, %v8678_v44 }
0x106a   : > { %v7777_v18 = vrot.slane %v3708_v49, %v8701_v21  ;;  %3801 = vrot.lane.b32.xlu0 %v3648_v55, %s6534_s29  ;;  %v7782_v13 = vrot.slane %v3757_v53, %v8701_v21  ;;  %v3716_v27 = vcombine.high %v3708_v49, %v8678_v44  ;;  %v3765_v23 = vcombine.high %v3757_v53, %v8678_v44 }
0x106b   : > { %v3715_v28 = vrot.slane %v3701_v60, %v8700_v61  ;;  %v3640_v6 = vrot.slane %v3617_v19, %v8701_v21  ;;  %v3764_v46 = vrot.slane %v3750_v26, %v8700_v61  ;;  %v3689_v24 = vrot.slane %v3666_v11, %v8701_v21 }
0x106c   : > { %v3746_v43 = vcombine.high %v7777_v18, %v8678_v44  ;;  %v3795_v9 = vcombine.high %v7782_v13, %v8678_v44  ;;  %v3730_v63 = vrot.slane %v3716_v27, %v8701_v21  ;;  %v3779_v0 = vrot.slane %v3765_v23, %v8701_v21 }
0x106d   : > { %v3738_v17 = vrot.slane %v3715_v28, %v8701_v21  ;;  %v3649_v34 = vcombine.high %v3632_v50, %v8678_v44  ;;  %v3787_v16 = vrot.slane %v3764_v46, %v8701_v21  ;;  %v3698_v25 = vcombine.high %v3681_v62, %v8678_v44 }
0x106e   : > { %3857 = vrot.lane.b32.xlu0 %v3697_v32, %s6534_s29  ;;  %3803 = vrot.lane.b32.xlu1 %v3746_v43, %s6534_s29  ;;  %v3747_v45 = vcombine.high %v3730_v63, %v8678_v44  ;;  %v3650_v54 = vcombine.high %v3640_v6, %v8678_v44  ;;  %v3796_v51 = vcombine.high %v3779_v0, %v8678_v44 }
0x106f   : > { %v3699_v35 = vcombine.high %v3689_v24, %v8678_v44  ;;  %v3748_v57 = vcombine.high %v3738_v17, %v8678_v44  ;;  %v3797_v22 = vcombine.high %v3787_v16, %v8678_v44  ;;  %v3633_v4 = vcombine.high %v3617_v19, %v8678_v44 }
0x1070   : > { %v3682_v53 = vcombine.high %v3666_v11, %v8678_v44  ;;  %v3731_v55 = vcombine.high %v3715_v28, %v8678_v44 }
0x1071   : > { %v3647_v49 = vrot.slane %v3633_v4, %v8701_v21 }
0x1072   : > { %3809 = vrot.lane.b32.xlu0 %v3632_v50, %s6535_s23  ;;  %3859 = vrot.lane.b32.xlu1 %v3795_v9, %s6534_s29  ;;  %v7854_v14 = vrot.slane %v3682_v53, %v8701_v21  ;;  %v3745_v43 = vrot.slane %v3731_v55, %v8701_v21 }
0x1073   : > { %v3651_v32 = vcombine.high %v3647_v49, %v8678_v44 }
0x1074   : > { %v3749_v31 = vcombine.high %v3745_v43, %v8678_v44 }
0x1076   : > { %3865 = vrot.lane.b32.xlu0 %v3681_v62, %s6535_s23  ;;  %3811 = vrot.lane.b32.xlu1 %v3730_v63, %s6535_s23 }
0x107a   : > { %3825 = vrot.lane.b32.xlu0 %v3640_v6, %s6536_s24  ;;  %3867 = vrot.lane.b32.xlu1 %v3779_v0, %s6535_s23 }
0x107e   : > { %3881 = vrot.lane.b32.xlu0 %v3689_v24, %s6536_s24  ;;  %3827 = vrot.lane.b32.xlu1 %v3738_v17, %s6536_s24 }
0x1082   : > { %3817 = vrot.lane.b32.xlu0 %v3649_v34, %s6537_s16  ;;  %3883 = vrot.lane.b32.xlu1 %v3787_v16, %s6536_s24 }
0x1086   : > { %3873 = vrot.lane.b32.xlu0 %v3698_v25, %s6537_s16  ;;  %3819 = vrot.lane.b32.xlu1 %v3747_v45, %s6537_s16 }
0x108a   : > { %3833 = vrot.lane.b32.xlu0 %v3650_v54, %s6538_s17  ;;  %3875 = vrot.lane.b32.xlu1 %v3796_v51, %s6537_s16 }
0x108e   : > { %3889 = vrot.lane.b32.xlu0 %v3699_v35, %s6538_s17  ;;  %3835 = vrot.lane.b32.xlu1 %v3748_v57, %s6538_s17 }
0x1092   : > { %3891 = vrot.lane.b32.xlu1 %v3797_v22, %s6538_s17 }
0x10b5   : > { %v3558_v1 = vpop.f32.mrb[20].mxu1 }
0x10b6   : > { %v3559_v38 = vadd.f32 %v7839_v15, %v3558_v1  ;;  %v6137_v33 = vpop.f32.mrb[21].mxu1 }
0x10b8   : > { %v5848_v52 = vmul.f32 -1.442695, %v3559_v38 }
0x10ba   : > { %6411 = vpow2.f32 %v5848_v52 }
0x10c4   : > { %v6412_v42 = vpop.eup %6411 }
0x10c5   : > { %v3565_v20 = vadd.f32 1.0, %v6412_v42 }
0x10c7   : > { %6413 = vrcp.f32 %v3565_v20 }
0x10d1   : > { %v6414_v8 = vpop.eup %6413 }
0x10d2   : > { %v3978_v56 = vrot.slane %v6414_v8, %v8692_v30  ;;  %v3966_v7 = vrot.slane %v6414_v8, %v6888_v3  ;;  %v3569_v39 = vmul.f32 %v6414_v8, %v7741_v12  ;;  %v3780_v12 = vcombine.high %v3764_v46, %v8678_v44 }
0x10d4   : > { %3981 = vbcast.lane.b32.xlu0 %v3978_v56, 272  ;;  %3969 = vbcast.lane.b32.xlu1 %v3966_v7, 272  ;;  %v3570_v37 = vadd.f32 %v5835_v41, %v3569_v39  ;;  %v7864_v36 = vrot.slane %v3780_v12, %v8701_v21 }
0x10d6   : > { %5849 = vst.msk [vmem:[%s6662_s11 + $0x4] sm:$0x3] %vm949_vm6, %v3570_v37 }
0x10d8   : > { %3841 = vrot.lane.b32.xlu0 %v3647_v49, %s6539_s26  ;;  %3973 = vbcast.lane.b32.xlu1 %v3966_v7, 280 }
0x10dc   : > { %3897 = vrot.lane.b32.xlu0 %v7854_v14, %s6539_s26  ;;  %3985 = vbcast.lane.b32.xlu1 %v3978_v56, 280  ;;  %v7870_v27 = vpop.permute.xlu0 %3801 }
0x10dd   : > { %v3911_v30 = vsel %vm527_vm1, %v7767_v48, %v7870_v27 }
0x10e0   : > { %3849 = vrot.lane.b32.xlu0 %v3651_v32, %s6530_s21  ;;  %3843 = vrot.lane.b32.xlu1 %v3745_v43, %s6539_s26  ;;  %v7872_v50 = vpop.permute.xlu1 %3803  ;;  %v7874_v9 = vpop.permute.xlu0 %3857 }
0x10e1   : > { %v3912_v58 = vsel %vm527_vm1, %v7777_v18, %v7872_v50 }
0x10e4   : > { %3899 = vrot.lane.b32.xlu1 %v7864_v36, %s6539_s26  ;;  %v7876_v10 = vpop.permute.xlu1 %3859  ;;  %v7878_v19 = vpop.permute.xlu0 %3809 }
0x10e5   : > { %v3926_v59 = vsel %vm527_vm1, %v7782_v13, %v7876_v10  ;;  %v3913_v29 = vsel %vm1291_vm7, %v3911_v30, %v7878_v19 }
0x10e8   : > { %3851 = vrot.lane.b32.xlu1 %v3749_v31, %s6530_s21  ;;  %v7880_v23 = vpop.permute.xlu1 %3811  ;;  %v7882_v60 = vpop.permute.xlu0 %3865 }
0x10e9   : > { %v3914_v48 = vsel %vm1291_vm7, %v3912_v58, %v7880_v23 }
0x10ec   : > { %v7884_v62 = vpop.permute.xlu1 %3867  ;;  %v7886_v63 = vpop.permute.xlu0 %3825 }
0x10ed   : > { %v3928_v23 = vsel %vm1291_vm7, %v3926_v59, %v7884_v62 }
0x10f0   : > { %v7888_v11 = vpop.permute.xlu1 %3827  ;;  %v7890_v26 = vpop.permute.xlu0 %3881 }
0x10f4   : > { %v7892_v28 = vpop.permute.xlu1 %3883  ;;  %v7894_v6 = vpop.permute.xlu0 %3817 }
0x10f5   : > { %v3915_v18 = vsel %vm1294_vm8, %v3913_v29, %v7894_v6 }
0x10f8   : > { %v7896_v0 = vpop.permute.xlu1 %3819  ;;  %v7898_v46 = vpop.permute.xlu0 %3873 }
0x10f9   : > { %v3916_v50 = vsel %vm1294_vm8, %v3914_v48, %v7896_v0 }
0x10fc   : > { %v7900_v24 = vpop.permute.xlu1 %3875  ;;  %v7902_v17 = vpop.permute.xlu0 %3833 }
0x1100   : > { %v7904_v34 = vpop.permute.xlu1 %3835  ;;  %v7906_v16 = vpop.permute.xlu0 %3889 }
0x1104   : > { %v7908_v25 = vpop.permute.xlu1 %3891 }
0x1146   : > { %v3982_v45 = vpop.permute.xlu0 %3981  ;;  %v3970_v54 = vpop.permute.xlu1 %3969 }
0x1147   : > { %v4092_v51 = vrot.slane %v3982_v45, %v8700_v61  ;;  %v3994_v35 = vrot.slane %v3970_v54, %v8700_v61  ;;  %v3987_v37 = vcombine.high %v3970_v54, %v8678_v44  ;;  %v4085_v55 = vcombine.high %v3982_v45, %v8678_v44 }
0x1149   : > { %v7913_v57 = vrot.slane %v4092_v51, %v8701_v21  ;;  %v7916_v22 = vrot.slane %v3994_v35, %v8701_v21  ;;  %v4002_v41 = vcombine.high %v3994_v35, %v8678_v44  ;;  %v4100_v7 = vcombine.high %v4092_v51, %v8678_v44 }
0x114a   : > { %v3974_v1 = vpop.permute.xlu1 %3973  ;;  %v4001_v43 = vrot.slane %v3987_v37, %v8700_v61  ;;  %v4099_v51 = vrot.slane %v4085_v55, %v8700_v61 }
0x114b   : > { %v4043_v38 = vrot.slane %v3974_v1, %v8700_v61  ;;  %v4130_v33 = vcombine.high %v7913_v57, %v8678_v44  ;;  %v4032_v52 = vcombine.high %v7916_v22, %v8678_v44  ;;  %v4016_v49 = vrot.slane %v4002_v41, %v8701_v21 }
0x114c   : > { %v4114_v32 = vrot.slane %v4100_v7, %v8701_v21  ;;  %v4036_v31 = vcombine.high %v3974_v1, %v8678_v44 }
0x114d   : > { %v7924_v42 = vrot.slane %v4043_v38, %v8701_v21  ;;  %4187 = vrot.lane.b32.xlu1 %v4130_v33, %s6534_s29  ;;  %4185 = vrot.lane.b32.xlu0 %v4032_v52, %s6534_s29  ;;  %v4051_v53 = vcombine.high %v4043_v38, %v8678_v44  ;;  %v4024_v33 = vrot.slane %v4001_v43, %v8701_v21 }
0x114e   : > { %v3986_v20 = vpop.permute.xlu1 %3985  ;;  %v4050_v38 = vrot.slane %v4036_v31, %v8700_v61  ;;  %v4122_v52 = vrot.slane %v4099_v51, %v8701_v21  ;;  %v4033_v41 = vcombine.high %v4016_v49, %v8678_v44 }
0x114f   : > { %v4141_v8 = vrot.slane %v3986_v20, %v8700_v61  ;;  %v4081_v4 = vcombine.high %v7924_v42, %v8678_v44  ;;  %v4065_v54 = vrot.slane %v4051_v53, %v8701_v21  ;;  %v4134_v35 = vcombine.high %v3986_v20, %v8678_v44 }
0x1150   : > { %v4034_v37 = vcombine.high %v4024_v33, %v8678_v44  ;;  %v4132_v53 = vcombine.high %v4122_v52, %v8678_v44  ;;  %v4066_v31 = vcombine.high %v4050_v38, %v8678_v44 }
0x1151   : > { %v7933_v56 = vrot.slane %v4141_v8, %v8701_v21  ;;  %4241 = vrot.lane.b32.xlu0 %v4081_v4, %s6534_s29  ;;  %v4149_v12 = vcombine.high %v4141_v8, %v8678_v44  ;;  %v4148_v1 = vrot.slane %v4134_v35, %v8700_v61  ;;  %v4073_v8 = vrot.slane %v4050_v38, %v8701_v21 }
0x1152   : > { %v4131_v4 = vcombine.high %v4114_v32, %v8678_v44  ;;  %v4082_v7 = vcombine.high %v4065_v54, %v8678_v44 }
0x1153   : > { %v4179_v39 = vcombine.high %v7933_v56, %v8678_v44  ;;  %v4163_v45 = vrot.slane %v4149_v12, %v8701_v21  ;;  %v4171_v20 = vrot.slane %v4148_v1, %v8701_v21  ;;  %v4083_v55 = vcombine.high %v4073_v8, %v8678_v44 }
0x1154   : > { %v4115_v12 = vcombine.high %v4099_v51, %v8678_v44 }
0x1155   : > { %4243 = vrot.lane.b32.xlu1 %v4179_v39, %s6534_s29  ;;  %4193 = vrot.lane.b32.xlu0 %v4016_v49, %s6535_s23  ;;  %v4180_v39 = vcombine.high %v4163_v45, %v8678_v44  ;;  %v4017_v49 = vcombine.high %v4001_v43, %v8678_v44  ;;  %v4164_v43 = vcombine.high %v4148_v1, %v8678_v44 }
0x1156   : > { %v4129_v35 = vrot.slane %v4115_v12, %v8701_v21 }
0x1157   : > { %v4178_v51 = vrot.slane %v4164_v43, %v8701_v21 }
0x1159   : > { %4195 = vrot.lane.b32.xlu1 %v4114_v32, %s6535_s23  ;;  %4249 = vrot.lane.b32.xlu0 %v4065_v54, %s6535_s23  ;;  %v4181_v32 = vcombine.high %v4171_v20, %v8678_v44  ;;  %v4031_v54 = vrot.slane %v4017_v49, %v8701_v21 }
0x115b   : > { %v4035_v38 = vcombine.high %v4031_v54, %v8678_v44 }
0x115d   : > { %4251 = vrot.lane.b32.xlu1 %v4163_v45, %s6535_s23  ;;  %4209 = vrot.lane.b32.xlu0 %v4024_v33, %s6536_s24  ;;  %v4080_v45 = vrot.slane %v4066_v31, %v8701_v21  ;;  %v4133_v33 = vcombine.high %v4129_v35, %v8678_v44 }
0x115f   : > { %v4084_v1 = vcombine.high %v4080_v45, %v8678_v44 }
0x1161   : > { %4211 = vrot.lane.b32.xlu1 %v4122_v52, %s6536_s24  ;;  %4265 = vrot.lane.b32.xlu0 %v4073_v8, %s6536_s24  ;;  %v4182_v52 = vcombine.high %v4178_v51, %v8678_v44  ;;  %v3700_v8 = vcombine.high %v7854_v14, %v8678_v44 }
0x1165   : > { %4267 = vrot.lane.b32.xlu1 %v4171_v20, %s6536_s24  ;;  %4201 = vrot.lane.b32.xlu0 %v4033_v41, %s6537_s16  ;;  %v3798_v20 = vcombine.high %v7864_v36, %v8678_v44  ;;  %v8008_v41 = vpop.permute.xlu0 %3841  ;;  %v3925_v44 = vsel %vm527_vm1, %v7770_v5, %v7874_v9 }
0x1166   : > { %v3927_v27 = vsel %vm1291_vm7, %v3925_v44, %v7882_v60 }
0x1167   : > { %v3929_v44 = vsel %vm1294_vm8, %v3927_v27, %v7898_v46  ;;  %v3930_v46 = vsel %vm1294_vm8, %v3928_v23, %v7900_v24 }
0x1168   : > { %v3931_v59 = vsel %vm1297_vm9, %v3929_v44, %v7890_v26 }
0x1169   : > { %4203 = vrot.lane.b32.xlu1 %v4131_v4, %s6537_s16  ;;  %4257 = vrot.lane.b32.xlu0 %v4082_v7, %s6537_s16  ;;  %v8010_v4 = vpop.permute.xlu1 %3843  ;;  %v8012_v7 = vpop.permute.xlu0 %3897 }
0x116d   : > { %4259 = vrot.lane.b32.xlu1 %v4180_v39, %s6537_s16  ;;  %4217 = vrot.lane.b32.xlu0 %v4034_v37, %s6538_s17  ;;  %v8014_v39 = vpop.permute.xlu1 %3899  ;;  %v8016_v37 = vpop.permute.xlu0 %3849 }
0x1171   : > { %4219 = vrot.lane.b32.xlu1 %v4132_v53, %s6538_s17  ;;  %4273 = vrot.lane.b32.xlu0 %v4083_v55, %s6538_s17  ;;  %v8018_v14 = vpop.permute.xlu1 %3851 }
0x1175   : > { %4275 = vrot.lane.b32.xlu1 %v4181_v32, %s6538_s17  ;;  %4225 = vrot.lane.b32.xlu0 %v4031_v54, %s6539_s26 }
0x1179   : > { %4227 = vrot.lane.b32.xlu1 %v4129_v35, %s6539_s26  ;;  %4281 = vrot.lane.b32.xlu0 %v4080_v45, %s6539_s26 }
0x117d   : > { %4283 = vrot.lane.b32.xlu1 %v4178_v51, %s6539_s26  ;;  %4233 = vrot.lane.b32.xlu0 %v4035_v38, %s6530_s21 }
0x1181   : > { %4235 = vrot.lane.b32.xlu1 %v4133_v33, %s6530_s21  ;;  %4289 = vrot.lane.b32.xlu0 %v4084_v1, %s6530_s21 }
0x1185   : > { %4291 = vrot.lane.b32.xlu1 %v4182_v52, %s6530_s21  ;;  %3905 = vrot.lane.b32.xlu0 %v3700_v8, %s6530_s21 }
0x1189   : > { %3907 = vrot.lane.b32.xlu1 %v3798_v20, %s6530_s21 }
0x11bf   : > { %v4186_v53 = vpop.permute.xlu0 %4185  ;;  %v4188_v49 = vpop.permute.xlu1 %4187 }
0x11c0   : > { %v4295_v13 = vsel %vm527_vm1, %v7916_v22, %v4186_v53  ;;  %v4296_v30 = vsel %vm527_vm1, %v7913_v57, %v4188_v49  ;;  %v3917_v22 = vsel %vm1297_vm9, %v3915_v18, %v7886_v63  ;;  %v3918_v53 = vsel %vm1297_vm9, %v3916_v50, %v7888_v11 }
0x11c1   : > { %v3919_v49 = vsel %vm1300_vm10, %v3917_v22, %v7902_v17  ;;  %v3932_v11 = vsel %vm1297_vm9, %v3930_v46, %v7892_v28  ;;  %v5853_v46 = vld.sshfl [vmem:[%s6655_s14 + $0x6] sm:$0x11 pattern:$0x75316420] }
0x11c3   : > { %v4242_v55 = vpop.permute.xlu0 %4241 }
0x11c4   : > { %v4309_v5 = vsel %vm527_vm1, %v7924_v42, %v4242_v55 }
0x11c7   : > { %v4244_v12 = vpop.permute.xlu1 %4243  ;;  %v4194_v32 = vpop.permute.xlu0 %4193 }
0x11c8   : > { %v4297_v9 = vsel %vm1291_vm7, %v4295_v13, %v4194_v32  ;;  %v4310_v60 = vsel %vm527_vm1, %v7933_v56, %v4244_v12 }
0x11cb   : > { %v4196_v36 = vpop.permute.xlu1 %4195  ;;  %v4250_v31 = vpop.permute.xlu0 %4249 }
0x11cc   : > { %v4311_v58 = vsel %vm1291_vm7, %v4309_v5, %v4250_v31  ;;  %v4298_v29 = vsel %vm1291_vm7, %v4296_v30, %v4196_v36 }
0x11cf   : > { %v4252_v54 = vpop.permute.xlu1 %4251  ;;  %v4210_v43 = vpop.permute.xlu0 %4209 }
0x11d0   : > { %v4312_v42 = vsel %vm1291_vm7, %v4310_v60, %v4252_v54 }
0x11d3   : > { %v4212_v35 = vpop.permute.xlu1 %4211  ;;  %v4266_v45 = vpop.permute.xlu0 %4265 }
0x11d7   : > { %v4268_v51 = vpop.permute.xlu1 %4267  ;;  %v4202_v38 = vpop.permute.xlu0 %4201 }
0x11d8   : > { %v4299_v6 = vsel %vm1294_vm8, %v4297_v9, %v4202_v38  ;;  %v8703_v9 = vld [vmem:[#allocation26_spill] sm:$0xff] }
0x11d9   : > { %v4301_v24 = vsel %vm1297_vm9, %v4299_v6, %v4210_v43 }
0x11db   : > { %v4204_v33 = vpop.permute.xlu1 %4203  ;;  %v4258_v1 = vpop.permute.xlu0 %4257 }
0x11dc   : > { %v4313_v10 = vsel %vm1294_vm8, %v4311_v58, %v4258_v1  ;;  %v4300_v0 = vsel %vm1294_vm8, %v4298_v29, %v4204_v33 }
0x11dd   : > { %v4315_v56 = vsel %vm1297_vm9, %v4313_v10, %v4266_v45  ;;  %v4302_v63 = vsel %vm1297_vm9, %v4300_v0, %v4212_v35  ;;  %v3920_v35 = vsel %vm1300_vm10, %v3918_v53, %v7904_v34 }
0x11de   : > { %v3922_v1 = vsel %vm1303_vm11, %v3920_v35, %v8010_v4 }
0x11df   : > { %v4260_v52 = vpop.permute.xlu1 %4259  ;;  %v4218_v8 = vpop.permute.xlu0 %4217 }
0x11e0   : > { %v4314_v62 = vsel %vm1294_vm8, %v4312_v42, %v4260_v52  ;;  %v4303_v32 = vsel %vm1300_vm10, %v4301_v24, %v4218_v8  ;;  %v8705_v42 = vld [vmem:[#allocation27_spill] sm:$0xff] }
0x11e1   : > { %v4316_v17 = vsel %vm1297_vm9, %v4314_v62, %v4268_v51  ;;  %v4460_v53 = vrot.slane %v5853_v46, %v8705_v42  ;;  %v8706_v62 = vmov 0.0  }
0x11e3   : > { %v4220_v20 = vpop.permute.xlu1 %4219  ;;  %v4274_v15 = vpop.permute.xlu0 %4273 }
0x11e4   : > { %v4317_v55 = vsel %vm1300_vm10, %v4315_v56, %v4274_v15  ;;  %v4304_v26 = vsel %vm1300_vm10, %v4302_v63, %v4220_v20 }
0x11e7   : > { %v4276_v21 = vpop.permute.xlu1 %4275  ;;  %v4226_v61 = vpop.permute.xlu0 %4225 }
0x11e8   : > { %v4305_v54 = vsel %vm1303_vm11, %v4303_v32, %v4226_v61  ;;  %v4318_v28 = vsel %vm1300_vm10, %v4316_v17, %v4276_v21  ;;  %v3921_v61 = vsel %vm1303_vm11, %v3919_v49, %v8008_v41 }
0x11e9   : > { %v3923_v21 = vsel %vm1306_vm12, %v3921_v61, %v8016_v37  ;;  %v3924_v37 = vsel %vm1306_vm12, %v3922_v1, %v8018_v14 }
0x11ea   : > { %v3942_v4 = vrot.slane %v3923_v21, %v6888_v3  ;;  %v3950_v58 = vrot.slane %v3924_v37, %v6888_v3 }
0x11eb   : > { %v4228_v47 = vpop.permute.xlu1 %4227  ;;  %v4282_v40 = vpop.permute.xlu0 %4281 }
0x11ec   : > { %v4319_v36 = vsel %vm1303_vm11, %v4317_v55, %v4282_v40  ;;  %v4306_v43 = vsel %vm1303_vm11, %v4304_v26, %v4228_v47  ;;  %v3933_v40 = vsel %vm1300_vm10, %v3931_v59, %v7906_v16  ;;  %v4453_v59 = vcombine.high %v5853_v46, %v5853_v46 }
0x11ed   : > { %v3935_v34 = vsel %vm1303_vm11, %v3933_v40, %v8012_v7  ;;  %v3934_v7 = vsel %vm1300_vm10, %v3932_v11, %v7908_v25 }
0x11ee   : > { %v3936_v18 = vsel %vm1303_vm11, %v3934_v7, %v8014_v39  ;;  %v4467_v49 = vrot.slane %v4453_v59, %v8705_v42 }
0x11ef   : > { %v4284_v19 = vpop.permute.xlu1 %4283  ;;  %v4234_v57 = vpop.permute.xlu0 %4233 }
0x11f0   : > { %v4307_v45 = vsel %vm1306_vm12, %v4305_v54, %v4234_v57  ;;  %v4320_v51 = vsel %vm1303_vm11, %v4318_v28, %v4284_v19 }
0x11f1   : > { %v4326_v8 = vrot.slane %v4307_v45, %v6888_v3 }
0x11f3   : > { %v4236_v12 = vpop.permute.xlu1 %4235  ;;  %v4290_v31 = vpop.permute.xlu0 %4289 }
0x11f4   : > { %v4321_v15 = vsel %vm1306_vm12, %v4319_v36, %v4290_v31  ;;  %v4308_v38 = vsel %vm1306_vm12, %v4306_v43, %v4236_v12 }
0x11f5   : > { %v4330_v47 = vrot.slane %v4321_v15, %v6888_v3  ;;  %v4334_v41 = vrot.slane %v4308_v38, %v6888_v3 }
0x11f7   : > { %v4292_v33 = vpop.permute.xlu1 %4291  ;;  %v3906_v52 = vpop.permute.xlu0 %3905  ;;  %v4343_v5 = vcombine.low %v4326_v8, %v4330_v47  ;;  %v8708_v8 = vld [vmem:[#allocation28_spill] sm:$0xff] }
0x11f8   : > { %v4322_v16 = vsel %vm1306_vm12, %v4320_v51, %v4292_v33  ;;  %v3937_v20 = vsel %vm1306_vm12, %v3935_v34, %v3906_v52 }
0x11f9   : > { %v4338_v48 = vrot.slane %v4322_v16, %v6888_v3  ;;  %v3946_v27 = vrot.slane %v3937_v20, %v6888_v3  ;;  %v4353_v14 = vmul.f32 %v4343_v5, %v7693_v2  ;;  %v8704_v2 = vld [vmem:[#allocation32_spill] sm:$0xff]  ;;  %v8707_v16 = vmov 0.0|0.0   ;;  %v5852_v5 = vld [vmem:[%s6660_s18 + $0x6] sm:$0x3]  ;;  %s5872_s18 = sshll.u32 %s6614_s13, 7 }
0x11fb   : > { %v4344_v50 = vcombine.low %v4334_v41, %v4338_v48  ;;  %v3908_v13 = vpop.permute.xlu1 %3907  ;;  %v3959_v44 = vcombine.low %v3942_v4, %v3946_v27 }
0x11fc   : > { %v3938_v30 = vsel %vm1306_vm12, %v3936_v18, %v3908_v13 }
0x11fd   : > { %v3954_v25 = vrot.slane %v3938_v30, %v6888_v3  ;;  %v4354_v29 = vmul.f32 %v4344_v50, %v8703_v9  ;;  %v8120_v19 = vadd.f32 %v4353_v14, %v3959_v44  ;;  %v8709_v44 = vld [vmem:[#allocation29_spill] sm:$0xff]  ;;  %v8710_v9 = vld [vmem:[#allocation30_spill] sm:$0xff] }
0x11ff   : > { %v3960_v10 = vcombine.low %v3950_v58, %v3954_v25 }
0x1201   : > { %v8122_v23 = vadd.f32 %v4354_v29, %v3960_v10  ;;  %v8711_v10 = vld [vmem:[#allocation31_spill] sm:$0xff] }
0x1203   : > { %v4359_v39 = vcombine.low %v8120_v19, %v8122_v23  ;;  %v4360_v60 = vcombine.high %v8120_v19, %v8122_v23 }
0x1205   : > { %4437 = vmatprep.mubr.f32.mxu1 %v4360_v60 }
0x1206   : > { %4438 = vmatmul.mubr.f32.vlgmr.msra.gmra.mrb[22].mxu1 %v4359_v39 }
0x12d9   : > { %v6043_v6 = vpop.f32.mrb[22].mxu1 }
0x12da   : > { %v6044_v0 = vpop.f32.mrb[23].mxu1 }
0x12db   : > { %v6045_v57 = vadd.f32 %v6044_v0, %v6043_v6 }
0x12dd   : > { %v4440_v22 = vadd.f32 %v8704_v2, %v6045_v57 }
0x12df   : > { %6139 = vmatpush3.xpose.msk.msra.mxu0 %vm527_vm1, %v4440_v22  ;;  %v4444_v56 = vcombine.high %v4440_v22, %v4440_v22 }
0x12e0   : > { %6143 = vmatprep.subr.mxu0 %v8706_v62 }
0x12e2   : > { %6141 = vmatmul.mubr.msk.f32.vlgmr.msra.gmra.mrb[14].mxu0 %vm527_vm1, %v4460_v53 }
0x12e3   : > { %6144 = vmatpush3.xpose.msk.msra.mxu0 %vm527_vm1, %v4444_v56  ;;  %6145 = vmatprep.mubr.msk.f32.mxu0 %vm6528_vm0, %v8706_v62 }
0x12e4   : > { %6148 = vmatprep.subr.mxu0 %v8706_v62 }
0x12e6   : > { %6146 = vmatmul.mubr.msk.f32.vlgmr.msra.gmra.mrb[16].mxu0 %vm527_vm1, %v4467_v49 }
0x12e7   : > { %6150 = vmatprep.mubr.msk.f32.mxu0 %vm6528_vm0, %v8706_v62 }
0x13b5   : > { %v4538_v24 = vpop.f32.mrb[14].mxu0 }
0x13b6   : > { %v4616_v55 = vmul.f32 0.25, %v4538_v24  ;;  %v6142_v63 = vpop.f32.mrb[15].mxu0 }
0x13b8   : > { %v4618_v12 = vsel %vm678_vm2, %v4616_v55, -inf }
0x13b9   : > { %4619 = vmax.xlane.f32.xlu0 %v4618_v12  ;;  %v4612_v11 = vpop.f32.mrb[16].mxu0 }
0x13ba   : > { %v4617_v32 = vmul.f32 0.25, %v4612_v11  ;;  %v6147_v26 = vpop.f32.mrb[17].mxu0 }
0x13bc   : > { %v4621_v36 = vsel %vm678_vm2, %v4617_v32, -inf }
0x13bd   : > { %4622 = vmax.xlane.f32.xlu1 %v4621_v36 }
0x13ce   : > { %4717 = vrot.lane.b32.xlu1 %v4444_v56, %s6530_s21 }
0x1446   : > { %v4620_v31 = vpop.xlane.xlu0 %4619 }
0x1447   : > { %v4624_v54 = vsub.f32 %v4616_v55, %v4620_v31 }
0x1449   : > { %v4626_v17 = vmul.f32 1.442695, %v4624_v54 }
0x144a   : > { %v4623_v43 = vpop.xlane.xlu1 %4622 }
0x144b   : > { %6415 = vpow2.f32 %v4626_v17  ;;  %v4625_v15 = vsub.f32 %v4617_v32, %v4623_v43 }
0x144d   : > { %v4628_v35 = vmul.f32 1.442695, %v4625_v15 }
0x144e   : > { %v4718_v21 = vpop.permute.xlu1 %4717 }
0x144f   : > { %6417 = vpow2.f32 %v4628_v35 }
0x1455   : > { %v6416_v28 = vpop.eup %6415 }
0x1456   : > { %v4630_v45 = vsel %vm678_vm2, %v6416_v28, 0.0 }
0x1457   : > { %4631 = vadd.xlane.f32.xlu0 %v4630_v45 }
0x1459   : > { %v6418_v38 = vpop.eup %6417 }
0x145a   : > { %v4633_v40 = vsel %vm678_vm2, %v6418_v38, 0.0 }
0x145b   : > { %4634 = vadd.xlane.f32.xlu0 %v4633_v40 }
0x1471   : > { %4640 = vrot.lane.b32.xlu0 %v4440_v22, %s6530_s21 }
0x14e4   : > { %v4632_v61 = vpop.xlane.xlu0 %4631 }
0x14e5   : > { %6419 = vrcp.f32 %v4632_v61 }
0x14e8   : > { %v4635_v51 = vpop.xlane.xlu0 %4634 }
0x14e9   : > { %6421 = vrcp.f32 %v4635_v51 }
0x14ec   : > { %v4641_v47 = vpop.permute.xlu0 %4640 }
0x14ed   : > { %6149 = vmatpush3.msk.msra.mxu0 %vm707_vm3, %v4641_v47 }
0x14ee   : > { %6153 = vmatprep.subr.mxu0 %v8706_v62 }
0x14ef   : > { %v6420_v33 = vpop.eup %6419 }
0x14f0   : > { %v4638_v34 = vmul.f32 %v6420_v33, %v6416_v28 }
0x14f2   : > { %6151 = vmatmul.mubr.msk.f32.vlgmr.msra.gmra.mrb[18].mxu0 %vm703_vm4, %v4638_v34 }
0x14f3   : > { %v6422_v1 = vpop.eup %6421  ;;  %6154 = vmatpush3.msk.msra.mxu0 %vm707_vm3, %v4718_v21  ;;  %6155 = vmatprep.mubr.msk.f32.mxu0 %vm6528_vm0, %v8706_v62 }
0x14f4   : > { %v4639_v52 = vmul.f32 %v6422_v1, %v6418_v38  ;;  %6302 = vmatprep.subr.bf16.mxu0 %v8707_v16 }
0x14f6   : > { %6156 = vmatmul.mubr.msk.f32.vlgmr.msra.gmra.mrb[20].mxu0 %vm703_vm4, %v4639_v52 }
0x14f7   : > { %6304 = vmatpush3.bf16.msra.mxu0 %v8708_v8  ;;  %6162 = vmatprep.mubr.msk.f32.mxu0 %vm6528_vm0, %v8706_v62 }
0x15c5   : > { %v4713_v41 = vpop.f32.mrb[18].mxu0 }
0x15c6   : > { %v6152_v20 = vpop.f32.mrb[19].mxu0 }
0x15c9   : > { %v4790_v48 = vpop.f32.mrb[20].mxu0 }
0x15ca   : > { %v4796_v7 = vrot.slane %v4790_v48, 7  ;;  %6423 = vtanh.f32 %v4790_v48  ;;  %v6157_v37 = vpop.f32.mrb[21].mxu0 }
0x15cb   : > { %6425 = vtanh.f32 %v4713_v41 }
0x15cc   : > { %v8160_v27 = vsel %vm866_vm5, %v4796_v7, %v4713_v41  ;;  %v8712_v41 = vld [vmem:[#allocation33_spill] sm:$0xff] }
0x15cd   : > { %6163 = vmatmul.mubr.msk.f32.vlgmr.msra.gmra.mrb[22].mxu0 %vm527_vm1, %v8160_v27 }
0x15d4   : > { %v6424_v4 = vpop.eup %6423 }
0x15d5   : > { %v4885_v18 = vrot.slane %v6424_v4, 7  ;;  %v6426_v50 = vpop.eup %6425 }
0x15d7   : > { %v4886_v13 = vsel %vm866_vm5, %v4885_v18, %v6426_v50  ;;  %v5850_v50 = vld [vmem:[%s6650_s27 + $0x6] sm:$0x3] }
0x15d8   : > { %v4888_v30 = vmul.f32 %v5852_v5, %v4886_v13 }
0x15da   : > { %v4892_v58 = vrot.slane %v4888_v30, %v6888_v3  ;;  %v4903_v25 = vrot.slane %v4888_v30, %v8709_v44 }
0x15dc   : > { %4898 = vbcast.lane.b32.xlu1 %v4892_v58, 264  ;;  %4894 = vbcast.lane.b32.xlu0 %v4892_v58, 256 }
0x15e0   : > { %4909 = vbcast.lane.b32.xlu1 %v4903_v25, 264  ;;  %4905 = vbcast.lane.b32.xlu0 %v4903_v25, 256 }
0x164e   : > { %v4895_v14 = vpop.permute.xlu0 %4894  ;;  %v8176_v46 = vpop.permute.xlu1 %4898 }
0x164f   : > { %v4918_v29 = vrot.slane %v4895_v14, %v8710_v9  ;;  %v4911_v6 = vcombine.high %v4895_v14, %v8706_v62  ;;  %v4967_v22 = vrot.slane %v8176_v46, %v8710_v9  ;;  %v4960_v18 = vcombine.high %v8176_v46, %v8706_v62 }
0x1651   : > { %v8170_v39 = vrot.slane %v4918_v29, %v8711_v10  ;;  %v4926_v0 = vcombine.high %v4918_v29, %v8706_v62  ;;  %v4925_v42 = vrot.slane %v4911_v6, %v8710_v9  ;;  %v8195_v63 = vrot.slane %v4967_v22, %v8711_v10 }
0x1652   : > { %v4906_v60 = vpop.permute.xlu0 %4905  ;;  %v8192_v55 = vpop.permute.xlu1 %4909  ;;  %v4975_v36 = vcombine.high %v4967_v22, %v8706_v62  ;;  %v4974_v13 = vrot.slane %v4960_v18, %v8710_v9 }
0x1653   : > { %v4956_v57 = vcombine.high %v8170_v39, %v8706_v62  ;;  %v5016_v2 = vrot.slane %v4906_v60, %v8710_v9  ;;  %v4940_v53 = vrot.slane %v4926_v0, %v8711_v10  ;;  %v5009_v56 = vcombine.high %v4906_v60, %v8706_v62 }
0x1654   : > { %v4948_v12 = vrot.slane %v4925_v42, %v8711_v10  ;;  %v5065_v11 = vrot.slane %v8192_v55, %v8710_v9  ;;  %v5005_v31 = vcombine.high %v8195_v63, %v8706_v62  ;;  %v4989_v43 = vrot.slane %v4975_v36, %v8711_v10 }
0x1655   : > { %5109 = vrot.lane.b32.xlu0 %v4956_v57, %s6534_s29  ;;  %v8185_v59 = vrot.slane %v5016_v2, %v8711_v10  ;;  %v5024_v49 = vcombine.high %v5016_v2, %v8706_v62  ;;  %v5023_v32 = vrot.slane %v5009_v56, %v8710_v9  ;;  %v4957_v28 = vcombine.high %v4940_v53, %v8706_v62 }
0x1656   : > { %v8209_v54 = vrot.slane %v5065_v11, %v8711_v10  ;;  %v5073_v15 = vcombine.high %v5065_v11, %v8706_v62  ;;  %v4941_v38 = vcombine.high %v4925_v42, %v8706_v62  ;;  %v4958_v40 = vcombine.high %v4948_v12, %v8706_v62 }
0x1657   : > { %v5054_v24 = vcombine.high %v8185_v59, %v8706_v62  ;;  %v5038_v26 = vrot.slane %v5024_v49, %v8711_v10  ;;  %v5046_v17 = vrot.slane %v5023_v32, %v8711_v10  ;;  %v5039_v47 = vcombine.high %v5023_v32, %v8706_v62 }
0x1658   : > { %v5103_v35 = vcombine.high %v8209_v54, %v8706_v62  ;;  %v5087_v45 = vrot.slane %v5073_v15, %v8711_v10  ;;  %v4955_v51 = vrot.slane %v4941_v38, %v8711_v10  ;;  %v5006_v34 = vcombine.high %v4989_v43, %v8706_v62 }
0x1659   : > { %5117 = vrot.lane.b32.xlu0 %v4940_v53, %s6535_s23  ;;  %5111 = vrot.lane.b32.xlu1 %v5054_v24, %s6534_s29  ;;  %v5055_v61 = vcombine.high %v5038_v26, %v8706_v62  ;;  %v5056_v33 = vcombine.high %v5046_v17, %v8706_v62  ;;  %v5053_v21 = vrot.slane %v5039_v47, %v8711_v10 }
0x165a   : > { %v4959_v1 = vcombine.high %v4955_v51, %v8706_v62  ;;  %v5104_v52 = vcombine.high %v5087_v45, %v8706_v62  ;;  %v4997_v29 = vrot.slane %v4974_v13, %v8711_v10  ;;  %v5058_v60 = vcombine.high %v8192_v55, %v8706_v62 }
0x165b   : > { %v5057_v16 = vcombine.high %v5053_v21, %v8706_v62  ;;  %v4990_v6 = vcombine.high %v4974_v13, %v8706_v62 }
0x165c   : > { %v5007_v0 = vcombine.high %v4997_v29, %v8706_v62 }
0x165d   : > { %5133 = vrot.lane.b32.xlu0 %v4948_v12, %s6536_s24  ;;  %5119 = vrot.lane.b32.xlu1 %v5038_v26, %s6535_s23  ;;  %v8264_v46 = vrot.slane %v4990_v6, %v8711_v10 }
0x1661   : > { %5165 = vrot.lane.b32.xlu0 %v5005_v31, %s6534_s29  ;;  %5135 = vrot.lane.b32.xlu1 %v5046_v17, %s6536_s24 }
0x1665   : > { %5173 = vrot.lane.b32.xlu0 %v4989_v43, %s6535_s23  ;;  %5167 = vrot.lane.b32.xlu1 %v5103_v35, %s6534_s29 }
0x1669   : > { %5125 = vrot.lane.b32.xlu0 %v4957_v28, %s6537_s16  ;;  %5175 = vrot.lane.b32.xlu1 %v5087_v45, %s6535_s23 }
0x166d   : > { %5141 = vrot.lane.b32.xlu0 %v4958_v40, %s6538_s17  ;;  %5127 = vrot.lane.b32.xlu1 %v5055_v61, %s6537_s16 }
0x1671   : > { %5149 = vrot.lane.b32.xlu0 %v4955_v51, %s6539_s26  ;;  %5143 = vrot.lane.b32.xlu1 %v5056_v33, %s6538_s17 }
0x1675   : > { %5181 = vrot.lane.b32.xlu0 %v5006_v34, %s6537_s16  ;;  %5151 = vrot.lane.b32.xlu1 %v5053_v21, %s6539_s26 }
0x1679   : > { %5157 = vrot.lane.b32.xlu0 %v4959_v1, %s6530_s21  ;;  %5183 = vrot.lane.b32.xlu1 %v5104_v52, %s6537_s16 }
0x167d   : > { %5159 = vrot.lane.b32.xlu1 %v5057_v16, %s6530_s21 }
0x16a0   : > { %v4866_v8 = vpop.f32.mrb[22].mxu0 }
0x16a1   : > { %v4867_v20 = vadd.f32 %v8712_v41, %v4866_v8  ;;  %v6164_v48 = vpop.f32.mrb[23].mxu0 }
0x16a3   : > { %v5863_v7 = vmul.f32 -1.442695, %v4867_v20 }
0x16a5   : > { %6427 = vpow2.f32 %v5863_v7 }
0x16af   : > { %v6428_v37 = vpop.eup %6427 }
0x16b0   : > { %v4873_v4 = vadd.f32 1.0, %v6428_v37 }
0x16b2   : > { %6429 = vrcp.f32 %v4873_v4 }
0x16bc   : > { %v6430_v5 = vpop.eup %6429 }
0x16bd   : > { %v5286_v30 = vrot.slane %v6430_v5, %v8709_v44  ;;  %v5274_v58 = vrot.slane %v6430_v5, %v6888_v3  ;;  %v4877_v25 = vmul.f32 %v6430_v5, %v8160_v27  ;;  %v5072_v44 = vrot.slane %v5058_v60, %v8710_v9 }
0x16bf   : > { %5289 = vbcast.lane.b32.xlu0 %v5286_v30, 272  ;;  %5277 = vbcast.lane.b32.xlu1 %v5274_v58, 272  ;;  %v4878_v14 = vadd.f32 %v5850_v50, %v4877_v25  ;;  %v5095_v57 = vrot.slane %v5072_v44, %v8711_v10  ;;  %v5088_v42 = vcombine.high %v5072_v44, %v8706_v62 }
0x16c1   : > { %5864 = vst.msk [vmem:[%s6662_s11 + $0x6] sm:$0x3] %vm949_vm6, %v4878_v14  ;;  %v5105_v56 = vcombine.high %v5095_v57, %v8706_v62  ;;  %v8276_v55 = vrot.slane %v5088_v42, %v8711_v10 }
0x16c3   : > { %5189 = vrot.lane.b32.xlu0 %v4997_v29, %s6536_s24  ;;  %5281 = vbcast.lane.b32.xlu1 %v5274_v58, 280 }
0x16c7   : > { %5197 = vrot.lane.b32.xlu0 %v5007_v0, %s6538_s17  ;;  %5293 = vbcast.lane.b32.xlu1 %v5286_v30, 280  ;;  %v5110_v27 = vpop.permute.xlu0 %5109 }
0x16c8   : > { %v5219_v2 = vsel %vm527_vm1, %v8170_v39, %v5110_v27 }
0x16cb   : > { %5205 = vrot.lane.b32.xlu0 %v8264_v46, %s6539_s26  ;;  %5191 = vrot.lane.b32.xlu1 %v5095_v57, %s6536_s24  ;;  %v5118_v22 = vpop.permute.xlu0 %5117  ;;  %v5112_v49 = vpop.permute.xlu1 %5111 }
0x16cc   : > { %v5221_v53 = vsel %vm1291_vm7, %v5219_v2, %v5118_v22  ;;  %v5220_v12 = vsel %vm527_vm1, %v8185_v59, %v5112_v49 }
0x16cf   : > { %5199 = vrot.lane.b32.xlu1 %v5105_v56, %s6538_s17  ;;  %v5134_v24 = vpop.permute.xlu0 %5133  ;;  %v5120_v11 = vpop.permute.xlu1 %5119 }
0x16d0   : > { %v5222_v39 = vsel %vm1291_vm7, %v5220_v12, %v5120_v11 }
0x16d3   : > { %5207 = vrot.lane.b32.xlu1 %v8276_v55, %s6539_s26  ;;  %v5166_v32 = vpop.permute.xlu0 %5165  ;;  %v5136_v26 = vpop.permute.xlu1 %5135 }
0x16d4   : > { %v5233_v36 = vsel %vm527_vm1, %v8195_v63, %v5166_v32 }
0x16d7   : > { %v5174_v31 = vpop.permute.xlu0 %5173  ;;  %v5168_v43 = vpop.permute.xlu1 %5167 }
0x16d8   : > { %v5235_v17 = vsel %vm1291_vm7, %v5233_v36, %v5174_v31  ;;  %v5234_v59 = vsel %vm527_vm1, %v8209_v54, %v5168_v43 }
0x16db   : > { %v5126_v15 = vpop.permute.xlu0 %5125  ;;  %v5176_v28 = vpop.permute.xlu1 %5175 }
0x16dc   : > { %v5223_v35 = vsel %vm1294_vm8, %v5221_v53, %v5126_v15  ;;  %v5236_v38 = vsel %vm1291_vm7, %v5234_v59, %v5176_v28 }
0x16dd   : > { %v5225_v45 = vsel %vm1297_vm9, %v5223_v35, %v5134_v24 }
0x16df   : > { %v5142_v40 = vpop.permute.xlu0 %5141  ;;  %v5128_v51 = vpop.permute.xlu1 %5127 }
0x16e0   : > { %v5227_v61 = vsel %vm1300_vm10, %v5225_v45, %v5142_v40  ;;  %v5224_v63 = vsel %vm1294_vm8, %v5222_v39, %v5128_v51 }
0x16e1   : > { %v5226_v47 = vsel %vm1297_vm9, %v5224_v63, %v5136_v26 }
0x16e3   : > { %v5150_v33 = vpop.permute.xlu0 %5149  ;;  %v5144_v21 = vpop.permute.xlu1 %5143 }
0x16e4   : > { %v8295_v34 = vsel %vm1303_vm11, %v5227_v61, %v5150_v33  ;;  %v5228_v54 = vsel %vm1300_vm10, %v5226_v47, %v5144_v21 }
0x16e7   : > { %v5182_v1 = vpop.permute.xlu0 %5181  ;;  %v5152_v16 = vpop.permute.xlu1 %5151 }
0x16e8   : > { %v5237_v52 = vsel %vm1294_vm8, %v5235_v17, %v5182_v1  ;;  %v5230_v8 = vsel %vm1303_vm11, %v5228_v54, %v5152_v16 }
0x16eb   : > { %v5184_v41 = vpop.permute.xlu1 %5183  ;;  %v8304_v37 = vpop.permute.xlu0 %5157 }
0x16ec   : > { %v5238_v20 = vsel %vm1294_vm8, %v5236_v38, %v5184_v41 }
0x16ef   : > { %v5160_v48 = vpop.permute.xlu1 %5159 }
0x16f0   : > { %v8302_v7 = vsel %vm1306_vm12, %v5230_v8, %v5160_v48 }
0x1731   : > { %v5290_v4 = vpop.permute.xlu0 %5289  ;;  %v5278_v18 = vpop.permute.xlu1 %5277 }
0x1732   : > { %v5400_v5 = vrot.slane %v5290_v4, %v8710_v9  ;;  %v5302_v50 = vrot.slane %v5278_v18, %v8710_v9  ;;  %v5295_v24 = vcombine.high %v5278_v18, %v8706_v62  ;;  %v5393_v39 = vcombine.high %v5290_v4, %v8706_v62 }
0x1734   : > { %v8309_v13 = vrot.slane %v5400_v5, %v8711_v10  ;;  %v8312_v30 = vrot.slane %v5302_v50, %v8711_v10  ;;  %v5310_v57 = vcombine.high %v5302_v50, %v8706_v62  ;;  %v5408_v56 = vcombine.high %v5400_v5, %v8706_v62 }
0x1735   : > { %v5190_v58 = vpop.permute.xlu0 %5189  ;;  %v5282_v25 = vpop.permute.xlu1 %5281  ;;  %v5309_v36 = vrot.slane %v5295_v24, %v8710_v9  ;;  %v5407_v43 = vrot.slane %v5393_v39, %v8710_v9 }
0x1736   : > { %v5438_v14 = vcombine.high %v8309_v13, %v8706_v62  ;;  %v5340_v29 = vcombine.high %v8312_v30, %v8706_v62  ;;  %v8319_v60 = vsel %vm1297_vm9, %v5237_v52, %v5190_v58  ;;  %v5351_v6 = vrot.slane %v5282_v25, %v8710_v9 }
0x1737   : > { %v5324_v12 = vrot.slane %v5310_v57, %v8711_v10  ;;  %v5422_v32 = vrot.slane %v5408_v56, %v8711_v10  ;;  %v5344_v31 = vcombine.high %v5282_v25, %v8706_v62  ;;  %v5332_v59 = vrot.slane %v5309_v36, %v8711_v10 }
0x1738   : > { %5495 = vrot.lane.b32.xlu1 %v5438_v14, %s6534_s29  ;;  %5493 = vrot.lane.b32.xlu0 %v5340_v29, %s6534_s29  ;;  %v8325_v0 = vrot.slane %v5351_v6, %v8711_v10  ;;  %v5359_v11 = vcombine.high %v5351_v6, %v8706_v62  ;;  %v5430_v45 = vrot.slane %v5407_v43, %v8711_v10 }
0x1739   : > { %v5294_v44 = vpop.permute.xlu1 %5293  ;;  %v5358_v28 = vrot.slane %v5344_v31, %v8710_v9  ;;  %v5341_v51 = vcombine.high %v5324_v12, %v8706_v62  ;;  %v5439_v63 = vcombine.high %v5422_v32, %v8706_v62  ;;  %v5342_v33 = vcombine.high %v5332_v59, %v8706_v62 }
0x173a   : > { %v5449_v27 = vrot.slane %v5294_v44, %v8710_v9  ;;  %v5389_v2 = vcombine.high %v8325_v0, %v8706_v62  ;;  %v5373_v17 = vrot.slane %v5359_v11, %v8711_v10  ;;  %v5442_v15 = vcombine.high %v5294_v44, %v8706_v62 }
0x173b   : > { %v5381_v40 = vrot.slane %v5358_v28, %v8711_v10  ;;  %v5440_v21 = vcombine.high %v5430_v45, %v8706_v62  ;;  %v5325_v54 = vcombine.high %v5309_v36, %v8706_v62  ;;  %v5423_v52 = vcombine.high %v5407_v43, %v8706_v62 }
0x173c   : > { %v8332_v22 = vrot.slane %v5449_v27, %v8711_v10  ;;  %5549 = vrot.lane.b32.xlu0 %v5389_v2, %s6534_s29  ;;  %v5457_v26 = vcombine.high %v5449_v27, %v8706_v62  ;;  %v5456_v38 = vrot.slane %v5442_v15, %v8710_v9  ;;  %v5390_v47 = vcombine.high %v5373_v17, %v8706_v62 }
0x173d   : > { %v5192_v42 = vpop.permute.xlu1 %5191  ;;  %v5391_v1 = vcombine.high %v5381_v40, %v8706_v62  ;;  %v5374_v8 = vcombine.high %v5358_v28, %v8706_v62  ;;  %v5339_v41 = vrot.slane %v5325_v54, %v8711_v10  ;;  %v5437_v48 = vrot.slane %v5423_v52, %v8711_v10 }
0x173e   : > { %v8336_v53 = vsel %vm1297_vm9, %v5238_v20, %v5192_v42  ;;  %v5487_v49 = vcombine.high %v8332_v22, %v8706_v62  ;;  %v5471_v35 = vrot.slane %v5457_v26, %v8711_v10  ;;  %v5479_v61 = vrot.slane %v5456_v38, %v8711_v10 }
0x173f   : > { %v5472_v20 = vcombine.high %v5456_v38, %v8706_v62  ;;  %v5388_v4 = vrot.slane %v5374_v8, %v8711_v10  ;;  %v5343_v5 = vcombine.high %v5339_v41, %v8706_v62  ;;  %v5441_v50 = vcombine.high %v5437_v48, %v8706_v62 }
0x1740   : > { %5551 = vrot.lane.b32.xlu1 %v5487_v49, %s6534_s29  ;;  %5501 = vrot.lane.b32.xlu0 %v5324_v12, %s6535_s23  ;;  %v5488_v9 = vcombine.high %v5471_v35, %v8706_v62  ;;  %v5489_v16 = vcombine.high %v5479_v61, %v8706_v62  ;;  %s8406_s29 = scalar_lea.hbm %s8554_s8, %s5872_s18  ;;  %v5008_v25 = vcombine.high %v8264_v46, %v8706_v62 }
0x1741   : > { %v5486_v18 = vrot.slane %v5472_v20, %v8711_v10  ;;  %v5392_v58 = vcombine.high %v5388_v4, %v8706_v62 }
0x1743   : > { %v5490_v10 = vcombine.high %v5486_v18, %v8706_v62 }
0x1744   : > { %5503 = vrot.lane.b32.xlu1 %v5422_v32, %s6535_s23  ;;  %5557 = vrot.lane.b32.xlu0 %v5373_v17, %s6535_s23 }
0x1748   : > { %5559 = vrot.lane.b32.xlu1 %v5471_v35, %s6535_s23  ;;  %5517 = vrot.lane.b32.xlu0 %v5332_v59, %s6536_s24 }
0x174c   : > { %5519 = vrot.lane.b32.xlu1 %v5430_v45, %s6536_s24  ;;  %5573 = vrot.lane.b32.xlu0 %v5381_v40, %s6536_s24 }
0x1750   : > { %5575 = vrot.lane.b32.xlu1 %v5479_v61, %s6536_s24  ;;  %5509 = vrot.lane.b32.xlu0 %v5341_v51, %s6537_s16  ;;  %s5687_s24 = sshll.u32 %s6662_s11, 4  ;;  %s6437_s11 = sshll.u32 %s6540_s22, 4  ;;  %s8410_s24 = int_to_ptr.vmem [resolvable:$true] %s5687_s24  ;;  %s6438_s11 = int_to_ptr.vmem [resolvable:$false] %s6437_s11 }
0x1751   : > { %s6439_s25 = scalar_lea.vmem %s6438_s11, 256  ;;  %p6440_p1 = scmp.lt.s32.totalorder %s8410_s24, %s6438_s11 }
0x1754   : > { %5511 = vrot.lane.b32.xlu1 %v5439_v63, %s6537_s16  ;;  %5565 = vrot.lane.b32.xlu0 %v5390_v47, %s6537_s16 }
0x1758   : > { %5567 = vrot.lane.b32.xlu1 %v5488_v9, %s6537_s16  ;;  %5525 = vrot.lane.b32.xlu0 %v5342_v33, %s6538_s17  ;;  %s8713_s16 = sand.u32 1, %s6517_s10  }
0x175c   : > { %5527 = vrot.lane.b32.xlu1 %v5440_v21, %s6538_s17  ;;  %5581 = vrot.lane.b32.xlu0 %v5391_v1, %s6538_s17 }
0x1760   : > { %5583 = vrot.lane.b32.xlu1 %v5489_v16, %s6538_s17  ;;  %5533 = vrot.lane.b32.xlu0 %v5339_v41, %s6539_s26  ;;  %s8416_s17 = scalar_lea.sflag [#allocation3], %s8713_s16 }
0x1764   : > { %5535 = vrot.lane.b32.xlu1 %v5437_v48, %s6539_s26  ;;  %5589 = vrot.lane.b32.xlu0 %v5388_v4, %s6539_s26 }
0x1768   : > { %5591 = vrot.lane.b32.xlu1 %v5486_v18, %s6539_s26  ;;  %5541 = vrot.lane.b32.xlu0 %v5343_v5, %s6530_s21  ;;  %s6433_s26 = scalar_lea.vmem %s8410_s24, 128 }
0x1769   : > { %p6434_p12 = scmp.ne.s32.totalorder %s8410_s24, %s6433_s26  ;;  %p6441_p3 = scmp.lt.s32.totalorder %s6439_s25, %s6433_s26 }
0x176b   : > { %p6435_p13 = pnand %p6434_p12, %p6633_p5  ;;  %p6442_p4 = por %p6441_p3, %p6440_p1 }
0x176c   : > { %5543 = vrot.lane.b32.xlu1 %v5441_v50, %s6530_s21  ;;  %5597 = vrot.lane.b32.xlu0 %v5392_v58, %s6530_s21 }
0x176d   : > { %p6436_p0 = pneg %p6435_p13 }
0x176f   : > { %p6443_p7 = pnand %p6442_p4, %p6436_p0 }
0x1771   : > { %6446 = shalt.err (!%p6443_p7)
}
0x1772   : > { %s6447_s28 = scalar_lea.hbm %s8406_s29, 128  ;;  %s6451_s14 = scalar_lea.hbm %s8554_s8, 256 }
0x1773   : > { %p6448_p8 = scmp.ne.s32.totalorder %s8406_s29, %s6447_s28  ;;  %p6452_p11 = scmp.lt.u32.totalorder %s8406_s29, %s8554_s8 }
0x1774   : > { %p6453_p12 = scmp.lt.u32.totalorder %s6451_s14, %s6447_s28  ;;  %p6455_p0 = scmp.lt.u32.totalorder %s6447_s28, %s8406_s29 }
0x1775   : > { %p6449_p9 = pnand %p6448_p8, %p6633_p5 }
0x1776   : > { %p6454_p13 = por %p6453_p12, %p6452_p11 }
0x1777   : > { %p6450_p10 = pneg %p6449_p9 }
0x1778   : > { %p6456_p1 = por %p6455_p0, %p6454_p13 }
0x177a   : > { %p6457_p3 = pnand %p6456_p1, %p6450_p10 }
0x177c   : > { %6460 = shalt.err (!%p6457_p3)
}
0x177d   : > { %s6541_s26 = smov 2   ;;  %5599 = vrot.lane.b32.xlu1 %v5490_v10, %s6530_s21  ;;  %5213 = vrot.lane.b32.xlu0 %v5008_v25, %s6530_s21  ;;  %v5106_v46 = vcombine.high %v8276_v55, %v8706_v62  ;;  %v5198_v14 = vpop.permute.xlu0 %5197  ;;  %v8447_v29 = vpop.permute.xlu1 %5199  ;;  %s6542_s19 = smov [#allocation4]  }
0x177e   : > { %6305 = dma.vmem_to_hbm [thread:$0]  (%p6633_p5), %s8410_s24, 128, %s8406_s29, %s8416_s17, %s6535_s23, %s6535_s23, %s6541_s26  }
0x1781   : > { %5215 = vrot.lane.b32.xlu1 %v5106_v46, %s6530_s21  ;;  %v5206_v6 = vpop.permute.xlu0 %5205  ;;  %v8449_v44 = vpop.permute.xlu1 %5207  ;;  %s5701_s21 = sshll.u32 %s6542_s19, 4  ;;  %s5702_s21 = int_to_ptr.vmem [resolvable:$true] %s5701_s21 }
0x1782   : > { %s6461_s23 = scalar_lea.vmem %s5702_s21, 256  ;;  %p6468_p8 = scmp.lt.s32.totalorder %s5702_s21, %s5702_s21 }
0x1783   : > { %p6462_p5 = scmp.ne.s32.totalorder %s5702_s21, %s6461_s23  ;;  %p6469_p9 = scmp.lt.s32.totalorder %s6461_s23, %s6461_s23 }
0x1785   : > { %p6463_p4 = pnand %p6462_p5, %p225_p2  ;;  %p6470_p10 = por %p6469_p9, %p6468_p8 }
0x1787   : > { %p6464_p7 = pneg %p6463_p4 }
0x1789   : > { %p6471_p11 = pnand %p6470_p10, %p6464_p7 }
0x17aa   : > { %v5494_v27 = vpop.permute.xlu0 %5493  ;;  %v5496_v57 = vpop.permute.xlu1 %5495 }
0x17ab   : > { %v5603_v28 = vsel %vm527_vm1, %v8312_v30, %v5494_v27  ;;  %v5604_v63 = vsel %vm527_vm1, %v8309_v13, %v5496_v57 }
0x17ae   : > { %v5550_v2 = vpop.permute.xlu0 %5549 }
0x17af   : > { %v5617_v61 = vsel %vm527_vm1, %v8325_v0, %v5550_v2 }
0x17b2   : > { %v5552_v42 = vpop.permute.xlu1 %5551  ;;  %v5502_v56 = vpop.permute.xlu0 %5501 }
0x17b3   : > { %v5605_v38 = vsel %vm1291_vm7, %v5603_v28, %v5502_v56  ;;  %v5618_v30 = vsel %vm527_vm1, %v8332_v22, %v5552_v42  ;;  %v5231_v42 = vsel %vm1306_vm12, %v8295_v34, %v8304_v37  ;;  %v5241_v56 = vsel %vm1300_vm10, %v8319_v60, %v5198_v14 }
0x17b4   : > { %v5250_v34 = vrot.slane %v5231_v42, %v6888_v3  ;;  %v5242_v37 = vsel %vm1300_vm10, %v8336_v53, %v8447_v29 }
0x17b5   : > { %v5244_v14 = vsel %vm1303_vm11, %v5242_v37, %v8449_v44 }
0x17b6   : > { %v5504_v49 = vpop.permute.xlu1 %5503  ;;  %v5558_v24 = vpop.permute.xlu0 %5557 }
0x17b7   : > { %v5619_v47 = vsel %vm1291_vm7, %v5617_v61, %v5558_v24  ;;  %v5606_v9 = vsel %vm1291_vm7, %v5604_v63, %v5504_v49 }
0x17ba   : > { %v5560_v12 = vpop.permute.xlu1 %5559  ;;  %v5518_v11 = vpop.permute.xlu0 %5517 }
0x17bb   : > { %v5620_v52 = vsel %vm1291_vm7, %v5618_v30, %v5560_v12  ;;  %v5243_v12 = vsel %vm1303_vm11, %v5241_v56, %v5206_v6 }
0x17be   : > { %v5520_v39 = vpop.permute.xlu1 %5519  ;;  %v5574_v32 = vpop.permute.xlu0 %5573 }
0x17c2   : > { %v5576_v62 = vpop.permute.xlu1 %5575  ;;  %v5510_v55 = vpop.permute.xlu0 %5509 }
0x17c3   : > { %v5607_v51 = vsel %vm1294_vm8, %v5605_v38, %v5510_v55 }
0x17c4   : > { %v5609_v1 = vsel %vm1297_vm9, %v5607_v51, %v5518_v11 }
0x17c6   : > { %v5512_v26 = vpop.permute.xlu1 %5511  ;;  %v5566_v36 = vpop.permute.xlu0 %5565 }
0x17c7   : > { %v5621_v33 = vsel %vm1294_vm8, %v5619_v47, %v5566_v36  ;;  %v5608_v54 = vsel %vm1294_vm8, %v5606_v9, %v5512_v26 }
0x17c8   : > { %v5623_v8 = vsel %vm1297_vm9, %v5621_v33, %v5574_v32  ;;  %v5610_v48 = vsel %vm1297_vm9, %v5608_v54, %v5520_v39 }
0x17ca   : > { %v5568_v31 = vpop.permute.xlu1 %5567  ;;  %v5526_v17 = vpop.permute.xlu0 %5525 }
0x17cb   : > { %v5611_v16 = vsel %vm1300_vm10, %v5609_v1, %v5526_v17  ;;  %v5622_v13 = vsel %vm1294_vm8, %v5620_v52, %v5568_v31 }
0x17cc   : > { %v5624_v58 = vsel %vm1297_vm9, %v5622_v13, %v5576_v62 }
0x17ce   : > { %v5528_v43 = vpop.permute.xlu1 %5527  ;;  %v5582_v15 = vpop.permute.xlu0 %5581 }
0x17cf   : > { %v5625_v20 = vsel %vm1300_vm10, %v5623_v8, %v5582_v15  ;;  %v5612_v18 = vsel %vm1300_vm10, %v5610_v48, %v5528_v43  ;;  %v5258_v15 = vrot.slane %v8302_v7, %v6888_v3 }
0x17d2   : > { %v5584_v35 = vpop.permute.xlu1 %5583  ;;  %v5534_v59 = vpop.permute.xlu0 %5533 }
0x17d3   : > { %v5613_v41 = vsel %vm1303_vm11, %v5611_v16, %v5534_v59  ;;  %v5626_v46 = vsel %vm1300_vm10, %v5624_v58, %v5584_v35 }
0x17d6   : > { %v5536_v45 = vpop.permute.xlu1 %5535  ;;  %v5590_v40 = vpop.permute.xlu0 %5589 }
0x17d7   : > { %v5627_v5 = vsel %vm1303_vm11, %v5625_v20, %v5590_v40  ;;  %v5614_v10 = vsel %vm1303_vm11, %v5612_v18, %v5536_v45 }
0x17da   : > { %v5592_v21 = vpop.permute.xlu1 %5591  ;;  %v5542_v0 = vpop.permute.xlu0 %5541 }
0x17db   : > { %v5615_v22 = vsel %vm1306_vm12, %v5613_v41, %v5542_v0  ;;  %v5628_v49 = vsel %vm1303_vm11, %v5626_v46, %v5592_v21 }
0x17dc   : > { %v5634_v27 = vrot.slane %v5615_v22, %v6888_v3 }
0x17de   : > { %v5544_v4 = vpop.permute.xlu1 %5543  ;;  %v5598_v50 = vpop.permute.xlu0 %5597 }
0x17df   : > { %v5629_v25 = vsel %vm1306_vm12, %v5627_v5, %v5598_v50  ;;  %v5616_v2 = vsel %vm1306_vm12, %v5614_v10, %v5544_v4 }
0x17e0   : > { %v5638_v57 = vrot.slane %v5629_v25, %v6888_v3  ;;  %v5642_v62 = vrot.slane %v5616_v2, %v6888_v3 }
0x17e2   : > { %v5651_v11 = vcombine.low %v5634_v27, %v5638_v57 }
0x17e4   : > { %v5661_v31 = vmul.f32 %v5651_v11, %v8120_v19 }
0x17ef   : > { %v5600_v24 = vpop.permute.xlu1 %5599  ;;  %v5214_v39 = vpop.permute.xlu0 %5213 }
0x17f0   : > { %v5630_v32 = vsel %vm1306_vm12, %v5628_v49, %v5600_v24  ;;  %v5245_v55 = vsel %vm1306_vm12, %v5243_v12, %v5214_v39 }
0x17f1   : > { %v5646_v26 = vrot.slane %v5630_v32, %v6888_v3  ;;  %v5254_v60 = vrot.slane %v5245_v55, %v6888_v3 }
0x17f3   : > { %v5652_v6 = vcombine.low %v5642_v62, %v5646_v26  ;;  %v5216_v36 = vpop.permute.xlu1 %5215  ;;  %v5267_v17 = vcombine.low %v5250_v34, %v5254_v60 }
0x17f4   : > { %v5246_v43 = vsel %vm1306_vm12, %v5244_v14, %v5216_v36 }
0x17f5   : > { %v5262_v35 = vrot.slane %v5246_v43, %v6888_v3  ;;  %v5663_v59 = vadd.f32 %v5661_v31, %v5267_v17  ;;  %v5662_v53 = vmul.f32 %v5652_v6, %v8122_v23 }
0x17f7   : > { %v5268_v29 = vcombine.low %v5258_v15, %v5262_v35 }
0x17f9   : > { %v5664_v44 = vadd.f32 %v5662_v53, %v5268_v29 }
0x17fb   : > { %v5667_v28 = vcombine.low %v5663_v59, %v5664_v44  ;;  %v5668_v45 = vcombine.high %v5663_v59, %v5664_v44 }
0x17fd   : > { %5671 = vst [vmem:[#allocation4] sm:$0xff] %v5667_v28  ;;  %5672 = vst [vmem:[#allocation4 + $0x8] sm:$0xff] %v5668_v45 }
0x17fe   : > { %6474 = shalt.err (!%p6471_p11)
}
0x17ff   : > { %s6475_s17 = scalar_lea.hbm %s8555_s9, 256 }
0x1800   : > { %p6476_p12 = scmp.ne.s32.totalorder %s8555_s9, %s6475_s17  ;;  %p6481_p1 = scmp.lt.u32.totalorder %s6475_s17, %s8555_s9 }
0x1802   : > { %p6477_p13 = pnand %p6476_p12, %p225_p2 }
0x1804   : > { %p6478_p0 = pneg %p6477_p13 }
0x1806   : > { %p6483_p3 = pnand %p6481_p1, %p6478_p0 }
0x1808   : > { %6486 = shalt.err (!%p6483_p3)
}
0x1809   : > { %6307 = dma.vmem_to_hbm [thread:$0]  (%p225_p2), %s5702_s21, 256, %s8555_s9, [#allocation5]  }
0x180a   : > { %6504 = dma.done.wait (%p225_p2), [#allocation5], 256  }
0x180b   : > { %6506 = vsyncadd (%p225_p2), [#allocation5], 4294967040 }
0x180c PF: > { %p6317_p5 = scmp.ge.s32.totalorder %s6525_s12, 2  ;;  %s5717_s16 = sand.u32 1, %s6513_s30  }
0x180d   : > { %s5718_s22 = scalar_lea.sflag [#allocation3], %s5717_s16 }
0x180e   : > { %p6312_p4 = pnand %p6317_p5, %p6637_p6 }
0x1810   : > { %6508 = dma.done.wait (!%p6312_p4), %s5718_s22, 128  }
0x1811   : > { %6510 = vsyncadd (!%p6312_p4), %s5718_s22, 4294967168  ;;  %s8714_s26 = sld [smem:[#allocation8_spill]]  ;;  %s8715_s11 = sld [smem:[#allocation9_spill]] }
0x1812   : > { %p21_p7 = scmp.ge.s32.totalorder %s6618_s15, 4   ;;  %s8716_s30 = smov %s6517_s10 }
0x1813   : > { %s8718_s12 = smov %s6618_s15 }
0x1814   :  { %23 = sbr.rel (!%p21_p7) target bundleno = 4 (0x4), region = 117 }
0x1817   : > { %s8717_s10 = smov %s8714_s26 }
0x181b   :  { %5723 = vsyncpa [#allocation3], 1 }
0x181c   :  { %5725 = vsyncpa [#allocation3 + $0x1], 1 }
0x181d   :  { %5726 = vsyncpa [#allocation5], 1 }

</bundles_post_ra>
